<compile_context>
chip_gen: v6e
topology: v6e:2x2x1
jax: 0.10.0
libtpu: 0.0.40
codegen_flags: <defaults>
</compile_context>

<pallas_src>
import jax
import jax.numpy as jnp
from jax.experimental import pallas as pl
from jax.experimental.pallas import tpu as pltpu

D_IN = 512
D_HID = 512
N_OUT = 10
N_PAD = 128    # last layer padded to full lane width


def label_predictor_kernel(x_ref, w1_ref, b1_ref, w2_ref, b2_ref, w3_ref, b3_ref, o_ref):
    half = x_ref.shape[0] // 2  # static: two unrolled M sub-blocks

    w1, w2, w3 = w1_ref[...], w2_ref[...], w3_ref[...]
    b1, b2, b3 = b1_ref[...], b2_ref[...], b3_ref[...]

    # Cast f32 -> bf16 on the VPU here (no standalone wrapper convert op).
    x0 = x_ref[0:half, :].astype(jnp.bfloat16)
    x1 = x_ref[half:, :].astype(jnp.bfloat16)

    # Layer 1: fused Linear+BN (pre-folded weights), bias + ReLU in f32.
    # Two sub-blocks let the scheduler overlap sub-block 1's matmul with
    # sub-block 0's VPU epilogue (and vice versa at each layer boundary).
    h0 = jnp.maximum(jnp.dot(x0, w1, preferred_element_type=jnp.float32) + b1, 0.0)
    h1 = jnp.maximum(jnp.dot(x1, w1, preferred_element_type=jnp.float32) + b1, 0.0)

    # Layer 2: fused Linear+BN, ReLU.  (Dropout = identity in eval mode.)
    g0 = jnp.maximum(
        jnp.dot(h0.astype(jnp.bfloat16), w2, preferred_element_type=jnp.float32) + b2, 0.0)
    g1 = jnp.maximum(
        jnp.dot(h1.astype(jnp.bfloat16), w2, preferred_element_type=jnp.float32) + b2, 0.0)

    # Layer 3: Linear(512 -> 10), zero-padded to 128 lanes; store as bf16.
    o_ref[0:half, :] = (
        jnp.dot(g0.astype(jnp.bfloat16), w3, preferred_element_type=jnp.float32) + b3
    ).astype(o_ref.dtype)
    o_ref[half:, :] = (
        jnp.dot(g1.astype(jnp.bfloat16), w3, preferred_element_type=jnp.float32) + b3
    ).astype(o_ref.dtype)


def _round_up(n, m):
    return ((n + m - 1) // m) * m


def _choose_tile_m(batch):
    """Big tiles (amortize ~0.35 us/step), but keep >= 2 grid steps for v7x's 2 TCs."""
    tile = min(1024, _round_up(batch, 256))
    if batch > 256:
        tile = min(tile, _round_up(-(-batch // 2), 256))
    return tile


def label_predictor(x, params):
    """x: [B, 512] float32 -> logits [B, 10] float32 (eval-mode forward)."""
    w1, b1, w2, b2, w3, b3 = params
    B = x.shape[0]
    tile_m = _choose_tile_m(B)
    n_tiles = pl.cdiv(B, tile_m)

    def resident(shape):
        # Full-array block, constant index_map -> fetched once, VMEM-resident.
        return pl.BlockSpec(shape, lambda i: (0, 0))

    out = pl.pallas_call(
        label_predictor_kernel,
        out_shape=jax.ShapeDtypeStruct((B, N_PAD), jnp.bfloat16),
        grid=(n_tiles,),
        in_specs=[
            # x streamed as f32; ragged tail rows (if B % tile_m != 0) are
            # unspecified but safe: rows are independent and wrapper keeps [:B].
            # NOTE: if xprof shows exposed DMA on x, add pipeline_mode=pl.Buffered(3).
            pl.BlockSpec((tile_m, D_IN), lambda i: (i, 0)),
            resident((D_IN, D_HID)), resident((1, D_HID)),
            resident((D_HID, D_HID)), resident((1, D_HID)),
            resident((D_HID, N_PAD)), resident((1, N_PAD)),
        ],
        out_specs=pl.BlockSpec((tile_m, N_PAD), lambda i: (i, 0)),
        compiler_params=pltpu.CompilerParams(
            dimension_semantics=("parallel",),
            vmem_limit_bytes=32 * 1024 * 1024,
        ),
    )(x, w1, b1, w2, b2, w3, b3)

    return out[:, :N_OUT].astype(jnp.float32)


def make_params(key):
    """Deterministic synthetic parameters with PyTorch-equivalent shapes.

    PyTorch stores Linear weight as (out, in); we keep the transposed (in, out)
    layout.  BatchNorm1d (eval) with gamma, beta, running_mean, running_var,
    eps is represented as scale = gamma / sqrt(var + eps), shift = beta - mean*scale.
    """
    eps = 1e-5
    ks = jax.random.split(key, 12)

    def linear(kw, kb, fan_in, fan_out):
        bound = 1.0 / jnp.sqrt(fan_in)
        w = jax.random.uniform(kw, (fan_in, fan_out), jnp.float32, -bound, bound)
        b = jax.random.uniform(kb, (1, fan_out), jnp.float32, -bound, bound)
        return w, b

    def bn(kg, kb, km, kv, feat):
        gamma = 1.0 + 0.1 * jax.random.normal(kg, (1, feat), jnp.float32)
        beta = 0.1 * jax.random.normal(kb, (1, feat), jnp.float32)
        mean = 0.1 * jax.random.normal(km, (1, feat), jnp.float32)
        var = jnp.abs(jax.random.normal(kv, (1, feat), jnp.float32)) + 0.5
        scale = gamma / jnp.sqrt(var + eps)
        shift = beta - mean * scale
        return scale, shift

    w1, b1 = linear(ks[0], ks[1], D_IN, D_HID)
    s1, t1 = bn(ks[2], ks[3], ks[4], ks[5], D_HID)
    w2, b2 = linear(ks[6], ks[7], D_HID, D_HID)
    s2, t2 = bn(ks[8], ks[9], ks[10], ks[11], D_HID)
    w3, b3 = linear(ks[0], ks[6], D_HID, N_OUT)  # reuse keys deterministically
    return (w1, b1, s1, t1, w2, b2, s2, t2, w3, b3)


def fold_params(raw):
    """Fold BN affine + Linear bias into the weights; pad last layer to 128 lanes."""
    (w1, b1, s1, t1, w2, b2, s2, t2, w3, b3) = raw
    w1f = (w1 * s1).astype(jnp.bfloat16)           # (512, 512)
    b1f = (b1 * s1 + t1).astype(jnp.float32)       # (1, 512)
    w2f = (w2 * s2).astype(jnp.bfloat16)           # (512, 512)
    b2f = (b2 * s2 + t2).astype(jnp.float32)       # (1, 512)
    # Keep w3 AND b3 zero-padded together so padded logit lanes stay exactly 0.
    w3f = jnp.pad(w3, ((0, 0), (0, N_PAD - N_OUT))).astype(jnp.bfloat16)  # (512, 128)
    b3f = jnp.pad(b3, ((0, 0), (0, N_PAD - N_OUT))).astype(jnp.float32)   # (1, 128)
    return (w1f, b1f, w2f, b2f, w3f, b3f)


def reference_folded_bf16(x, params):
    """Same folded-weight / bf16-operand / bf16-output structure as the kernel."""
    w1, b1, w2, b2, w3, b3 = params
    h = jnp.dot(x.astype(jnp.bfloat16), w1, preferred_element_type=jnp.float32)
    h = jnp.maximum(h + b1, 0.0)
    h = jnp.dot(h.astype(jnp.bfloat16), w2, preferred_element_type=jnp.float32)
    h = jnp.maximum(h + b2, 0.0)
    out = jnp.dot(h.astype(jnp.bfloat16), w3, preferred_element_type=jnp.float32) + b3
    out = out.astype(jnp.bfloat16).astype(jnp.float32)
    return out[:, :N_OUT]


def reference_f32(x, raw):
    """Original module math in full f32 (eval mode)."""
    (w1, b1, s1, t1, w2, b2, s2, t2, w3, b3) = raw
    h = jnp.maximum((x @ w1 + b1) * s1 + t1, 0.0)
    h = jnp.maximum((h @ w2 + b2) * s2 + t2, 0.0)
    return h @ w3 + b3


if __name__ == "__main__":
    key = jax.random.PRNGKey(0)
    kx, kp = jax.random.split(key)

    # B deliberately NOT a multiple of the tile: exercises the ragged tail and
    # gives 2 grid steps (tile_m = 256 here, so both v7x TensorCores get work).
    B = 300
    x = jax.random.normal(kx, (B, D_IN), jnp.float32)
    raw = make_params(kp)
    params = fold_params(raw)

    out = jax.block_until_ready(label_predictor(x, params))
    assert out.shape == (B, N_OUT) and out.dtype == jnp.float32

    # Structural check: same folded weights / bf16 matmul operands / bf16 store.
    ref_b = reference_folded_bf16(x, params)
    assert jnp.allclose(out, ref_b, atol=2e-2, rtol=2e-2)

    # Semantic check vs the original full-f32 module math (looser tol: bf16 operands).
    ref_f = reference_f32(x, raw)
    assert jnp.allclose(out, ref_f, atol=5e-2, rtol=5e-2)

    print("KERNEL_OK")
</pallas_src>

<mosaic_0001>
module attributes {stable_mosaic.version = 11 : i64} {
  func.func @label_predictor_kernel(%arg0: i32, %arg1: memref<256x512xf32, #tpu.memory_space<vmem>>, %arg2: memref<512x512xbf16, #tpu.memory_space<vmem>>, %arg3: memref<1x512xf32, #tpu.memory_space<vmem>>, %arg4: memref<512x512xbf16, #tpu.memory_space<vmem>>, %arg5: memref<1x512xf32, #tpu.memory_space<vmem>>, %arg6: memref<512x128xbf16, #tpu.memory_space<vmem>>, %arg7: memref<1x128xf32, #tpu.memory_space<vmem>>, %arg8: memref<256x128xbf16, #tpu.memory_space<vmem>>) attributes {dimension_semantics = [#tpu.dimension_semantics<parallel>], iteration_bounds = array<i64: 2>, scalar_prefetch = 0 : i64, scratch_operands = 0 : i64, tpu.core_type = #tpu.core_type<tc>, window_params = [{transform_indices = @transform_0, window_bounds = array<i64: 256, 512>}, {pipeline_mode = #tpu.pipeline_mode<synchronous>, transform_indices = @transform_1, window_bounds = array<i64: 512, 512>}, {pipeline_mode = #tpu.pipeline_mode<synchronous>, transform_indices = @transform_2, window_bounds = array<i64: 1, 512>}, {pipeline_mode = #tpu.pipeline_mode<synchronous>, transform_indices = @transform_3, window_bounds = array<i64: 512, 512>}, {pipeline_mode = #tpu.pipeline_mode<synchronous>, transform_indices = @transform_4, window_bounds = array<i64: 1, 512>}, {pipeline_mode = #tpu.pipeline_mode<synchronous>, transform_indices = @transform_5, window_bounds = array<i64: 512, 128>}, {pipeline_mode = #tpu.pipeline_mode<synchronous>, transform_indices = @transform_6, window_bounds = array<i64: 1, 128>}, {transform_indices = @transform_7, window_bounds = array<i64: 256, 128>}]} {
    %c0 = arith.constant 0 : index
    %c0_0 = arith.constant 0 : index
    %0 = vector.load %arg2[%c0, %c0_0] : memref<512x512xbf16, #tpu.memory_space<vmem>>, vector<512x512xbf16>
    %c0_1 = arith.constant 0 : index
    %c0_2 = arith.constant 0 : index
    %1 = vector.load %arg4[%c0_1, %c0_2] : memref<512x512xbf16, #tpu.memory_space<vmem>>, vector<512x512xbf16>
    %c0_3 = arith.constant 0 : index
    %c0_4 = arith.constant 0 : index
    %2 = vector.load %arg6[%c0_3, %c0_4] : memref<512x128xbf16, #tpu.memory_space<vmem>>, vector<512x128xbf16>
    %c0_5 = arith.constant 0 : index
    %c0_6 = arith.constant 0 : index
    %3 = vector.load %arg3[%c0_5, %c0_6] : memref<1x512xf32, #tpu.memory_space<vmem>>, vector<1x512xf32>
    %c0_7 = arith.constant 0 : index
    %c0_8 = arith.constant 0 : index
    %4 = vector.load %arg5[%c0_7, %c0_8] : memref<1x512xf32, #tpu.memory_space<vmem>>, vector<1x512xf32>
    %c0_9 = arith.constant 0 : index
    %c0_10 = arith.constant 0 : index
    %5 = vector.load %arg7[%c0_9, %c0_10] : memref<1x128xf32, #tpu.memory_space<vmem>>, vector<1x128xf32>
    %c0_11 = arith.constant 0 : index
    %c0_12 = arith.constant 0 : index
    %6 = vector.load %arg1[%c0_11, %c0_12] : memref<256x512xf32, #tpu.memory_space<vmem>>, vector<128x512xf32>
    %7 = arith.truncf %6 : vector<128x512xf32> to vector<128x512xbf16>
    %c128 = arith.constant 128 : index
    %c0_13 = arith.constant 0 : index
    %8 = vector.load %arg1[%c128, %c0_13] : memref<256x512xf32, #tpu.memory_space<vmem>>, vector<128x512xf32>
    %9 = arith.truncf %8 : vector<128x512xf32> to vector<128x512xbf16>
    %cst = arith.constant dense<0.000000e+00> : vector<128x512xf32>
    %10 = tpu.matmul %7, %0, %cst {dimension_numbers = #tpu.dot_dimension_numbers<[1], [0], [0], [1], [0, 0, 1, 1], [], []>} : vector<128x512xbf16>, vector<512x512xbf16>, vector<128x512xf32> -> vector<128x512xf32>
    %11 = vector.broadcast %3 : vector<1x512xf32> to vector<128x512xf32>
    %12 = arith.addf %10, %11 : vector<128x512xf32>
    %cst_14 = arith.constant 0.000000e+00 : f32
    %13 = vector.broadcast %cst_14 : f32 to vector<128x512xf32>
    %14 = arith.maximumf %12, %13 : vector<128x512xf32>
    %cst_15 = arith.constant dense<0.000000e+00> : vector<128x512xf32>
    %15 = tpu.matmul %9, %0, %cst_15 {dimension_numbers = #tpu.dot_dimension_numbers<[1], [0], [0], [1], [0, 0, 1, 1], [], []>} : vector<128x512xbf16>, vector<512x512xbf16>, vector<128x512xf32> -> vector<128x512xf32>
    %16 = vector.broadcast %3 : vector<1x512xf32> to vector<128x512xf32>
    %17 = arith.addf %15, %16 : vector<128x512xf32>
    %cst_16 = arith.constant 0.000000e+00 : f32
    %18 = vector.broadcast %cst_16 : f32 to vector<128x512xf32>
    %19 = arith.maximumf %17, %18 : vector<128x512xf32>
    %20 = arith.truncf %14 : vector<128x512xf32> to vector<128x512xbf16>
    %cst_17 = arith.constant dense<0.000000e+00> : vector<128x512xf32>
    %21 = tpu.matmul %20, %1, %cst_17 {dimension_numbers = #tpu.dot_dimension_numbers<[1], [0], [0], [1], [0, 0, 1, 1], [], []>} : vector<128x512xbf16>, vector<512x512xbf16>, vector<128x512xf32> -> vector<128x512xf32>
    %22 = vector.broadcast %4 : vector<1x512xf32> to vector<128x512xf32>
    %23 = arith.addf %21, %22 : vector<128x512xf32>
    %cst_18 = arith.constant 0.000000e+00 : f32
    %24 = vector.broadcast %cst_18 : f32 to vector<128x512xf32>
    %25 = arith.maximumf %23, %24 : vector<128x512xf32>
    %26 = arith.truncf %19 : vector<128x512xf32> to vector<128x512xbf16>
    %cst_19 = arith.constant dense<0.000000e+00> : vector<128x512xf32>
    %27 = tpu.matmul %26, %1, %cst_19 {dimension_numbers = #tpu.dot_dimension_numbers<[1], [0], [0], [1], [0, 0, 1, 1], [], []>} : vector<128x512xbf16>, vector<512x512xbf16>, vector<128x512xf32> -> vector<128x512xf32>
    %28 = vector.broadcast %4 : vector<1x512xf32> to vector<128x512xf32>
    %29 = arith.addf %27, %28 : vector<128x512xf32>
    %cst_20 = arith.constant 0.000000e+00 : f32
    %30 = vector.broadcast %cst_20 : f32 to vector<128x512xf32>
    %31 = arith.maximumf %29, %30 : vector<128x512xf32>
    %32 = arith.truncf %25 : vector<128x512xf32> to vector<128x512xbf16>
    %cst_21 = arith.constant dense<0.000000e+00> : vector<128x128xf32>
    %33 = tpu.matmul %32, %2, %cst_21 {dimension_numbers = #tpu.dot_dimension_numbers<[1], [0], [0], [1], [0, 0, 1, 1], [], []>} : vector<128x512xbf16>, vector<512x128xbf16>, vector<128x128xf32> -> vector<128x128xf32>
    %34 = vector.broadcast %5 : vector<1x128xf32> to vector<128x128xf32>
    %35 = arith.addf %33, %34 : vector<128x128xf32>
    %36 = arith.truncf %35 : vector<128x128xf32> to vector<128x128xbf16>
    %c0_22 = arith.constant 0 : index
    %c0_23 = arith.constant 0 : index
    %37 = vector.load %arg8[%c0_22, %c0_23] : memref<256x128xbf16, #tpu.memory_space<vmem>>, vector<128x128xbf16>
    tpu.vector_store %arg8[%c0_22, %c0_23], %36 {strides = array<i32>} : memref<256x128xbf16, #tpu.memory_space<vmem>>, vector<128x128xbf16>,
    %38 = arith.truncf %31 : vector<128x512xf32> to vector<128x512xbf16>
    %cst_24 = arith.constant dense<0.000000e+00> : vector<128x128xf32>
    %39 = tpu.matmul %38, %2, %cst_24 {dimension_numbers = #tpu.dot_dimension_numbers<[1], [0], [0], [1], [0, 0, 1, 1], [], []>} : vector<128x512xbf16>, vector<512x128xbf16>, vector<128x128xf32> -> vector<128x128xf32>
    %40 = vector.broadcast %5 : vector<1x128xf32> to vector<128x128xf32>
    %41 = arith.addf %39, %40 : vector<128x128xf32>
    %42 = arith.truncf %41 : vector<128x128xf32> to vector<128x128xbf16>
    %c128_25 = arith.constant 128 : index
    %c0_26 = arith.constant 0 : index
    %43 = vector.load %arg8[%c128_25, %c0_26] : memref<256x128xbf16, #tpu.memory_space<vmem>>, vector<128x128xbf16>
    tpu.vector_store %arg8[%c128_25, %c0_26], %42 {strides = array<i32>} : memref<256x128xbf16, #tpu.memory_space<vmem>>, vector<128x128xbf16>,
    return
  }
  func.func @transform_0(%arg0: i32) -> (i32, i32) {
    %c0_i32 = arith.constant 0 : i32
    %c0_i32_0 = arith.constant 0 : i32
    return %arg0, %c0_i32 : i32, i32
  }
  func.func @transform_1(%arg0: i32) -> (i32, i32) {
    %c0_i32 = arith.constant 0 : i32
    %c0_i32_0 = arith.constant 0 : i32
    %c0_i32_1 = arith.constant 0 : i32
    return %c0_i32, %c0_i32_0 : i32, i32
  }
  func.func @transform_2(%arg0: i32) -> (i32, i32) {
    %c0_i32 = arith.constant 0 : i32
    %c0_i32_0 = arith.constant 0 : i32
    %c0_i32_1 = arith.constant 0 : i32
    return %c0_i32, %c0_i32_0 : i32, i32
  }
  func.func @transform_3(%arg0: i32) -> (i32, i32) {
    %c0_i32 = arith.constant 0 : i32
    %c0_i32_0 = arith.constant 0 : i32
    %c0_i32_1 = arith.constant 0 : i32
    return %c0_i32, %c0_i32_0 : i32, i32
  }
  func.func @transform_4(%arg0: i32) -> (i32, i32) {
    %c0_i32 = arith.constant 0 : i32
    %c0_i32_0 = arith.constant 0 : i32
    %c0_i32_1 = arith.constant 0 : i32
    return %c0_i32, %c0_i32_0 : i32, i32
  }
  func.func @transform_5(%arg0: i32) -> (i32, i32) {
    %c0_i32 = arith.constant 0 : i32
    %c0_i32_0 = arith.constant 0 : i32
    %c0_i32_1 = arith.constant 0 : i32
    return %c0_i32, %c0_i32_0 : i32, i32
  }
  func.func @transform_6(%arg0: i32) -> (i32, i32) {
    %c0_i32 = arith.constant 0 : i32
    %c0_i32_0 = arith.constant 0 : i32
    %c0_i32_1 = arith.constant 0 : i32
    return %c0_i32, %c0_i32_0 : i32, i32
  }
  func.func @transform_7(%arg0: i32) -> (i32, i32) {
    %c0_i32 = arith.constant 0 : i32
    %c0_i32_0 = arith.constant 0 : i32
    return %arg0, %c0_i32 : i32, i32
  }
}

</mosaic_0001>

<bundles_post_ra>
// kernel: tpu_custom_call.1
= control target key start
LH: loop header
LB: loop body
LE: loop exit
PB: predicated region body
PF: predicated region fallthrough
CT: control target
= control target key end

     0   :  { %s9149_s0 = inlined_call_operand.hbm [shape: f32[300,512], index: 0, kind: input, shape index: {}]   ;;  %s9150_s1 = inlined_call_operand.hbm [shape: bf16[512,512], index: 1, kind: input, shape index: {}]   ;;  %s9151_s2 = inlined_call_operand.hbm [shape: f32[1,512], index: 2, kind: input, shape index: {}]   ;;  %s9152_s3 = inlined_call_operand.hbm [shape: bf16[512,512], index: 3, kind: input, shape index: {}]   ;;  %s9153_s4 = inlined_call_operand.vmem [shape: f32[1,512], index: 4, kind: input, shape index: {}]   ;;  %s9154_s5 = inlined_call_operand.hbm [shape: bf16[512,128], index: 5, kind: input, shape index: {}]   ;;  %s9155_s6 = inlined_call_operand.vmem [shape: f32[1,128], index: 6, kind: input, shape index: {}]   ;;  %s9156_s7 = inlined_call_operand.hbm [shape: bf16[300,128], index: 7, kind: output, shape index: {}]  }
   0x1   :  { %9189 = sst [smem:[#allocation48_spill]] %s9150_s1 }
   0x2   :  { %9190 = sst [smem:[#allocation49_spill]] %s9151_s2 }
   0x3   :  { %12 = vsyncpa [#allocation3], 0 }
   0x4   :  { %14 = vsyncpa [#allocation3 + $0x1], 0 }
   0x5   :  { %15 = vsyncpa [#allocation6], 0 }
   0x6   :  { %16 = vsyncpa [#allocation9], 0 }
   0x7   :  { %17 = vsyncpa [#allocation4], 0 }
   0x8   :  { %19 = vsyncpa [#allocation4 + $0x1], 0  ;;  %s7021_s24 = smov 0   ;;  %s7023_s25 = smov 0  }
   0x9   :  { %s7025_s26 = smov 0   ;;  %s7027_s27 = smov 0  }
   0xa LB: > { %s7042_s28 = sadd.s32 4294967295, %s6965_s27   ;;  %s5279_s29 = sadd.s32 4294967294, %s6965_s27   ;;  %s6965_s27 = sphi %s7027_s27, %s9327_s27   ;;  %s6961_s26 = sphi %s7025_s26, %s9326_s26   ;;  %s6957_s25 = sphi %s7023_s25, %s9325_s25   ;;  %s6953_s24 = sphi %s7021_s24, %s9324_s24  }
   0xb   : > { %s7046_s30 = sadd.s32 1, %s6965_s27   ;;  %s32_s8 = sadd.s32 1, %s6961_s26 }
   0xc   : > { %s29_s9 = ssub.s32 %s6965_s27, %s7046_s30  ;;  %p39_p0 = scmp.ne.s32.totalorder %s6961_s26, %s6957_s25 }
   0xd   : > { %p30_p1 = scmp.eq.s32.totalorder %s29_s9, 0  ;;  %p40_p2 = scmp.eq.s32.totalorder %s6965_s27, 0 }
   0xe   : > { %p45_p3 = scmp.ne.s32.totalorder %s6957_s25, %s6953_s24  ;;  %p9157_p4 = scmp.eq.s32.totalorder %s7042_s28, 0 }
   0xf   : > { %s7058_s10 = scalar_select %p30_p1, %s6961_s26, %s32_s8  }
  0x10   : > { %p7060_p5 = por %p40_p2, %p39_p0  ;;  %p7066_p6 = por %p9157_p4, %p45_p3 }
  0x11   : > { %p195_p7 = scmp.eq.s32.totalorder %s7042_s28, 1  ;;  %p201_p8 = scmp.eq.s32.totalorder %s5279_s29, 1 }
  0x12   : > { %s9192_s12 = scalar_select %p7066_p6, 1, 0 }
  0x13   : > { %p5280_p9 = scmp.ge.s32.totalorder %s6965_s27, 1  ;;  %p208_p10 = scmp.lt.s32.totalorder %s6965_s27, 3 }
  0x14   : > { %p7073_p11 = por %p195_p7, %p39_p0  ;;  %p7077_p12 = por %p201_p8, %p45_p3 }
  0x15   : > { %p7081_p13 = pnand %p5280_p9, %p208_p10  ;;  %s6967_s16 = smov [#allocation5]  }
  0x16   : > { %s9193_s13 = scalar_select %p7073_p11, 1, 0 }
  0x17   : > { %s9194_s14 = scalar_select %p7077_p12, 1, 0 }
  0x18   : > { %s9195_s15 = scalar_select %p7081_p13, 1, 0 }
  0x19   : > { %p6037_p1 = pneg %p7081_p13  ;;  %s220_s17 = sshll.u32 %s6967_s16, 4  ;;  %s221_s17 = int_to_ptr.vmem [resolvable:$true] %s220_s17 }
  0x1a   : > { %s6968_s19 = smov [#allocation8]   ;;  %s6774_s21 = scalar_lea.vmem %s221_s17, 16384 }
  0x1b   : > { %p7089_p2 = pnand %p6037_p1, %p9157_p4  ;;  %s244_s20 = sshll.u32 %s6968_s19, 4  ;;  %s245_s20 = int_to_ptr.vmem [resolvable:$true] %s244_s20 }
  0x1c   : > { %p6775_p3 = scmp.ne.s32.totalorder %s221_s17, %s6774_s21  ;;  %p6782_p9 = scmp.lt.s32.totalorder %s221_s17, %s221_s17 }
  0x1d   : > { %p6765_p0 = pneg %p7089_p2  ;;  %p6783_p10 = scmp.lt.s32.totalorder %s6774_s21, %s6774_s21 }
  0x1f   : > { %p6777_p7 = pnand %p6775_p3, %p6765_p0  ;;  %p6784_p12 = por %p6783_p10, %p6782_p9 }
  0x21   : > { %p6778_p8 = pneg %p6777_p7 }
  0x23   : > { %p6785_p1 = pnand %p6784_p12, %p6778_p8 }
  0x25   : > { %6788 = shalt.err (!%p6785_p1)
}
  0x26   : > { %s6969_s22 = smov 256   ;;  %s6970_s23 = smov 16  }
  0x27   : > { %s9197_s1 = sld [smem:[#allocation48_spill]]  ;;  %s6800_s9 = scalar_lea.vmem %s245_s20, 16384 }
  0x28   : > { %p6801_p4 = scmp.ne.s32.totalorder %s245_s20, %s6800_s9  ;;  %p6808_p11 = scmp.lt.s32.totalorder %s245_s20, %s245_s20 }
  0x29   : > { %p6809_p6 = scmp.lt.s32.totalorder %s6800_s9, %s6800_s9 }
  0x2a   : > { %p6803_p3 = pnand %p6801_p4, %p6765_p0 }
  0x2b   : > { %p6810_p9 = por %p6809_p6, %p6808_p11 }
  0x2c   : > { %p6804_p7 = pneg %p6803_p3 }
  0x2d   : > { %6040 = dma.hbm_to_vmem [thread:$0]  (!%p7089_p2), %s9197_s1, 16384, %s221_s17, [#allocation6], %s6969_s22, %s6969_s22, %s6970_s23  }
  0x2e   : > { %p6811_p12 = pnand %p6810_p9, %p6804_p7 }
  0x30   : > { %6814 = shalt.err (!%p6811_p12)
}
  0x31   : > { %6046 = dma.hbm_to_vmem [thread:$0]  (!%p7089_p2), %s9152_s3, 16384, %s245_s20, [#allocation9], %s6969_s22, %s6969_s22, %s6970_s23  }
  0x32   : > { %s6971_s21 = smov [#allocation7]   ;;  %s6972_s29 = smov [#allocation10]  }
  0x33   : > { %s234_s17 = sshll.u32 %s6971_s21, 4  ;;  %s260_s8 = sshll.u32 %s6972_s29, 4  ;;  %s235_s17 = int_to_ptr.vmem [resolvable:$true] %s234_s17  ;;  %s261_s8 = int_to_ptr.vmem [resolvable:$true] %s260_s8 }
  0x34   : > { %s6826_s1 = scalar_lea.vmem %s235_s17, 64  ;;  %p6834_p11 = scmp.lt.s32.totalorder %s235_s17, %s235_s17 }
  0x35   : > { %p6827_p4 = scmp.ne.s32.totalorder %s235_s17, %s6826_s1  ;;  %p6835_p10 = scmp.lt.s32.totalorder %s6826_s1, %s6826_s1 }
  0x37   : > { %p6829_p8 = pnand %p6827_p4, %p6765_p0  ;;  %p6836_p1 = por %p6835_p10, %p6834_p11 }
  0x39   : > { %p6830_p6 = pneg %p6829_p8 }
  0x3b   : > { %p6837_p3 = pnand %p6836_p1, %p6830_p6 }
  0x3d   : > { %6840 = shalt.err (!%p6837_p3)
}
  0x3e   : > { %s9198_s2 = sld [smem:[#allocation49_spill]]  ;;  %s6852_s22 = scalar_lea.vmem %s261_s8, 4096 }
  0x3f   : > { %p6853_p7 = scmp.ne.s32.totalorder %s261_s8, %s6852_s22  ;;  %p6860_p4 = scmp.lt.s32.totalorder %s261_s8, %s261_s8 }
  0x40   : > { %p6861_p8 = scmp.lt.s32.totalorder %s6852_s22, %s6852_s22 }
  0x41   : > { %p6855_p9 = pnand %p6853_p7, %p6765_p0 }
  0x42   : > { %p6862_p13 = por %p6861_p8, %p6860_p4 }
  0x43   : > { %p6856_p12 = pneg %p6855_p9 }
  0x44   : > { %6043 = dma.hbm_to_vmem [thread:$0]  (!%p7089_p2), %s9198_s2, 64, %s235_s17, [#allocation6]  }
  0x45   : > { %p6863_p11 = pnand %p6862_p13, %p6856_p12 }
  0x47   : > { %6866 = shalt.err (!%p6863_p11)
}
  0x48   : > { %s6973_s1 = smov 64   ;;  %s6974_s23 = smov 4  }
  0x49   : > { %6049 = dma.hbm_to_vmem [thread:$0]  (!%p7089_p2), %s9154_s5, 4096, %s261_s8, [#allocation9], %s6973_s1, %s6973_s1, %s6974_s23  }
  0x4a   : > { %p5285_p6 = scmp.ge.s32.totalorder %s6965_s27, 2 }
  0x4c   : > { %273 = sbr.rel (%p5285_p6) target bundleno = 113 (0x71), region = 40 }
  0x51   : > { %276 = sbr.rel (!%p7060_p5) target bundleno = 113 (0x71), region = 44  ;;  %s277_s21 = sand.u32 (%p7060_p5), 1, %s6961_s26  }
  0x52   : > { %s5287_s17 = sshll.u32 (%p7060_p5), %s6965_s27, 5  ;;  %s5286_s29 = sshll.u32 (%p7060_p5), %s277_s21, 10 }
  0x53   : > { %s283_s9 = ssub.s32 (%p7060_p5), 38, %s5287_s17  ;;  %s7137_s20 = scalar_lea.sflag (%p7060_p5), [#allocation3], %s277_s21 }
  0x54   : > { %p284_p13 = scmp.lt.s32.totalorder (%p7060_p5), %s283_s9, 32  ;;  %s281_s22 = scalar_lea.vmem (%p7060_p5), [#allocation2], %s5286_s29 }
  0x56   : > { %s9329_s9 = smov (!%p284_p13, %s283_s9), 32 }
  0x57   : > { %s7134_s18 = sshll.u32 %s9329_s9, 9 }
  0x58   : > { %s289_s8 = ssub.s32 16384, %s7134_s18 }
  0x59   : > { %290 = vsyncadd %s7137_s20, %s289_s8  ;;  %p5290_p5 = scmp.ne.s32.totalorder %s7134_s18, 0  ;;  %s5634_s11 = sshll.u32 %s6965_s27, 14 }
  0x5a   : > { %s7145_s16 = scalar_lea.hbm %s9149_s0, %s5634_s11  ;;  %s296_s19 = sshll.u32 %s281_s22, 4  ;;  %s7147_s19 = int_to_ptr.vmem [resolvable:$true] %s296_s19 }
  0x5b   : > { %s6867_s21 = scalar_lea.hbm %s7145_s16, %s7134_s18  ;;  %s6871_s9 = scalar_lea.hbm %s9149_s0, 19456 }
  0x5c   : > { %p6868_p2 = scmp.ne.s32.totalorder %s7145_s16, %s6867_s21  ;;  %p6872_p1 = scmp.lt.s32.totalorder %s7145_s16, %s9149_s0 }
  0x5d   : > { %p6873_p3 = scmp.lt.s32.totalorder %s6871_s9, %s6867_s21 }
  0x5e   : > { %p6869_p0 = pnand %p6868_p2, %p5290_p5 }
  0x5f   : > { %p6874_p7 = por %p6873_p3, %p6872_p1 }
  0x60   : > { %p6870_p10 = pneg %p6869_p0 }
  0x62   : > { %p6875_p9 = pnand %p6874_p7, %p6870_p10 }
  0x64   : > { %6878 = shalt.err (!%p6875_p9)
}
  0x65   : > { %s6879_s22 = scalar_lea.vmem %s7147_s19, %s7134_s18  ;;  %s6975_s11 = smov [#allocation2]  }
  0x66   : > { %p6880_p12 = scmp.ne.s32.totalorder %s7147_s19, %s6879_s22  ;;  %s6883_s1 = sshll.u32 %s6975_s11, 4  ;;  %s6884_s1 = int_to_ptr.vmem [resolvable:$false] %s6883_s1 }
  0x67   : > { %s6885_s23 = scalar_lea.vmem %s6884_s1, 32768  ;;  %p6886_p11 = scmp.lt.s32.totalorder %s7147_s19, %s6884_s1 }
  0x68   : > { %p6881_p4 = pnand %p6880_p12, %p5290_p5  ;;  %p6887_p13 = scmp.lt.s32.totalorder %s6885_s23, %s6879_s22 }
  0x6a   : > { %p6882_p8 = pneg %p6881_p4  ;;  %p6888_p2 = por %p6887_p13, %p6886_p11 }
  0x6c   : > { %p6889_p0 = pnand %p6888_p2, %p6882_p8 }
  0x6e   : > { %6892 = shalt.err (!%p6889_p0)
}
  0x6f   : > { %s6976_s2 = smov 512   ;;  %s6977_s21 = smov 32  }
  0x70   : > { %302 = dma.hbm_to_vmem [thread:$0]  (%p5290_p5), %s7145_s16, %s7134_s18, %s7147_s19, %s7137_s20, %s6976_s2, %s6976_s2, %s6977_s21  }
  0x71 PF: > { %p9199_p10 = scmp.ne.s32.totalorder %s9195_s15, 0 }
  0x73   : > { %308 = sbr.rel (%p9199_p10) target bundleno = 1157 (0x485), region = 48 }
  0x78   : > { %s7176_s17 = sand.u32 1, %s6957_s25   ;;  %p9200_p1 = scmp.ne.s32.totalorder %s9192_s12, 0 }
  0x79   : > { %s5296_s29 = sshll.u32 %s7176_s17, 10  ;;  %s311_s9 = scalar_lea.sflag [#allocation3], %s7176_s17 }
  0x7a   : > { %s7180_s8 = scalar_lea.vmem [#allocation2], %s5296_s29 }
  0x7b   : > { %6936 = dma.done.wait (%p9200_p1), %s311_s9, 16384  }
  0x7c   : > { %6938 = vsyncadd (%p9200_p1), %s311_s9, 4294950912  ;;  %p9201_p5 = scmp.eq.s32.totalorder %s7042_s28, 0 }
  0x7e   : > { %6940 = dma.done.wait (%p9201_p5), [#allocation6], 16448   ;;  %p9202_p3 = pmov %p9201_p5 }
  0x80   : > { %6942 = vsyncadd (%p9202_p3), [#allocation6], 4294950848  ;;  %p9203_p7 = pmov %p9202_p3 }
  0x81   : > { %p9204_p9 = pmov %p9202_p3 }
  0x82   : > { %6944 = dma.done.wait (%p9203_p7), [#allocation9], 20480  }
  0x83   : > { %6946 = vsyncadd (%p9204_p9), [#allocation9], 4294946816  ;;  %v6107_v0 = vld [vmem:[#allocation5 + $0xe4] ss:$16 sps:$4 sm:$0xff]   ;;  %v6111_v2 = vld [vmem:[#allocation5 + $0xe0] ss:$16 sps:$4 sm:$0xff]  }
  0x84   : > { %v6109_v1 = vld [vmem:[#allocation5 + $0x2e4] ss:$16 sps:$4 sm:$0xff]   ;;  %1549 = vmatprep.subr.bf16.mxu0 %v6107_v0  ;;  %v6112_v3 = vld [vmem:[#allocation5 + $0x2e0] ss:$16 sps:$4 sm:$0xff]   ;;  %v697_v46 = vld [vmem:[%s7180_s8 + $0x8] sm:$0xff]  ;;  %s5301_s16 = sshll.u32 %s7176_s17, 7 }
  0x85   : > { %1662 = vmatprep.subr.bf16.mxu1 %v6109_v1  ;;  %v6113_v4 = vld [vmem:[#allocation5 + $0xc4] ss:$16 sps:$4 sm:$0xff]   ;;  %1550 = vmatpush1.bf16.msra.mxu0 %v6111_v2  ;;  %v6117_v6 = vld [vmem:[#allocation5 + $0xc0] ss:$16 sps:$4 sm:$0xff]   ;;  %v701_v47 = vld [vmem:[%s7180_s8 + $0x28] sm:$0xff]  ;;  %s9032_s19 = scalar_lea.vmem [#allocation11], %s5301_s16 }
  0x86   : > { %1663 = vmatpush1.bf16.msra.mxu1 %v6112_v3  ;;  %v6115_v5 = vld [vmem:[#allocation5 + $0x2c4] ss:$16 sps:$4 sm:$0xff]   ;;  %1551 = vmatprep.subr.bf16.mxu0 %v6113_v4  ;;  %v6118_v7 = vld [vmem:[#allocation5 + $0x2c0] ss:$16 sps:$4 sm:$0xff]   ;;  %v699_v48 = vld [vmem:[%s7180_s8 + $0x18] sm:$0xff]  ;;  %v7198_v53 = vpack.c.bf16 %v701_v47, %v697_v46  ;;  %s5149_s22 = scalar_lea.sflag [#allocation4], %s7176_s17 }
  0x87   : > { %1664 = vmatprep.subr.bf16.mxu1 %v6115_v5  ;;  %v6119_v8 = vld [vmem:[#allocation5 + $0xa4] ss:$16 sps:$4 sm:$0xff]   ;;  %v6123_v10 = vld [vmem:[#allocation5 + $0xa0] ss:$16 sps:$4 sm:$0xff]   ;;  %v703_v49 = vld [vmem:[%s7180_s8 + $0x38] sm:$0xff]  ;;  %p9322_p12 = scmp.ne.s32.totalorder %s9193_s13, 0 }
  0x88   : > { %v6121_v9 = vld [vmem:[#allocation5 + $0x2a4] ss:$16 sps:$4 sm:$0xff]   ;;  %v6124_v11 = vld [vmem:[#allocation5 + $0x2a0] ss:$16 sps:$4 sm:$0xff]   ;;  %v7200_v54 = vpack.c.bf16 %v703_v49, %v699_v48  ;;  %1581 = vmatprep.mubr.bf16.mxu0 %v7198_v53  ;;  %s5624_s11 = sshll.u32 (%p9322_p12), %s7042_s28, 5 }
  0x89   : > { %1552 = vmatpush1.bf16.msra.mxu0 %v6117_v6  ;;  %v6125_v12 = vld [vmem:[#allocation5 + $0x84] ss:$16 sps:$4 sm:$0xff]   ;;  %v6129_v14 = vld [vmem:[#allocation5 + $0x80] ss:$16 sps:$4 sm:$0xff]   ;;  %s5157_s1 = ssub.s32 (%p9322_p12), 38, %s5624_s11 }
  0x8a   : > { %1665 = vmatpush1.bf16.msra.mxu1 %v6118_v7  ;;  %1553 = vmatprep.subr.bf16.mxu0 %v6119_v8  ;;  %v6127_v13 = vld [vmem:[#allocation5 + $0x284] ss:$16 sps:$4 sm:$0xff]   ;;  %v6130_v15 = vld [vmem:[#allocation5 + $0x280] ss:$16 sps:$4 sm:$0xff]   ;;  %p5158_p4 = scmp.lt.s32.totalorder (%p9322_p12), %s5157_s1, 32 }
  0x8b   : > { %1666 = vmatprep.subr.bf16.mxu1 %v6121_v9  ;;  %v6131_v16 = vld [vmem:[#allocation5 + $0x64] ss:$16 sps:$4 sm:$0xff]   ;;  %v6135_v18 = vld [vmem:[#allocation5 + $0x60] ss:$16 sps:$4 sm:$0xff]   ;;  %1694 = vmatprep.mubr.bf16.mxu1 %v7200_v54 }
  0x8c   : > { %v6133_v17 = vld [vmem:[#allocation5 + $0x264] ss:$16 sps:$4 sm:$0xff]   ;;  %v6136_v19 = vld [vmem:[#allocation5 + $0x260] ss:$16 sps:$4 sm:$0xff]  }
  0x8d   : > { %1554 = vmatpush1.bf16.msra.mxu0 %v6123_v10  ;;  %v6137_v20 = vld [vmem:[#allocation5 + $0x44] ss:$16 sps:$4 sm:$0xff]   ;;  %v6141_v22 = vld [vmem:[#allocation5 + $0x40] ss:$16 sps:$4 sm:$0xff]   ;;  %v6205_v10 = vld [vmem:[#allocation5 + $0xec] ss:$16 sps:$4 sm:$0xff]  }
  0x8e   : > { %1667 = vmatpush1.bf16.msra.mxu1 %v6124_v11  ;;  %1555 = vmatprep.subr.bf16.mxu0 %v6125_v12  ;;  %v6139_v21 = vld [vmem:[#allocation5 + $0x244] ss:$16 sps:$4 sm:$0xff]   ;;  %v6142_v23 = vld [vmem:[#allocation5 + $0x240] ss:$16 sps:$4 sm:$0xff]   ;;  %v6208_v11 = vld [vmem:[#allocation5 + $0x2ec] ss:$16 sps:$4 sm:$0xff]  }
  0x8f   : > { %1668 = vmatprep.subr.bf16.mxu1 %v6127_v13  ;;  %v6143_v24 = vld [vmem:[#allocation5 + $0x24] ss:$16 sps:$4 sm:$0xff]   ;;  %v6147_v26 = vld [vmem:[#allocation5 + $0x20] ss:$16 sps:$4 sm:$0xff]   ;;  %v6203_v12 = vld [vmem:[#allocation5 + $0xe8] ss:$16 sps:$4 sm:$0xff]  }
  0x90   : > { %v6145_v25 = vld [vmem:[#allocation5 + $0x224] ss:$16 sps:$4 sm:$0xff]   ;;  %v6148_v27 = vld [vmem:[#allocation5 + $0x220] ss:$16 sps:$4 sm:$0xff]   ;;  %v6206_v13 = vld [vmem:[#allocation5 + $0x2e8] ss:$16 sps:$4 sm:$0xff]  }
  0x91   : > { %1556 = vmatpush1.bf16.msra.mxu0 %v6129_v14  ;;  %v6149_v28 = vld [vmem:[#allocation5 + $0x4] ss:$16 sps:$4 sm:$0xff]   ;;  %v6153_v30 = vld [vmem:[#allocation5] ss:$16 sps:$4 sm:$0xff]   ;;  %v705_v14 = vld [vmem:[%s7180_s8 + $0x48] sm:$0xff] }
  0x92   : > { %1669 = vmatpush1.bf16.msra.mxu1 %v6130_v15  ;;  %1557 = vmatprep.subr.bf16.mxu0 %v6131_v16  ;;  %v6151_v29 = vld [vmem:[#allocation5 + $0x204] ss:$16 sps:$4 sm:$0xff]   ;;  %v6154_v31 = vld [vmem:[#allocation5 + $0x200] ss:$16 sps:$4 sm:$0xff]   ;;  %v709_v15 = vld [vmem:[%s7180_s8 + $0x68] sm:$0xff] }
  0x93   : > { %1670 = vmatprep.subr.bf16.mxu1 %v6133_v17  ;;  %v6155_v32 = vld [vmem:[#allocation5 + $0x1e4] ss:$16 sps:$4 sm:$0xff]   ;;  %v6159_v34 = vld [vmem:[#allocation5 + $0x1e0] ss:$16 sps:$4 sm:$0xff]  }
  0x94   : > { %v6157_v33 = vld [vmem:[#allocation5 + $0x3e4] ss:$16 sps:$4 sm:$0xff]   ;;  %v6160_v35 = vld [vmem:[#allocation5 + $0x3e0] ss:$16 sps:$4 sm:$0xff]  }
  0x95   : > { %1558 = vmatpush1.bf16.msra.mxu0 %v6135_v18  ;;  %v6161_v36 = vld [vmem:[#allocation5 + $0x1c4] ss:$16 sps:$4 sm:$0xff]   ;;  %v6165_v38 = vld [vmem:[#allocation5 + $0x1c0] ss:$16 sps:$4 sm:$0xff]   ;;  %v707_v18 = vld [vmem:[%s7180_s8 + $0x58] sm:$0xff] }
  0x96   : > { %1671 = vmatpush1.bf16.msra.mxu1 %v6136_v19  ;;  %1559 = vmatprep.subr.bf16.mxu0 %v6137_v20  ;;  %v6163_v37 = vld [vmem:[#allocation5 + $0x3c4] ss:$16 sps:$4 sm:$0xff]   ;;  %v6166_v39 = vld [vmem:[#allocation5 + $0x3c0] ss:$16 sps:$4 sm:$0xff]   ;;  %v711_v19 = vld [vmem:[%s7180_s8 + $0x78] sm:$0xff] }
  0x97   : > { %1672 = vmatprep.subr.bf16.mxu1 %v6139_v21  ;;  %v6167_v40 = vld [vmem:[#allocation5 + $0x1a4] ss:$16 sps:$4 sm:$0xff]   ;;  %v6171_v42 = vld [vmem:[#allocation5 + $0x1a0] ss:$16 sps:$4 sm:$0xff]   ;;  %v6211_v20 = vld [vmem:[#allocation5 + $0xcc] ss:$16 sps:$4 sm:$0xff]  }
  0x98   : > { %v6169_v41 = vld [vmem:[#allocation5 + $0x3a4] ss:$16 sps:$4 sm:$0xff]   ;;  %v6172_v43 = vld [vmem:[#allocation5 + $0x3a0] ss:$16 sps:$4 sm:$0xff]   ;;  %v6214_v21 = vld [vmem:[#allocation5 + $0x2cc] ss:$16 sps:$4 sm:$0xff]  }
  0x99   : > { %1560 = vmatpush1.bf16.msra.mxu0 %v6141_v22  ;;  %v6173_v44 = vld [vmem:[#allocation5 + $0x184] ss:$16 sps:$4 sm:$0xff]   ;;  %v6177_v50 = vld [vmem:[#allocation5 + $0x180] ss:$16 sps:$4 sm:$0xff]   ;;  %v6209_v22 = vld [vmem:[#allocation5 + $0xc8] ss:$16 sps:$4 sm:$0xff]  }
  0x9a   : > { %1673 = vmatpush1.bf16.msra.mxu1 %v6142_v23  ;;  %1561 = vmatprep.subr.bf16.mxu0 %v6143_v24  ;;  %v6175_v45 = vld [vmem:[#allocation5 + $0x384] ss:$16 sps:$4 sm:$0xff]   ;;  %v6178_v51 = vld [vmem:[#allocation5 + $0x380] ss:$16 sps:$4 sm:$0xff]   ;;  %v7216_v23 = vpack.c.bf16 %v709_v15, %v705_v14  ;;  %v7218_v24 = vpack.c.bf16 %v711_v19, %v707_v18  ;;  %v731_v18 = vld [vmem:[%s7180_s8 + $0x118] sm:$0xff] }
  0x9b   : > { %1674 = vmatprep.subr.bf16.mxu1 %v6145_v25  ;;  %v6179_v52 = vld [vmem:[#allocation5 + $0x164] ss:$16 sps:$4 sm:$0xff]   ;;  %v6183_v56 = vld [vmem:[#allocation5 + $0x160] ss:$16 sps:$4 sm:$0xff]   ;;  %v6212_v25 = vld [vmem:[#allocation5 + $0x2c8] ss:$16 sps:$4 sm:$0xff]  }
  0x9c   : > { %v6181_v55 = vld [vmem:[#allocation5 + $0x364] ss:$16 sps:$4 sm:$0xff]   ;;  %v6184_v57 = vld [vmem:[#allocation5 + $0x360] ss:$16 sps:$4 sm:$0xff]   ;;  %v735_v19 = vld [vmem:[%s7180_s8 + $0x138] sm:$0xff] }
  0x9d   : > { %1562 = vmatpush1.bf16.msra.mxu0 %v6147_v26  ;;  %v6185_v58 = vld [vmem:[#allocation5 + $0x144] ss:$16 sps:$4 sm:$0xff]   ;;  %v6189_v60 = vld [vmem:[#allocation5 + $0x140] ss:$16 sps:$4 sm:$0xff]  }
  0x9e   : > { %1675 = vmatpush1.bf16.msra.mxu1 %v6148_v27  ;;  %1563 = vmatprep.subr.bf16.mxu0 %v6149_v28  ;;  %v6187_v59 = vld [vmem:[#allocation5 + $0x344] ss:$16 sps:$4 sm:$0xff]   ;;  %v6190_v61 = vld [vmem:[#allocation5 + $0x340] ss:$16 sps:$4 sm:$0xff]  }
  0x9f   : > { %1676 = vmatprep.subr.bf16.mxu1 %v6151_v29  ;;  %v6191_v62 = vld [vmem:[#allocation5 + $0x124] ss:$16 sps:$4 sm:$0xff]   ;;  %v6195_v0 = vld [vmem:[#allocation5 + $0x120] ss:$16 sps:$4 sm:$0xff]  }
  0xa0   : > { %v6193_v63 = vld [vmem:[#allocation5 + $0x324] ss:$16 sps:$4 sm:$0xff]   ;;  %v6196_v1 = vld [vmem:[#allocation5 + $0x320] ss:$16 sps:$4 sm:$0xff]  }
  0xa1   : > { %1564 = vmatpush1.bf16.msra.mxu0 %v6153_v30  ;;  %v6197_v2 = vld [vmem:[#allocation5 + $0x104] ss:$16 sps:$4 sm:$0xff]   ;;  %v6201_v4 = vld [vmem:[#allocation5 + $0x100] ss:$16 sps:$4 sm:$0xff]   ;;  %v6217_v30 = vld [vmem:[#allocation5 + $0xac] ss:$16 sps:$4 sm:$0xff]  }
  0xa2   : > { %1677 = vmatpush1.bf16.msra.mxu1 %v6154_v31  ;;  %1565 = vmatprep.subr.bf16.mxu0 %v6155_v32  ;;  %v6199_v3 = vld [vmem:[#allocation5 + $0x304] ss:$16 sps:$4 sm:$0xff]   ;;  %v6202_v5 = vld [vmem:[#allocation5 + $0x300] ss:$16 sps:$4 sm:$0xff]   ;;  %v6220_v31 = vld [vmem:[#allocation5 + $0x2ac] ss:$16 sps:$4 sm:$0xff]  }
  0xa3   : > { %1678 = vmatprep.subr.bf16.mxu1 %v6157_v33  ;;  %v696_v6 = vld [vmem:[%s7180_s8] sm:$0xff]  ;;  %v698_v8 = vld [vmem:[%s7180_s8 + $0x10] sm:$0xff]  ;;  %v6215_v32 = vld [vmem:[#allocation5 + $0xa8] ss:$16 sps:$4 sm:$0xff]  }
  0xa4   : > { %v700_v7 = vld [vmem:[%s7180_s8 + $0x20] sm:$0xff]  ;;  %v702_v9 = vld [vmem:[%s7180_s8 + $0x30] sm:$0xff]  ;;  %v6218_v33 = vld [vmem:[#allocation5 + $0x2a8] ss:$16 sps:$4 sm:$0xff]  }
  0xa5   : > { %1566 = vmatpush2.bf16.msra.mxu0 %v6159_v34  ;;  %v7210_v16 = vpack.c.bf16 %v700_v7, %v696_v6  ;;  %v7212_v17 = vpack.c.bf16 %v702_v9, %v698_v8  ;;  %v704_v26 = vld [vmem:[%s7180_s8 + $0x40] sm:$0xff]  ;;  %v706_v28 = vld [vmem:[%s7180_s8 + $0x50] sm:$0xff]  ;;  %v713_v34 = vld [vmem:[%s7180_s8 + $0x88] sm:$0xff] }
  0xa6   : > { %1679 = vmatpush2.bf16.msra.mxu1 %v6160_v35  ;;  %1567 = vmatprep.subr.bf16.mxu0 %v6161_v36  ;;  %v708_v27 = vld [vmem:[%s7180_s8 + $0x60] sm:$0xff]  ;;  %v710_v29 = vld [vmem:[%s7180_s8 + $0x70] sm:$0xff]  ;;  %v717_v35 = vld [vmem:[%s7180_s8 + $0xa8] sm:$0xff] }
  0xa7   : > { %1680 = vmatprep.subr.bf16.mxu1 %v6163_v37  ;;  %v7230_v36 = vpack.c.bf16 %v708_v27, %v704_v26  ;;  %v7232_v37 = vpack.c.bf16 %v710_v29, %v706_v28  ;;  %v712_v46 = vld [vmem:[%s7180_s8 + $0x80] sm:$0xff]  ;;  %v714_v48 = vld [vmem:[%s7180_s8 + $0x90] sm:$0xff]  ;;  %v6241_v8 = vld [vmem:[#allocation5 + $0x2c] ss:$16 sps:$4 sm:$0xff]   ;;  %v7278_v26 = vpack.c.bf16 %v735_v19, %v731_v18 }
  0xa8   : > { %v716_v47 = vld [vmem:[%s7180_s8 + $0xa0] sm:$0xff]  ;;  %v718_v49 = vld [vmem:[%s7180_s8 + $0xb0] sm:$0xff]  ;;  %v6244_v9 = vld [vmem:[#allocation5 + $0x22c] ss:$16 sps:$4 sm:$0xff]  }
  0xa9   : > { %1568 = vmatpush2.bf16.msra.mxu0 %v6165_v38  ;;  %v715_v38 = vld [vmem:[%s7180_s8 + $0x98] sm:$0xff]  ;;  %v722_v6 = vld [vmem:[%s7180_s8 + $0xd0] sm:$0xff]  ;;  %v728_v28 = vld [vmem:[%s7180_s8 + $0x100] sm:$0xff] }
  0xaa   : > { %1681 = vmatpush2.bf16.msra.mxu1 %v6166_v39  ;;  %1569 = vmatprep.subr.bf16.mxu0 %v6167_v40  ;;  %v719_v39 = vld [vmem:[%s7180_s8 + $0xb8] sm:$0xff]  ;;  %v726_v7 = vld [vmem:[%s7180_s8 + $0xf0] sm:$0xff]  ;;  %v732_v29 = vld [vmem:[%s7180_s8 + $0x120] sm:$0xff] }
  0xab   : > { %1682 = vmatprep.subr.bf16.mxu1 %v6169_v41  ;;  %v6223_v40 = vld [vmem:[#allocation5 + $0x8c] ss:$16 sps:$4 sm:$0xff]   ;;  %v7272_v15 = vpack.c.bf16 %v726_v7, %v722_v6  ;;  %v6248_v27 = vld [vmem:[#allocation5 + $0x208] ss:$16 sps:$4 sm:$0xff]   ;;  %v744_v18 = vld [vmem:[%s7180_s8 + $0x180] sm:$0xff] }
  0xac   : > { %v6226_v41 = vld [vmem:[#allocation5 + $0x28c] ss:$16 sps:$4 sm:$0xff]   ;;  %v748_v19 = vld [vmem:[%s7180_s8 + $0x1a0] sm:$0xff] }
  0xad   : > { %1570 = vmatpush2.bf16.msra.mxu0 %v6171_v42  ;;  %v6221_v42 = vld [vmem:[#allocation5 + $0x88] ss:$16 sps:$4 sm:$0xff]  }
  0xae   : > { %1683 = vmatpush2.bf16.msra.mxu1 %v6172_v43  ;;  %1571 = vmatprep.subr.bf16.mxu0 %v6173_v44  ;;  %v7236_v43 = vpack.c.bf16 %v717_v35, %v713_v34  ;;  %v7238_v44 = vpack.c.bf16 %v719_v39, %v715_v38  ;;  %v6251_v34 = vld [vmem:[#allocation5 + $0x1e8] ss:$16 sps:$4 sm:$0xff]  }
  0xaf   : > { %1684 = vmatprep.subr.bf16.mxu1 %v6175_v45  ;;  %v6224_v45 = vld [vmem:[#allocation5 + $0x288] ss:$16 sps:$4 sm:$0xff]  }
  0xb0   : > { %v6254_v35 = vld [vmem:[#allocation5 + $0x3e8] ss:$16 sps:$4 sm:$0xff]  }
  0xb1   : > { %1572 = vmatpush2.bf16.msra.mxu0 %v6177_v50  ;;  %v6229_v50 = vld [vmem:[#allocation5 + $0x6c] ss:$16 sps:$4 sm:$0xff]  }
  0xb2   : > { %1685 = vmatpush2.bf16.msra.mxu1 %v6178_v51  ;;  %1573 = vmatprep.subr.bf16.mxu0 %v6179_v52  ;;  %v6232_v51 = vld [vmem:[#allocation5 + $0x26c] ss:$16 sps:$4 sm:$0xff]   ;;  %v6227_v52 = vld [vmem:[#allocation5 + $0x68] ss:$16 sps:$4 sm:$0xff]  }
  0xb3   : > { %1686 = vmatprep.subr.bf16.mxu1 %v6181_v55  ;;  %v6230_v55 = vld [vmem:[#allocation5 + $0x268] ss:$16 sps:$4 sm:$0xff]  }
  0xb4   : > { %v737_v38 = vld [vmem:[%s7180_s8 + $0x148] sm:$0xff]  ;;  %v747_v6 = vld [vmem:[%s7180_s8 + $0x198] sm:$0xff] }
  0xb5   : > { %1574 = vmatpush2.bf16.msra.mxu0 %v6183_v56  ;;  %v721_v56 = vld [vmem:[%s7180_s8 + $0xc8] sm:$0xff]  ;;  %v751_v7 = vld [vmem:[%s7180_s8 + $0x1b8] sm:$0xff] }
  0xb6   : > { %1687 = vmatpush2.bf16.msra.mxu1 %v6184_v57  ;;  %1575 = vmatprep.subr.bf16.mxu0 %v6185_v58  ;;  %v725_v57 = vld [vmem:[%s7180_s8 + $0xe8] sm:$0xff]  ;;  %v7250_v58 = vpack.c.bf16 %v716_v47, %v712_v46 }
  0xb7   : > { %1688 = vmatprep.subr.bf16.mxu1 %v6187_v59  ;;  %v7252_v59 = vpack.c.bf16 %v718_v49, %v714_v48  ;;  %v741_v39 = vld [vmem:[%s7180_s8 + $0x168] sm:$0xff] }
  0xb8   : > { %v6259_v46 = vld [vmem:[#allocation5 + $0x1cc] ss:$16 sps:$4 sm:$0xff]   ;;  %v6257_v48 = vld [vmem:[#allocation5 + $0x1c8] ss:$16 sps:$4 sm:$0xff]   ;;  %v7296_v49 = vpack.c.bf16 %v741_v39, %v737_v38 }
  0xb9   : > { %1576 = vmatpush2.bf16.msra.mxu0 %v6189_v60  ;;  %v723_v60 = vld [vmem:[%s7180_s8 + $0xd8] sm:$0xff] }
  0xba   : > { %1689 = vmatpush2.bf16.msra.mxu1 %v6190_v61  ;;  %1577 = vmatprep.subr.bf16.mxu0 %v6191_v62  ;;  %v727_v61 = vld [vmem:[%s7180_s8 + $0xf8] sm:$0xff] }
  0xbb   : > { %1690 = vmatprep.subr.bf16.mxu1 %v6193_v63  ;;  %v6235_v62 = vld [vmem:[#allocation5 + $0x4c] ss:$16 sps:$4 sm:$0xff]  }
  0xbc   : > { %v6238_v63 = vld [vmem:[#allocation5 + $0x24c] ss:$16 sps:$4 sm:$0xff]  }
  0xbd   : > { %1578 = vmatpush2.bf16.msra.mxu0 %v6195_v0  ;;  %v6233_v0 = vld [vmem:[#allocation5 + $0x48] ss:$16 sps:$4 sm:$0xff]   ;;  %v6262_v47 = vld [vmem:[#allocation5 + $0x3cc] ss:$16 sps:$4 sm:$0xff]  }
  0xbe   : > { %1691 = vmatpush2.bf16.msra.mxu1 %v6196_v1  ;;  %1579 = vmatprep.subr.bf16.mxu0 %v6197_v2  ;;  %v7256_v1 = vpack.c.bf16 %v725_v57, %v721_v56  ;;  %v7258_v2 = vpack.c.bf16 %v727_v61, %v723_v60  ;;  %v738_v56 = vld [vmem:[%s7180_s8 + $0x150] sm:$0xff]  ;;  %v6265_v60 = vld [vmem:[#allocation5 + $0x1ac] ss:$16 sps:$4 sm:$0xff]  }
  0xbf   : > { %1692 = vmatprep.subr.bf16.mxu1 %v6199_v3  ;;  %v6236_v3 = vld [vmem:[#allocation5 + $0x248] ss:$16 sps:$4 sm:$0xff]   ;;  %v742_v57 = vld [vmem:[%s7180_s8 + $0x170] sm:$0xff]  ;;  %v6268_v61 = vld [vmem:[#allocation5 + $0x3ac] ss:$16 sps:$4 sm:$0xff]  }
  0xc0   : > { %v7346_v38 = vld [vmem:[#allocation5 + $0x14c] ss:$16 sps:$4 sm:$0xff]  }
  0xc1   : > { %1580 = vmatpush2.bf16.msra.mxu0 %v6201_v4  ;;  %v720_v4 = vld [vmem:[%s7180_s8 + $0xc0] sm:$0xff]  ;;  %v7348_v39 = vld [vmem:[#allocation5 + $0x34c] ss:$16 sps:$4 sm:$0xff]  }
  0xc2   : > { %1693 = vmatpush2.bf16.msra.mxu1 %v6202_v5  ;;  %1775 = vmatprep.subr.bf16.mxu0 %v6205_v10  ;;  %v724_v5 = vld [vmem:[%s7180_s8 + $0xe0] sm:$0xff]  ;;  %v6239_v10 = vld [vmem:[#allocation5 + $0x28] ss:$16 sps:$4 sm:$0xff]  }
  0xc3   : > { %1888 = vmatprep.subr.bf16.mxu1 %v6208_v11  ;;  %v6242_v11 = vld [vmem:[#allocation5 + $0x228] ss:$16 sps:$4 sm:$0xff]   ;;  %v7270_v14 = vpack.c.bf16 %v724_v5, %v720_v4  ;;  %v7312_v5 = vpack.c.bf16 %v742_v57, %v738_v56  ;;  %v7368_v56 = vld [vmem:[#allocation5 + $0x12c] ss:$16 sps:$4 sm:$0xff]  }
  0xc4   : > { %1582 = vmatmul.mubr.bf16.vlgmr.msra.gmra.mxu0 %v7210_v16  ;;  %v7370_v57 = vld [vmem:[#allocation5 + $0x32c] ss:$16 sps:$4 sm:$0xff]  }
  0xc5   : > { %1695 = vmatmul.mubr.bf16.vlgmr.msra.gmra.mxu1 %v7212_v17  ;;  %1776 = vmatpush1.bf16.msra.mxu0 %v6203_v12  ;;  %v729_v12 = vld [vmem:[%s7180_s8 + $0x108] sm:$0xff] }
  0xc6   : > { %1889 = vmatpush1.bf16.msra.mxu1 %v6206_v13  ;;  %1777 = vmatprep.subr.bf16.mxu0 %v6211_v20  ;;  %v733_v13 = vld [vmem:[%s7180_s8 + $0x128] sm:$0xff] }
  0xc7   : > { %1890 = vmatprep.subr.bf16.mxu1 %v6214_v21  ;;  %1591 = vmatprep.mubr.bf16.mxu0 %v7216_v23  ;;  %v6247_v20 = vld [vmem:[#allocation5 + $0xc] ss:$16 sps:$4 sm:$0xff]  }
  0xc8   : > { %1704 = vmatprep.mubr.bf16.mxu1 %v7218_v24  ;;  %v6250_v21 = vld [vmem:[#allocation5 + $0x20c] ss:$16 sps:$4 sm:$0xff]  }
  0xc9   : > { %1778 = vmatpush1.bf16.msra.mxu0 %v6209_v22  ;;  %v6245_v22 = vld [vmem:[#allocation5 + $0x8] ss:$16 sps:$4 sm:$0xff]  }
  0xca   : > { %1891 = vmatpush1.bf16.msra.mxu1 %v6212_v25  ;;  %1779 = vmatprep.subr.bf16.mxu0 %v6217_v30  ;;  %v7276_v25 = vpack.c.bf16 %v733_v13, %v729_v12  ;;  %v730_v30 = vld [vmem:[%s7180_s8 + $0x110] sm:$0xff]  ;;  %v6269_v12 = vld [vmem:[#allocation5 + $0x188] ss:$16 sps:$4 sm:$0xff]  }
  0xcb   : > { %1892 = vmatprep.subr.bf16.mxu1 %v6220_v31  ;;  %v734_v31 = vld [vmem:[%s7180_s8 + $0x130] sm:$0xff]  ;;  %v6272_v13 = vld [vmem:[#allocation5 + $0x388] ss:$16 sps:$4 sm:$0xff]  }
  0xcc   : > { %1592 = vmatmul.mubr.bf16.gmra.mxu0 %v7230_v36 }
  0xcd   : > { %1705 = vmatmul.mubr.bf16.gmra.mxu1 %v7232_v37  ;;  %1780 = vmatpush1.bf16.msra.mxu0 %v6215_v32  ;;  %v6253_v32 = vld [vmem:[#allocation5 + $0x1ec] ss:$16 sps:$4 sm:$0xff]  }
  0xce   : > { %1893 = vmatpush1.bf16.msra.mxu1 %v6218_v33  ;;  %1781 = vmatprep.subr.bf16.mxu0 %v6223_v40  ;;  %v6256_v33 = vld [vmem:[#allocation5 + $0x3ec] ss:$16 sps:$4 sm:$0xff]   ;;  %v7290_v40 = vpack.c.bf16 %v732_v29, %v728_v28  ;;  %v7333_v29 = vpack.c.bf16 %v748_v19, %v744_v18  ;;  %v6527_v18 = vld [vmem:[#allocation5 + $0xc4] ss:$16 sps:$4 sm:$0xff]   ;;  %v6530_v19 = vld [vmem:[#allocation5 + $0x2c0] ss:$16 sps:$4 sm:$0xff]  }
  0xcf   : > { %1894 = vmatprep.subr.bf16.mxu1 %v6226_v41  ;;  %1601 = vmatprep.mubr.bf16.mxu0 %v7236_v43  ;;  %v7292_v41 = vpack.c.bf16 %v734_v31, %v730_v30  ;;  %v753_v28 = vld [vmem:[%s7180_s8 + $0x1c8] sm:$0xff] }
  0xd0   : > { %1714 = vmatprep.mubr.bf16.mxu1 %v7238_v44  ;;  %v757_v31 = vld [vmem:[%s7180_s8 + $0x1e8] sm:$0xff] }
  0xd1   : > { %1782 = vmatpush1.bf16.msra.mxu0 %v6221_v42  ;;  %v739_v42 = vld [vmem:[%s7180_s8 + $0x158] sm:$0xff] }
  0xd2   : > { %1895 = vmatpush1.bf16.msra.mxu1 %v6224_v45  ;;  %1783 = vmatprep.subr.bf16.mxu0 %v6229_v50  ;;  %v743_v45 = vld [vmem:[%s7180_s8 + $0x178] sm:$0xff] }
  0xd3   : > { %1896 = vmatprep.subr.bf16.mxu1 %v6232_v51  ;;  %v7298_v50 = vpack.c.bf16 %v743_v45, %v739_v42  ;;  %v6260_v51 = vld [vmem:[#allocation5 + $0x3c8] ss:$16 sps:$4 sm:$0xff]   ;;  %v7350_v42 = vpack.c.bf16 %v757_v31, %v753_v28  ;;  %v6535_v28 = vld [vmem:[#allocation5 + $0x84] ss:$16 sps:$4 sm:$0xff]   ;;  %v6538_v31 = vld [vmem:[#allocation5 + $0x280] ss:$16 sps:$4 sm:$0xff]  }
  0xd4   : > { %1602 = vmatmul.mubr.bf16.gmra.mxu0 %v7250_v58 }
  0xd5   : > { %1715 = vmatmul.mubr.bf16.gmra.mxu1 %v7252_v59  ;;  %1784 = vmatpush1.bf16.msra.mxu0 %v6227_v52  ;;  %v736_v52 = vld [vmem:[%s7180_s8 + $0x140] sm:$0xff] }
  0xd6   : > { %1897 = vmatpush1.bf16.msra.mxu1 %v6230_v55  ;;  %1785 = vmatprep.subr.bf16.mxu0 %v6235_v62  ;;  %v740_v55 = vld [vmem:[%s7180_s8 + $0x160] sm:$0xff]  ;;  %v6263_v62 = vld [vmem:[#allocation5 + $0x1a8] ss:$16 sps:$4 sm:$0xff]  }
  0xd7   : > { %1898 = vmatprep.subr.bf16.mxu1 %v6238_v63  ;;  %1611 = vmatprep.mubr.bf16.mxu0 %v7256_v1  ;;  %v6266_v63 = vld [vmem:[#allocation5 + $0x3a8] ss:$16 sps:$4 sm:$0xff]   ;;  %v7310_v4 = vpack.c.bf16 %v740_v55, %v736_v52  ;;  %v754_v52 = vld [vmem:[%s7180_s8 + $0x1d0] sm:$0xff] }
  0xd8   : > { %1724 = vmatprep.mubr.bf16.mxu1 %v7258_v2  ;;  %v758_v55 = vld [vmem:[%s7180_s8 + $0x1f0] sm:$0xff] }
  0xd9   : > { %1786 = vmatpush1.bf16.msra.mxu0 %v6233_v0  ;;  %v745_v0 = vld [vmem:[%s7180_s8 + $0x188] sm:$0xff] }
  0xda   : > { %1899 = vmatpush1.bf16.msra.mxu1 %v6236_v3  ;;  %1787 = vmatprep.subr.bf16.mxu0 %v6241_v8  ;;  %v749_v3 = vld [vmem:[%s7180_s8 + $0x1a8] sm:$0xff] }
  0xdb   : > { %1900 = vmatprep.subr.bf16.mxu1 %v6244_v9  ;;  %v6271_v8 = vld [vmem:[#allocation5 + $0x18c] ss:$16 sps:$4 sm:$0xff]  }
  0xdc   : > { %1612 = vmatmul.mubr.bf16.gmra.mxu0 %v7270_v14  ;;  %v6274_v9 = vld [vmem:[#allocation5 + $0x38c] ss:$16 sps:$4 sm:$0xff]  }
  0xdd   : > { %1725 = vmatmul.mubr.bf16.gmra.mxu1 %v7272_v15  ;;  %1788 = vmatpush1.bf16.msra.mxu0 %v6239_v10  ;;  %v7316_v10 = vpack.c.bf16 %v749_v3, %v745_v0  ;;  %v7386_v0 = vld [vmem:[#allocation5 + $0x10c] ss:$16 sps:$4 sm:$0xff]  }
  0xde   : > { %1901 = vmatpush1.bf16.msra.mxu1 %v6242_v11  ;;  %1789 = vmatprep.subr.bf16.mxu0 %v6247_v20  ;;  %v7318_v11 = vpack.c.bf16 %v751_v7, %v747_v6  ;;  %v746_v20 = vld [vmem:[%s7180_s8 + $0x190] sm:$0xff]  ;;  %v7388_v3 = vld [vmem:[#allocation5 + $0x30c] ss:$16 sps:$4 sm:$0xff]   ;;  %v7394_v6 = vld [vmem:[#allocation5 + $0x108] ss:$16 sps:$4 sm:$0xff]  }
  0xdf   : > { %1902 = vmatprep.subr.bf16.mxu1 %v6250_v21  ;;  %1621 = vmatprep.mubr.bf16.mxu0 %v7276_v25  ;;  %v750_v21 = vld [vmem:[%s7180_s8 + $0x1b0] sm:$0xff]  ;;  %v7396_v7 = vld [vmem:[#allocation5 + $0x308] ss:$16 sps:$4 sm:$0xff]  }
  0xe0   : > { %1734 = vmatprep.mubr.bf16.mxu1 %v7278_v26  ;;  %v7335_v30 = vpack.c.bf16 %v750_v21, %v746_v20  ;;  %v6531_v20 = vld [vmem:[#allocation5 + $0xa4] ss:$16 sps:$4 sm:$0xff]   ;;  %v6534_v21 = vld [vmem:[#allocation5 + $0x2a0] ss:$16 sps:$4 sm:$0xff]  }
  0xe1   : > { %1790 = vmatpush1.bf16.msra.mxu0 %v6245_v22  ;;  %v7326_v22 = vld [vmem:[#allocation5 + $0x16c] ss:$16 sps:$4 sm:$0xff]  }
  0xe2   : > { %1903 = vmatpush1.bf16.msra.mxu1 %v6248_v27  ;;  %1791 = vmatprep.subr.bf16.mxu0 %v6253_v32  ;;  %v7328_v27 = vld [vmem:[#allocation5 + $0x36c] ss:$16 sps:$4 sm:$0xff]  }
  0xe3   : > { %1904 = vmatprep.subr.bf16.mxu1 %v6256_v33  ;;  %v755_v32 = vld [vmem:[%s7180_s8 + $0x1d8] sm:$0xff] }
  0xe4   : > { %1622 = vmatmul.mubr.bf16.gmra.mxu0 %v7290_v40  ;;  %v759_v33 = vld [vmem:[%s7180_s8 + $0x1f8] sm:$0xff] }
  0xe5   : > { %1735 = vmatmul.mubr.bf16.gmra.mxu1 %v7292_v41  ;;  %1792 = vmatpush2.bf16.msra.mxu0 %v6251_v34  ;;  %v7340_v34 = vld [vmem:[#allocation5 + $0x168] ss:$16 sps:$4 sm:$0xff]   ;;  %v7352_v45 = vpack.c.bf16 %v759_v33, %v755_v32  ;;  %v6539_v32 = vld [vmem:[#allocation5 + $0x64] ss:$16 sps:$4 sm:$0xff]   ;;  %v6542_v33 = vld [vmem:[#allocation5 + $0x260] ss:$16 sps:$4 sm:$0xff]  }
  0xe6   : > { %1905 = vmatpush2.bf16.msra.mxu1 %v6254_v35  ;;  %1793 = vmatprep.subr.bf16.mxu0 %v6259_v46  ;;  %v7342_v35 = vld [vmem:[#allocation5 + $0x368] ss:$16 sps:$4 sm:$0xff]  }
  0xe7   : > { %1906 = vmatprep.subr.bf16.mxu1 %v6262_v47  ;;  %1631 = vmatprep.mubr.bf16.mxu0 %v7296_v49  ;;  %v7356_v46 = vld [vmem:[#allocation5 + $0x148] ss:$16 sps:$4 sm:$0xff]  }
  0xe8   : > { %1744 = vmatprep.mubr.bf16.mxu1 %v7298_v50  ;;  %v7358_v47 = vld [vmem:[#allocation5 + $0x348] ss:$16 sps:$4 sm:$0xff]  }
  0xe9   : > { %1794 = vmatpush2.bf16.msra.mxu0 %v6257_v48  ;;  %v752_v48 = vld [vmem:[%s7180_s8 + $0x1c0] sm:$0xff] }
  0xea   : > { %1907 = vmatpush2.bf16.msra.mxu1 %v6260_v51  ;;  %1795 = vmatprep.subr.bf16.mxu0 %v6265_v60  ;;  %v756_v51 = vld [vmem:[%s7180_s8 + $0x1e0] sm:$0xff] }
  0xeb   : > { %1908 = vmatprep.subr.bf16.mxu1 %v6268_v61  ;;  %v7374_v60 = vpack.c.bf16 %v756_v51, %v752_v48  ;;  %v7376_v61 = vpack.c.bf16 %v758_v55, %v754_v52  ;;  %v6543_v48 = vld [vmem:[#allocation5 + $0x44] ss:$16 sps:$4 sm:$0xff]   ;;  %v6546_v51 = vld [vmem:[#allocation5 + $0x240] ss:$16 sps:$4 sm:$0xff]  }
  0xec   : > { %1632 = vmatmul.mubr.bf16.gmra.mxu0 %v7310_v4  ;;  %v6547_v52 = vld [vmem:[#allocation5 + $0x24] ss:$16 sps:$4 sm:$0xff]   ;;  %v6550_v55 = vld [vmem:[#allocation5 + $0x220] ss:$16 sps:$4 sm:$0xff]  }
  0xed   : > { %1745 = vmatmul.mubr.bf16.gmra.mxu1 %v7312_v5  ;;  %1796 = vmatpush2.bf16.msra.mxu0 %v6263_v62  ;;  %v7380_v62 = vld [vmem:[#allocation5 + $0x128] ss:$16 sps:$4 sm:$0xff]  }
  0xee   : > { %1909 = vmatpush2.bf16.msra.mxu1 %v6266_v63  ;;  %1797 = vmatprep.subr.bf16.mxu0 %v6271_v8  ;;  %v7382_v63 = vld [vmem:[#allocation5 + $0x328] ss:$16 sps:$4 sm:$0xff]   ;;  %v6523_v8 = vld [vmem:[#allocation5 + $0xe4] ss:$16 sps:$4 sm:$0xff]  }
  0xef   : > { %1910 = vmatprep.subr.bf16.mxu1 %v6274_v9  ;;  %1641 = vmatprep.mubr.bf16.mxu0 %v7316_v10  ;;  %v6524_v9 = vld [vmem:[#allocation5 + $0x2e4] ss:$16 sps:$4 sm:$0xff]  }
  0xf0   : > { %1754 = vmatprep.mubr.bf16.mxu1 %v7318_v11 }
  0xf1   : > { %1798 = vmatpush2.bf16.msra.mxu0 %v6269_v12  ;;  %v6525_v12 = vld [vmem:[#allocation5 + $0xe0] ss:$16 sps:$4 sm:$0xff]  }
  0xf2   : > { %1911 = vmatpush2.bf16.msra.mxu1 %v6272_v13  ;;  %1799 = vmatprep.subr.bf16.mxu0 %v7326_v22  ;;  %v6526_v13 = vld [vmem:[#allocation5 + $0x2e0] ss:$16 sps:$4 sm:$0xff]  }
  0xf3   : > { %1912 = vmatprep.subr.bf16.mxu1 %v7328_v27 }
  0xf4   : > { %1642 = vmatmul.mubr.bf16.gmra.mxu0 %v7333_v29 }
  0xf5   : > { %1755 = vmatmul.mubr.bf16.gmra.mxu1 %v7335_v30  ;;  %1800 = vmatpush2.bf16.msra.mxu0 %v7340_v34 }
  0xf6   : > { %1913 = vmatpush2.bf16.msra.mxu1 %v7342_v35  ;;  %1801 = vmatprep.subr.bf16.mxu0 %v7346_v38 }
  0xf7   : > { %1914 = vmatprep.subr.bf16.mxu1 %v7348_v39  ;;  %1651 = vmatprep.mubr.bf16.mxu0 %v7350_v42 }
  0xf8   : > { %1764 = vmatprep.mubr.bf16.mxu1 %v7352_v45 }
  0xf9   : > { %1802 = vmatpush2.bf16.msra.mxu0 %v7356_v46 }
  0xfa   : > { %1915 = vmatpush2.bf16.msra.mxu1 %v7358_v47  ;;  %1803 = vmatprep.subr.bf16.mxu0 %v7368_v56 }
  0xfb   : > { %1916 = vmatprep.subr.bf16.mxu1 %v7370_v57 }
  0xfc   : > { %1652 = vmatmul.mubr.bf16.gmra.mxu0 %v7374_v60 }
  0xfd   : > { %1765 = vmatmul.mubr.bf16.gmra.mxu1 %v7376_v61  ;;  %1804 = vmatpush2.bf16.msra.mxu0 %v7380_v62 }
  0xfe   : > { %1917 = vmatpush2.bf16.msra.mxu1 %v7382_v63  ;;  %1805 = vmatprep.subr.bf16.mxu0 %v7386_v0 }
  0xff   : > { %1918 = vmatprep.subr.bf16.mxu1 %v7388_v3  ;;  %1807 = vmatprep.mubr.bf16.mxu0 %v7198_v53  ;;  %v6528_v53 = vld [vmem:[#allocation5 + $0x2c4] ss:$16 sps:$4 sm:$0xff]  }
 0x100   : > { %1920 = vmatprep.mubr.bf16.mxu1 %v7200_v54  ;;  %v6529_v54 = vld [vmem:[#allocation5 + $0xc0] ss:$16 sps:$4 sm:$0xff]  }
 0x101   : > { %1806 = vmatpush2.bf16.msra.mxu0 %v7394_v6 }
 0x102   : > { %1919 = vmatpush2.bf16.msra.mxu1 %v7396_v7  ;;  %2065 = vmatprep.subr.bf16.mxu0 %v6523_v8  ;;  %v6551_v8 = vld [vmem:[#allocation5 + $0x4] ss:$16 sps:$4 sm:$0xff]  }
 0x103   : > { %2178 = vmatprep.subr.bf16.mxu1 %v6524_v9  ;;  %v6554_v9 = vld [vmem:[#allocation5 + $0x200] ss:$16 sps:$4 sm:$0xff]  }
 0x104   : > { %1808 = vmatmul.mubr.bf16.vlgmr.msra.gmra.mxu0 %v7210_v16  ;;  %v6532_v16 = vld [vmem:[#allocation5 + $0x2a4] ss:$16 sps:$4 sm:$0xff]  }
 0x105   : > { %1921 = vmatmul.mubr.bf16.vlgmr.msra.gmra.mxu1 %v7212_v17  ;;  %2066 = vmatpush1.bf16.msra.mxu0 %v6525_v12  ;;  %v6533_v17 = vld [vmem:[#allocation5 + $0xa0] ss:$16 sps:$4 sm:$0xff]   ;;  %v6555_v12 = vld [vmem:[#allocation5 + $0x1e4] ss:$16 sps:$4 sm:$0xff]  }
 0x106   : > { %2179 = vmatpush1.bf16.msra.mxu1 %v6526_v13  ;;  %2067 = vmatprep.subr.bf16.mxu0 %v6527_v18  ;;  %v6558_v13 = vld [vmem:[#allocation5 + $0x3e0] ss:$16 sps:$4 sm:$0xff]   ;;  %v6559_v18 = vld [vmem:[#allocation5 + $0x1c4] ss:$16 sps:$4 sm:$0xff]  }
 0x107   : > { %2180 = vmatprep.subr.bf16.mxu1 %v6528_v53  ;;  %1817 = vmatprep.mubr.bf16.mxu0 %v7216_v23  ;;  %v6536_v23 = vld [vmem:[#allocation5 + $0x284] ss:$16 sps:$4 sm:$0xff]   ;;  %v6562_v53 = vld [vmem:[#allocation5 + $0x3c0] ss:$16 sps:$4 sm:$0xff]  }
 0x108   : > { %1930 = vmatprep.mubr.bf16.mxu1 %v7218_v24  ;;  %v6537_v24 = vld [vmem:[#allocation5 + $0x80] ss:$16 sps:$4 sm:$0xff]  }
 0x109   : > { %2068 = vmatpush1.bf16.msra.mxu0 %v6529_v54  ;;  %v6563_v54 = vld [vmem:[#allocation5 + $0x1a4] ss:$16 sps:$4 sm:$0xff]  }
 0x10a   : > { %2181 = vmatpush1.bf16.msra.mxu1 %v6530_v19  ;;  %2069 = vmatprep.subr.bf16.mxu0 %v6531_v20  ;;  %v6566_v19 = vld [vmem:[#allocation5 + $0x3a0] ss:$16 sps:$4 sm:$0xff]   ;;  %v6567_v20 = vld [vmem:[#allocation5 + $0x184] ss:$16 sps:$4 sm:$0xff]  }
 0x10b   : > { %2182 = vmatprep.subr.bf16.mxu1 %v6532_v16  ;;  %v6570_v16 = vld [vmem:[#allocation5 + $0x380] ss:$16 sps:$4 sm:$0xff]  }
 0x10c   : > { %1818 = vmatmul.mubr.bf16.gmra.mxu0 %v7230_v36  ;;  %v6540_v36 = vld [vmem:[#allocation5 + $0x264] ss:$16 sps:$4 sm:$0xff]  }
 0x10d   : > { %1931 = vmatmul.mubr.bf16.gmra.mxu1 %v7232_v37  ;;  %2070 = vmatpush1.bf16.msra.mxu0 %v6533_v17  ;;  %v6541_v37 = vld [vmem:[#allocation5 + $0x60] ss:$16 sps:$4 sm:$0xff]  }
 0x10e   : > { %2183 = vmatpush1.bf16.msra.mxu1 %v6534_v21  ;;  %2071 = vmatprep.subr.bf16.mxu0 %v6535_v28  ;;  %v6573_v17 = vld [vmem:[#allocation5 + $0x160] ss:$16 sps:$4 sm:$0xff]   ;;  %v6576_v21 = vld [vmem:[#allocation5 + $0x344] ss:$16 sps:$4 sm:$0xff]   ;;  %v793_v28 = vld [vmem:[%s7180_s8 + $0x208] sm:$0xff] }
 0x10f   : > { %2184 = vmatprep.subr.bf16.mxu1 %v6536_v23  ;;  %1827 = vmatprep.mubr.bf16.mxu0 %v7236_v43  ;;  %v6544_v43 = vld [vmem:[#allocation5 + $0x244] ss:$16 sps:$4 sm:$0xff]   ;;  %v797_v23 = vld [vmem:[%s7180_s8 + $0x228] sm:$0xff] }
 0x110   : > { %1940 = vmatprep.mubr.bf16.mxu1 %v7238_v44  ;;  %v6545_v44 = vld [vmem:[#allocation5 + $0x40] ss:$16 sps:$4 sm:$0xff]  }
 0x111   : > { %2072 = vmatpush1.bf16.msra.mxu0 %v6537_v24  ;;  %v6577_v24 = vld [vmem:[#allocation5 + $0x140] ss:$16 sps:$4 sm:$0xff]  }
 0x112   : > { %2185 = vmatpush1.bf16.msra.mxu1 %v6538_v31  ;;  %2073 = vmatprep.subr.bf16.mxu0 %v6539_v32  ;;  %v6578_v31 = vld [vmem:[#allocation5 + $0x340] ss:$16 sps:$4 sm:$0xff]   ;;  %v6579_v32 = vld [vmem:[#allocation5 + $0x124] ss:$16 sps:$4 sm:$0xff]  }
 0x113   : > { %2186 = vmatprep.subr.bf16.mxu1 %v6540_v36  ;;  %v6580_v36 = vld [vmem:[#allocation5 + $0x324] ss:$16 sps:$4 sm:$0xff]  }
 0x114   : > { %1828 = vmatmul.mubr.bf16.gmra.mxu0 %v7250_v58  ;;  %v6548_v58 = vld [vmem:[#allocation5 + $0x224] ss:$16 sps:$4 sm:$0xff]  }
 0x115   : > { %1941 = vmatmul.mubr.bf16.gmra.mxu1 %v7252_v59  ;;  %2074 = vmatpush1.bf16.msra.mxu0 %v6541_v37  ;;  %v6549_v59 = vld [vmem:[#allocation5 + $0x20] ss:$16 sps:$4 sm:$0xff]   ;;  %v7436_v37 = vpack.c.bf16 %v797_v23, %v793_v28 }
 0x116   : > { %2187 = vmatpush1.bf16.msra.mxu1 %v6542_v33  ;;  %2075 = vmatprep.subr.bf16.mxu0 %v6543_v48  ;;  %v796_v48 = vld [vmem:[%s7180_s8 + $0x220] sm:$0xff] }
 0x117   : > { %2188 = vmatprep.subr.bf16.mxu1 %v6544_v43  ;;  %1837 = vmatprep.mubr.bf16.mxu0 %v7256_v1  ;;  %v6552_v1 = vld [vmem:[#allocation5 + $0x204] ss:$16 sps:$4 sm:$0xff]  }
 0x118   : > { %1950 = vmatprep.mubr.bf16.mxu1 %v7258_v2  ;;  %v6553_v2 = vld [vmem:[#allocation5] ss:$16 sps:$4 sm:$0xff]  }
 0x119   : > { %2076 = vmatpush1.bf16.msra.mxu0 %v6545_v44  ;;  %v798_v43 = vld [vmem:[%s7180_s8 + $0x230] sm:$0xff] }
 0x11a   : > { %2189 = vmatpush1.bf16.msra.mxu1 %v6546_v51  ;;  %2077 = vmatprep.subr.bf16.mxu0 %v6547_v52  ;;  %v6581_v44 = vld [vmem:[#allocation5 + $0x120] ss:$16 sps:$4 sm:$0xff]   ;;  %v6583_v52 = vld [vmem:[#allocation5 + $0x104] ss:$16 sps:$4 sm:$0xff]  }
 0x11b   : > { %2190 = vmatprep.subr.bf16.mxu1 %v6548_v58  ;;  %v6582_v51 = vld [vmem:[#allocation5 + $0x320] ss:$16 sps:$4 sm:$0xff]   ;;  %v6584_v58 = vld [vmem:[#allocation5 + $0x304] ss:$16 sps:$4 sm:$0xff]  }
 0x11c   : > { %1838 = vmatmul.mubr.bf16.gmra.mxu0 %v7270_v14  ;;  %v6556_v14 = vld [vmem:[#allocation5 + $0x3e4] ss:$16 sps:$4 sm:$0xff]  }
 0x11d   : > { %1951 = vmatmul.mubr.bf16.gmra.mxu1 %v7272_v15  ;;  %2078 = vmatpush1.bf16.msra.mxu0 %v6549_v59  ;;  %v6557_v15 = vld [vmem:[#allocation5 + $0x1e0] ss:$16 sps:$4 sm:$0xff]   ;;  %v801_v59 = vld [vmem:[%s7180_s8 + $0x248] sm:$0xff] }
 0x11e   : > { %2191 = vmatpush1.bf16.msra.mxu1 %v6550_v55  ;;  %2079 = vmatprep.subr.bf16.mxu0 %v6551_v8  ;;  %v805_v55 = vld [vmem:[%s7180_s8 + $0x268] sm:$0xff]  ;;  %v803_v8 = vld [vmem:[%s7180_s8 + $0x258] sm:$0xff] }
 0x11f   : > { %2192 = vmatprep.subr.bf16.mxu1 %v6552_v1  ;;  %1847 = vmatprep.mubr.bf16.mxu0 %v7276_v25  ;;  %v6560_v25 = vld [vmem:[#allocation5 + $0x3c4] ss:$16 sps:$4 sm:$0xff]  }
 0x120   : > { %1960 = vmatprep.mubr.bf16.mxu1 %v7278_v26  ;;  %v6561_v26 = vld [vmem:[#allocation5 + $0x1c0] ss:$16 sps:$4 sm:$0xff]  }
 0x121   : > { %2080 = vmatpush1.bf16.msra.mxu0 %v6553_v2  ;;  %v6585_v2 = vld [vmem:[#allocation5 + $0x100] ss:$16 sps:$4 sm:$0xff]  }
 0x122   : > { %2193 = vmatpush1.bf16.msra.mxu1 %v6554_v9  ;;  %2081 = vmatprep.subr.bf16.mxu0 %v6555_v12  ;;  %v6586_v9 = vld [vmem:[#allocation5 + $0x300] ss:$16 sps:$4 sm:$0xff]   ;;  %v6587_v12 = vld [vmem:[#allocation5 + $0xec] ss:$16 sps:$4 sm:$0xff]  }
 0x123   : > { %2194 = vmatprep.subr.bf16.mxu1 %v6556_v14  ;;  %v6588_v14 = vld [vmem:[#allocation5 + $0x2ec] ss:$16 sps:$4 sm:$0xff]  }
 0x124   : > { %1848 = vmatmul.mubr.bf16.gmra.mxu0 %v7290_v40  ;;  %v6564_v40 = vld [vmem:[#allocation5 + $0x3a4] ss:$16 sps:$4 sm:$0xff]  }
 0x125   : > { %1961 = vmatmul.mubr.bf16.gmra.mxu1 %v7292_v41  ;;  %2082 = vmatpush2.bf16.msra.mxu0 %v6557_v15  ;;  %v6565_v41 = vld [vmem:[#allocation5 + $0x1a0] ss:$16 sps:$4 sm:$0xff]   ;;  %v7456_v15 = vpack.c.bf16 %v805_v55, %v801_v59  ;;  %v6601_v59 = vld [vmem:[#allocation5 + $0x88] ss:$16 sps:$4 sm:$0xff]  }
 0x126   : > { %2195 = vmatpush2.bf16.msra.mxu1 %v6558_v13  ;;  %2083 = vmatprep.subr.bf16.mxu0 %v6559_v18  ;;  %v800_v18 = vld [vmem:[%s7180_s8 + $0x240] sm:$0xff]  ;;  %v6602_v55 = vld [vmem:[#allocation5 + $0x288] ss:$16 sps:$4 sm:$0xff]  }
 0x127   : > { %2196 = vmatprep.subr.bf16.mxu1 %v6560_v25  ;;  %1857 = vmatprep.mubr.bf16.mxu0 %v7296_v49  ;;  %v6568_v49 = vld [vmem:[#allocation5 + $0x384] ss:$16 sps:$4 sm:$0xff]  }
 0x128   : > { %1970 = vmatprep.mubr.bf16.mxu1 %v7298_v50  ;;  %v6569_v50 = vld [vmem:[#allocation5 + $0x180] ss:$16 sps:$4 sm:$0xff]  }
 0x129   : > { %2084 = vmatpush2.bf16.msra.mxu0 %v6561_v26  ;;  %v804_v25 = vld [vmem:[%s7180_s8 + $0x260] sm:$0xff]  ;;  %v802_v26 = vld [vmem:[%s7180_s8 + $0x250] sm:$0xff] }
 0x12a   : > { %2197 = vmatpush2.bf16.msra.mxu1 %v6562_v53  ;;  %2085 = vmatprep.subr.bf16.mxu0 %v6563_v54  ;;  %v806_v53 = vld [vmem:[%s7180_s8 + $0x270] sm:$0xff]  ;;  %v6589_v54 = vld [vmem:[#allocation5 + $0xe8] ss:$16 sps:$4 sm:$0xff]  }
 0x12b   : > { %2198 = vmatprep.subr.bf16.mxu1 %v6564_v40  ;;  %v6590_v40 = vld [vmem:[#allocation5 + $0x2e8] ss:$16 sps:$4 sm:$0xff]  }
 0x12c   : > { %1858 = vmatmul.mubr.bf16.gmra.mxu0 %v7310_v4  ;;  %v6571_v4 = vld [vmem:[#allocation5 + $0x164] ss:$16 sps:$4 sm:$0xff]  }
 0x12d   : > { %1971 = vmatmul.mubr.bf16.gmra.mxu1 %v7312_v5  ;;  %2086 = vmatpush2.bf16.msra.mxu0 %v6565_v41  ;;  %v6572_v5 = vld [vmem:[#allocation5 + $0x364] ss:$16 sps:$4 sm:$0xff]   ;;  %v6591_v41 = vld [vmem:[#allocation5 + $0xcc] ss:$16 sps:$4 sm:$0xff]  }
 0x12e   : > { %2199 = vmatpush2.bf16.msra.mxu1 %v6566_v19  ;;  %2087 = vmatprep.subr.bf16.mxu0 %v6567_v20  ;;  %v6592_v19 = vld [vmem:[#allocation5 + $0x2cc] ss:$16 sps:$4 sm:$0xff]  }
 0x12f   : > { %2200 = vmatprep.subr.bf16.mxu1 %v6568_v49  ;;  %1867 = vmatprep.mubr.bf16.mxu0 %v7316_v10  ;;  %v6574_v10 = vld [vmem:[#allocation5 + $0x360] ss:$16 sps:$4 sm:$0xff]   ;;  %v809_v20 = vld [vmem:[%s7180_s8 + $0x288] sm:$0xff] }
 0x130   : > { %1980 = vmatprep.mubr.bf16.mxu1 %v7318_v11  ;;  %v6575_v11 = vld [vmem:[#allocation5 + $0x144] ss:$16 sps:$4 sm:$0xff]   ;;  %v813_v49 = vld [vmem:[%s7180_s8 + $0x2a8] sm:$0xff] }
 0x131   : > { %2088 = vmatpush2.bf16.msra.mxu0 %v6569_v50  ;;  %v811_v50 = vld [vmem:[%s7180_s8 + $0x298] sm:$0xff]  ;;  %v7476_v28 = vpack.c.bf16 %v813_v49, %v809_v20 }
 0x132   : > { %2201 = vmatpush2.bf16.msra.mxu1 %v6570_v16  ;;  %2089 = vmatprep.subr.bf16.mxu0 %v6571_v4  ;;  %v815_v16 = vld [vmem:[%s7180_s8 + $0x2b8] sm:$0xff]  ;;  %v7472_v4 = vpack.c.bf16 %v804_v25, %v800_v18  ;;  %v818_v18 = vld [vmem:[%s7180_s8 + $0x2d0] sm:$0xff] }
 0x133   : > { %2202 = vmatprep.subr.bf16.mxu1 %v6572_v5  ;;  %v7474_v5 = vpack.c.bf16 %v806_v53, %v802_v26  ;;  %v7478_v23 = vpack.c.bf16 %v815_v16, %v811_v50  ;;  %v822_v25 = vld [vmem:[%s7180_s8 + $0x2f0] sm:$0xff]  ;;  %v6605_v26 = vld [vmem:[#allocation5 + $0x68] ss:$16 sps:$4 sm:$0xff]  }
 0x134   : > { %1868 = vmatmul.mubr.bf16.gmra.mxu0 %v7333_v29  ;;  %v795_v29 = vld [vmem:[%s7180_s8 + $0x218] sm:$0xff]  ;;  %v7512_v49 = vpack.c.bf16 %v822_v25, %v818_v18 }
 0x135   : > { %1981 = vmatmul.mubr.bf16.gmra.mxu1 %v7335_v30  ;;  %2090 = vmatpush2.bf16.msra.mxu0 %v6573_v17  ;;  %v799_v30 = vld [vmem:[%s7180_s8 + $0x238] sm:$0xff] }
 0x136   : > { %2203 = vmatpush2.bf16.msra.mxu1 %v6574_v10  ;;  %2091 = vmatprep.subr.bf16.mxu0 %v6575_v11  ;;  %v7438_v33 = vpack.c.bf16 %v799_v30, %v795_v29  ;;  %v6593_v17 = vld [vmem:[#allocation5 + $0xc8] ss:$16 sps:$4 sm:$0xff]   ;;  %v6595_v11 = vld [vmem:[#allocation5 + $0xac] ss:$16 sps:$4 sm:$0xff]   ;;  %v808_v29 = vld [vmem:[%s7180_s8 + $0x280] sm:$0xff] }
 0x137   : > { %2204 = vmatprep.subr.bf16.mxu1 %v6576_v21  ;;  %1877 = vmatprep.mubr.bf16.mxu0 %v7350_v42  ;;  %v792_v42 = vld [vmem:[%s7180_s8 + $0x200] sm:$0xff]  ;;  %v6594_v10 = vld [vmem:[#allocation5 + $0x2c8] ss:$16 sps:$4 sm:$0xff]   ;;  %v6596_v21 = vld [vmem:[#allocation5 + $0x2ac] ss:$16 sps:$4 sm:$0xff]  }
 0x138   : > { %1990 = vmatprep.mubr.bf16.mxu1 %v7352_v45  ;;  %v794_v45 = vld [vmem:[%s7180_s8 + $0x210] sm:$0xff]  ;;  %v812_v30 = vld [vmem:[%s7180_s8 + $0x2a0] sm:$0xff]  ;;  %v6606_v53 = vld [vmem:[#allocation5 + $0x268] ss:$16 sps:$4 sm:$0xff]  }
 0x139   : > { %2092 = vmatpush2.bf16.msra.mxu0 %v6577_v24  ;;  %v7454_v1 = vpack.c.bf16 %v798_v43, %v794_v45  ;;  %v810_v24 = vld [vmem:[%s7180_s8 + $0x290] sm:$0xff]  ;;  %v817_v45 = vld [vmem:[%s7180_s8 + $0x2c8] sm:$0xff]  ;;  %v827_v50 = vld [vmem:[%s7180_s8 + $0x318] sm:$0xff] }
 0x13a   : > { %2205 = vmatpush2.bf16.msra.mxu1 %v6578_v31  ;;  %2093 = vmatprep.subr.bf16.mxu0 %v6579_v32  ;;  %v814_v31 = vld [vmem:[%s7180_s8 + $0x2b0] sm:$0xff]  ;;  %v6597_v32 = vld [vmem:[#allocation5 + $0xa8] ss:$16 sps:$4 sm:$0xff]   ;;  %v6619_v18 = vld [vmem:[#allocation5 + $0x1ec] ss:$16 sps:$4 sm:$0xff]  }
 0x13b   : > { %2206 = vmatprep.subr.bf16.mxu1 %v6580_v36  ;;  %v6598_v36 = vld [vmem:[#allocation5 + $0x2a8] ss:$16 sps:$4 sm:$0xff]   ;;  %v6620_v25 = vld [vmem:[#allocation5 + $0x3ec] ss:$16 sps:$4 sm:$0xff]  }
 0x13c   : > { %1878 = vmatmul.mubr.bf16.gmra.mxu0 %v7374_v60  ;;  %v807_v60 = vld [vmem:[%s7180_s8 + $0x278] sm:$0xff]  ;;  %v821_v43 = vld [vmem:[%s7180_s8 + $0x2e8] sm:$0xff] }
 0x13d   : > { %1991 = vmatmul.mubr.bf16.gmra.mxu1 %v7376_v61  ;;  %2094 = vmatpush2.bf16.msra.mxu0 %v6581_v44  ;;  %v7452_v61 = vpack.c.bf16 %v796_v48, %v792_v42  ;;  %v7458_v13 = vpack.c.bf16 %v807_v60, %v803_v8  ;;  %v6599_v42 = vld [vmem:[#allocation5 + $0x8c] ss:$16 sps:$4 sm:$0xff]  }
 0x13e   : > { %2207 = vmatpush2.bf16.msra.mxu1 %v6582_v51  ;;  %2095 = vmatprep.subr.bf16.mxu0 %v6583_v52  ;;  %v6600_v48 = vld [vmem:[#allocation5 + $0x28c] ss:$16 sps:$4 sm:$0xff]   ;;  %v7492_v52 = vpack.c.bf16 %v812_v30, %v808_v29 }
 0x13f   : > { %2208 = vmatprep.subr.bf16.mxu1 %v6584_v58  ;;  %2097 = vmatprep.mubr.bf16.mxu0 %v7436_v37  ;;  %v819_v44 = vld [vmem:[%s7180_s8 + $0x2d8] sm:$0xff]  ;;  %v7494_v58 = vpack.c.bf16 %v814_v31, %v810_v24  ;;  %v824_v24 = vld [vmem:[%s7180_s8 + $0x300] sm:$0xff] }
 0x140   : > { %2210 = vmatprep.mubr.bf16.mxu1 %v7438_v33  ;;  %v823_v51 = vld [vmem:[%s7180_s8 + $0x2f8] sm:$0xff]  ;;  %v828_v31 = vld [vmem:[%s7180_s8 + $0x320] sm:$0xff] }
 0x141   : > { %2096 = vmatpush2.bf16.msra.mxu0 %v6585_v2  ;;  %v6603_v8 = vld [vmem:[#allocation5 + $0x6c] ss:$16 sps:$4 sm:$0xff]   ;;  %v7496_v2 = vpack.c.bf16 %v821_v43, %v817_v45 }
 0x142   : > { %2209 = vmatpush2.bf16.msra.mxu1 %v6586_v9  ;;  %2291 = vmatprep.subr.bf16.mxu0 %v6587_v12  ;;  %v6604_v60 = vld [vmem:[#allocation5 + $0x26c] ss:$16 sps:$4 sm:$0xff]   ;;  %v7498_v9 = vpack.c.bf16 %v823_v51, %v819_v44  ;;  %v816_v12 = vld [vmem:[%s7180_s8 + $0x2c0] sm:$0xff]  ;;  %v7529_v51 = vpack.c.bf16 %v828_v31, %v824_v24 }
 0x143   : > { %2404 = vmatprep.subr.bf16.mxu1 %v6588_v14  ;;  %v820_v14 = vld [vmem:[%s7180_s8 + $0x2e0] sm:$0xff]  ;;  %v831_v16 = vld [vmem:[%s7180_s8 + $0x338] sm:$0xff]  ;;  %v833_v44 = vld [vmem:[%s7180_s8 + $0x348] sm:$0xff] }
 0x144   : > { %2098 = vmatmul.mubr.bf16.vlgmr.msra.gmra.mxu0 %v7452_v61  ;;  %v7510_v20 = vpack.c.bf16 %v820_v14, %v816_v12  ;;  %v7518_v30 = vpack.c.bf16 %v831_v16, %v827_v50  ;;  %v6615_v45 = vld [vmem:[#allocation5 + $0xc] ss:$16 sps:$4 sm:$0xff]   ;;  %v6617_v12 = vld [vmem:[#allocation5 + $0x8] ss:$16 sps:$4 sm:$0xff]   ;;  %v834_v50 = vld [vmem:[%s7180_s8 + $0x350] sm:$0xff] }
 0x145   : > { %2211 = vmatmul.mubr.bf16.vlgmr.msra.gmra.mxu1 %v7454_v1  ;;  %2292 = vmatpush1.bf16.msra.mxu0 %v6589_v54  ;;  %v6607_v54 = vld [vmem:[#allocation5 + $0x4c] ss:$16 sps:$4 sm:$0xff]   ;;  %v6618_v14 = vld [vmem:[#allocation5 + $0x208] ss:$16 sps:$4 sm:$0xff]   ;;  %v838_v16 = vld [vmem:[%s7180_s8 + $0x370] sm:$0xff] }
 0x146   : > { %2405 = vmatpush1.bf16.msra.mxu1 %v6590_v40  ;;  %2293 = vmatprep.subr.bf16.mxu0 %v6591_v41  ;;  %v6608_v40 = vld [vmem:[#allocation5 + $0x24c] ss:$16 sps:$4 sm:$0xff]   ;;  %v7551_v24 = vpack.c.bf16 %v838_v16, %v834_v50 }
 0x147   : > { %2406 = vmatprep.subr.bf16.mxu1 %v6592_v19  ;;  %2107 = vmatprep.mubr.bf16.mxu0 %v7456_v15  ;;  %v825_v41 = vld [vmem:[%s7180_s8 + $0x308] sm:$0xff] }
 0x148   : > { %2220 = vmatprep.mubr.bf16.mxu1 %v7458_v13  ;;  %v829_v19 = vld [vmem:[%s7180_s8 + $0x328] sm:$0xff] }
 0x149   : > { %2294 = vmatpush1.bf16.msra.mxu0 %v6593_v17  ;;  %v6609_v17 = vld [vmem:[#allocation5 + $0x48] ss:$16 sps:$4 sm:$0xff]   ;;  %v7516_v29 = vpack.c.bf16 %v829_v19, %v825_v41  ;;  %v6616_v43 = vld [vmem:[#allocation5 + $0x20c] ss:$16 sps:$4 sm:$0xff]   ;;  %v836_v19 = vld [vmem:[%s7180_s8 + $0x360] sm:$0xff] }
 0x14a   : > { %2407 = vmatpush1.bf16.msra.mxu1 %v6594_v10  ;;  %2295 = vmatprep.subr.bf16.mxu0 %v6595_v11  ;;  %v6610_v10 = vld [vmem:[#allocation5 + $0x248] ss:$16 sps:$4 sm:$0xff]   ;;  %v6611_v11 = vld [vmem:[#allocation5 + $0x2c] ss:$16 sps:$4 sm:$0xff]  }
 0x14b   : > { %2408 = vmatprep.subr.bf16.mxu1 %v6596_v21  ;;  %v6612_v21 = vld [vmem:[#allocation5 + $0x22c] ss:$16 sps:$4 sm:$0xff]   ;;  %v6622_v41 = vld [vmem:[#allocation5 + $0x3e8] ss:$16 sps:$4 sm:$0xff]  }
 0x14c   : > { %2108 = vmatmul.mubr.bf16.gmra.mxu0 %v7472_v4  ;;  %v845_v31 = vld [vmem:[%s7180_s8 + $0x3a8] sm:$0xff] }
 0x14d   : > { %2221 = vmatmul.mubr.bf16.gmra.mxu1 %v7474_v5  ;;  %2296 = vmatpush1.bf16.msra.mxu0 %v6597_v32  ;;  %v826_v32 = vld [vmem:[%s7180_s8 + $0x310] sm:$0xff]  ;;  %v853_v16 = vld [vmem:[%s7180_s8 + $0x3e8] sm:$0xff] }
 0x14e   : > { %2409 = vmatpush1.bf16.msra.mxu1 %v6598_v36  ;;  %2297 = vmatprep.subr.bf16.mxu0 %v6599_v42  ;;  %v830_v36 = vld [vmem:[%s7180_s8 + $0x330] sm:$0xff]  ;;  %v6613_v42 = vld [vmem:[#allocation5 + $0x28] ss:$16 sps:$4 sm:$0xff]  }
 0x14f   : > { %2410 = vmatprep.subr.bf16.mxu1 %v6600_v48  ;;  %2117 = vmatprep.mubr.bf16.mxu0 %v7476_v28  ;;  %v6614_v48 = vld [vmem:[#allocation5 + $0x228] ss:$16 sps:$4 sm:$0xff]  }
 0x150   : > { %2230 = vmatprep.mubr.bf16.mxu1 %v7478_v23 }
 0x151   : > { %2298 = vmatpush1.bf16.msra.mxu0 %v6601_v59  ;;  %v7531_v59 = vpack.c.bf16 %v830_v36, %v826_v32  ;;  %v843_v32 = vld [vmem:[%s7180_s8 + $0x398] sm:$0xff] }
 0x152   : > { %2411 = vmatpush1.bf16.msra.mxu1 %v6602_v55  ;;  %2299 = vmatprep.subr.bf16.mxu0 %v6603_v8  ;;  %v837_v55 = vld [vmem:[%s7180_s8 + $0x368] sm:$0xff]  ;;  %v835_v8 = vld [vmem:[%s7180_s8 + $0x358] sm:$0xff] }
 0x153   : > { %2412 = vmatprep.subr.bf16.mxu1 %v6604_v60  ;;  %v839_v60 = vld [vmem:[%s7180_s8 + $0x378] sm:$0xff] }
 0x154   : > { %2118 = vmatmul.mubr.bf16.gmra.mxu0 %v7492_v52  ;;  %v847_v36 = vld [vmem:[%s7180_s8 + $0x3b8] sm:$0xff] }
 0x155   : > { %2231 = vmatmul.mubr.bf16.gmra.mxu1 %v7494_v58  ;;  %2300 = vmatpush1.bf16.msra.mxu0 %v6605_v26  ;;  %v7536_v26 = vpack.c.bf16 %v837_v55, %v833_v44  ;;  %v7558_v55 = vpack.c.bf16 %v847_v36, %v843_v32 }
 0x156   : > { %2413 = vmatpush1.bf16.msra.mxu1 %v6606_v53  ;;  %2301 = vmatprep.subr.bf16.mxu0 %v6607_v54  ;;  %v7538_v53 = vpack.c.bf16 %v839_v60, %v835_v8  ;;  %v832_v54 = vld [vmem:[%s7180_s8 + $0x340] sm:$0xff]  ;;  %v6629_v60 = vld [vmem:[#allocation5 + $0x1a8] ss:$16 sps:$4 sm:$0xff]  }
 0x157   : > { %2414 = vmatprep.subr.bf16.mxu1 %v6608_v40  ;;  %2127 = vmatprep.mubr.bf16.mxu0 %v7496_v2  ;;  %v6621_v40 = vld [vmem:[#allocation5 + $0x1e8] ss:$16 sps:$4 sm:$0xff]   ;;  %v840_v8 = vld [vmem:[%s7180_s8 + $0x380] sm:$0xff] }
 0x158   : > { %2240 = vmatprep.mubr.bf16.mxu1 %v7498_v9 }
 0x159   : > { %2302 = vmatpush1.bf16.msra.mxu0 %v6609_v17  ;;  %v6623_v17 = vld [vmem:[#allocation5 + $0x1cc] ss:$16 sps:$4 sm:$0xff]  }
 0x15a   : > { %2415 = vmatpush1.bf16.msra.mxu1 %v6610_v10  ;;  %2303 = vmatprep.subr.bf16.mxu0 %v6611_v11  ;;  %v6624_v10 = vld [vmem:[#allocation5 + $0x3cc] ss:$16 sps:$4 sm:$0xff]  }
 0x15b   : > { %2416 = vmatprep.subr.bf16.mxu1 %v6612_v21  ;;  %v841_v11 = vld [vmem:[%s7180_s8 + $0x388] sm:$0xff]  ;;  %v7549_v21 = vpack.c.bf16 %v836_v19, %v832_v54 }
 0x15c   : > { %2128 = vmatmul.mubr.bf16.gmra.mxu0 %v7510_v20  ;;  %v7556_v44 = vpack.c.bf16 %v845_v31, %v841_v11  ;;  %v6631_v54 = vld [vmem:[#allocation5 + $0x18c] ss:$16 sps:$4 sm:$0xff]   ;;  %v6633_v11 = vld [vmem:[#allocation5 + $0x188] ss:$16 sps:$4 sm:$0xff]  }
 0x15d   : > { %2241 = vmatmul.mubr.bf16.gmra.mxu1 %v7512_v49  ;;  %2304 = vmatpush1.bf16.msra.mxu0 %v6613_v42  ;;  %v6625_v42 = vld [vmem:[#allocation5 + $0x1c8] ss:$16 sps:$4 sm:$0xff]  }
 0x15e   : > { %2417 = vmatpush1.bf16.msra.mxu1 %v6614_v48  ;;  %2305 = vmatprep.subr.bf16.mxu0 %v6615_v45  ;;  %v6626_v48 = vld [vmem:[#allocation5 + $0x3c8] ss:$16 sps:$4 sm:$0xff]   ;;  %v6627_v45 = vld [vmem:[#allocation5 + $0x1ac] ss:$16 sps:$4 sm:$0xff]  }
 0x15f   : > { %2418 = vmatprep.subr.bf16.mxu1 %v6616_v43  ;;  %2137 = vmatprep.mubr.bf16.mxu0 %v7516_v29  ;;  %v6628_v43 = vld [vmem:[#allocation5 + $0x3ac] ss:$16 sps:$4 sm:$0xff]   ;;  %v6634_v31 = vld [vmem:[#allocation5 + $0x388] ss:$16 sps:$4 sm:$0xff]  }
 0x160   : > { %2250 = vmatprep.mubr.bf16.mxu1 %v7518_v30 }
 0x161   : > { %2306 = vmatpush1.bf16.msra.mxu0 %v6617_v12  ;;  %v6630_v12 = vld [vmem:[#allocation5 + $0x3a8] ss:$16 sps:$4 sm:$0xff]  }
 0x162   : > { %2419 = vmatpush1.bf16.msra.mxu1 %v6618_v14  ;;  %2307 = vmatprep.subr.bf16.mxu0 %v6619_v18  ;;  %v844_v14 = vld [vmem:[%s7180_s8 + $0x3a0] sm:$0xff]  ;;  %v842_v18 = vld [vmem:[%s7180_s8 + $0x390] sm:$0xff] }
 0x163   : > { %2420 = vmatprep.subr.bf16.mxu1 %v6620_v25  ;;  %v846_v25 = vld [vmem:[%s7180_s8 + $0x3b0] sm:$0xff]  ;;  %v7569_v19 = vpack.c.bf16 %v844_v14, %v840_v8  ;;  %v6328_v8 = vld [vmem:[#allocation8 + $0x2a4] ss:$16 sps:$4 sm:$0xff]  }
 0x164   : > { %2138 = vmatmul.mubr.bf16.gmra.mxu0 %v7529_v51  ;;  %v7571_v50 = vpack.c.bf16 %v846_v25, %v842_v18  ;;  %v6308_v14 = vld [vmem:[#allocation8 + $0x80] ss:$16 sps:$4 sm:$0xff]   ;;  %v6334_v18 = vld [vmem:[#allocation8 + $0x284] ss:$16 sps:$4 sm:$0xff]  }
 0x165   : > { %2251 = vmatmul.mubr.bf16.gmra.mxu1 %v7531_v59  ;;  %2308 = vmatpush2.bf16.msra.mxu0 %v6621_v40  ;;  %v6632_v40 = vld [vmem:[#allocation5 + $0x38c] ss:$16 sps:$4 sm:$0xff]  }
 0x166   : > { %2421 = vmatpush2.bf16.msra.mxu1 %v6622_v41  ;;  %2309 = vmatprep.subr.bf16.mxu0 %v6623_v17  ;;  %v849_v41 = vld [vmem:[%s7180_s8 + $0x3c8] sm:$0xff]  ;;  %v851_v17 = vld [vmem:[%s7180_s8 + $0x3d8] sm:$0xff] }
 0x167   : > { %2422 = vmatprep.subr.bf16.mxu1 %v6624_v10  ;;  %2147 = vmatprep.mubr.bf16.mxu0 %v7536_v26  ;;  %v855_v10 = vld [vmem:[%s7180_s8 + $0x3f8] sm:$0xff]  ;;  %v7578_v32 = vpack.c.bf16 %v853_v16, %v849_v41 }
 0x168   : > { %2260 = vmatprep.mubr.bf16.mxu1 %v7538_v53  ;;  %v7580_v36 = vpack.c.bf16 %v855_v10, %v851_v17  ;;  %v6319_v17 = vld [vmem:[#allocation8 + $0x44] ss:$16 sps:$4 sm:$0xff]   ;;  %v6332_v10 = vld [vmem:[#allocation8 + $0x280] ss:$16 sps:$4 sm:$0xff]  }
 0x169   : > { %2310 = vmatpush2.bf16.msra.mxu0 %v6625_v42  ;;  %v848_v42 = vld [vmem:[%s7180_s8 + $0x3c0] sm:$0xff] }
 0x16a   : > { %2423 = vmatpush2.bf16.msra.mxu1 %v6626_v48  ;;  %2311 = vmatprep.subr.bf16.mxu0 %v6627_v45  ;;  %v852_v48 = vld [vmem:[%s7180_s8 + $0x3e0] sm:$0xff]  ;;  %v850_v45 = vld [vmem:[%s7180_s8 + $0x3d0] sm:$0xff] }
 0x16b   : > { %2424 = vmatprep.subr.bf16.mxu1 %v6628_v43  ;;  %v854_v43 = vld [vmem:[%s7180_s8 + $0x3f0] sm:$0xff] }
 0x16c   : > { %2148 = vmatmul.mubr.bf16.gmra.mxu0 %v7549_v21 }
 0x16d   : > { %2261 = vmatmul.mubr.bf16.gmra.mxu1 %v7551_v24  ;;  %2312 = vmatpush2.bf16.msra.mxu0 %v6629_v60 }
 0x16e   : > { %2425 = vmatpush2.bf16.msra.mxu1 %v6630_v12  ;;  %2313 = vmatprep.subr.bf16.mxu0 %v6631_v54  ;;  %v6326_v12 = vld [vmem:[#allocation8 + $0x2a0] ss:$16 sps:$4 sm:$0xff]  }
 0x16f   : > { %2426 = vmatprep.subr.bf16.mxu1 %v6632_v40  ;;  %2157 = vmatprep.mubr.bf16.mxu0 %v7556_v44  ;;  %v6313_v40 = vld [vmem:[#allocation8 + $0x64] ss:$16 sps:$4 sm:$0xff]  }
 0x170   : > { %2270 = vmatprep.mubr.bf16.mxu1 %v7558_v55 }
 0x171   : > { %2314 = vmatpush2.bf16.msra.mxu0 %v6633_v11 }
 0x172   : > { %2427 = vmatpush2.bf16.msra.mxu1 %v6634_v31  ;;  %2315 = vmatprep.subr.bf16.mxu0 %v7326_v22  ;;  %v7594_v22 = vpack.c.bf16 %v852_v48, %v848_v42  ;;  %v6340_v31 = vld [vmem:[#allocation8 + $0x264] ss:$16 sps:$4 sm:$0xff]   ;;  %v6317_v42 = vld [vmem:[#allocation8 + $0x40] ss:$16 sps:$4 sm:$0xff]  }
 0x173   : > { %2428 = vmatprep.subr.bf16.mxu1 %v7328_v27  ;;  %v7596_v27 = vpack.c.bf16 %v854_v43, %v850_v45  ;;  %v6325_v43 = vld [vmem:[#allocation8 + $0x24] ss:$16 sps:$4 sm:$0xff]  }
 0x174   : > { %2158 = vmatmul.mubr.bf16.gmra.mxu0 %v7569_v19 }
 0x175   : > { %2271 = vmatmul.mubr.bf16.gmra.mxu1 %v7571_v50  ;;  %2316 = vmatpush2.bf16.msra.mxu0 %v7340_v34  ;;  %v6301_v34 = vld [vmem:[#allocation8 + $0xe4] ss:$16 sps:$4 sm:$0xff]  }
 0x176   : > { %2429 = vmatpush2.bf16.msra.mxu1 %v7342_v35  ;;  %2317 = vmatprep.subr.bf16.mxu0 %v7346_v38  ;;  %v6316_v35 = vld [vmem:[#allocation8 + $0x2e4] ss:$16 sps:$4 sm:$0xff]   ;;  %v6299_v38 = vld [vmem:[#allocation8 + $0xe0] ss:$16 sps:$4 sm:$0xff]  }
 0x177   : > { %2430 = vmatprep.subr.bf16.mxu1 %v7348_v39  ;;  %2167 = vmatprep.mubr.bf16.mxu0 %v7578_v32  ;;  %v6304_v39 = vld [vmem:[#allocation8 + $0xc4] ss:$16 sps:$4 sm:$0xff]  }
 0x178   : > { %2280 = vmatprep.mubr.bf16.mxu1 %v7580_v36 }
 0x179   : > { %2318 = vmatpush2.bf16.msra.mxu0 %v7356_v46  ;;  %v6314_v46 = vld [vmem:[#allocation8 + $0x2e0] ss:$16 sps:$4 sm:$0xff]  }
 0x17a   : > { %2431 = vmatpush2.bf16.msra.mxu1 %v7358_v47  ;;  %2319 = vmatprep.subr.bf16.mxu0 %v7368_v56 }
 0x17b   : > { %2432 = vmatprep.subr.bf16.mxu1 %v7370_v57  ;;  %v6322_v57 = vld [vmem:[#allocation8 + $0x2c4] ss:$16 sps:$4 sm:$0xff]  }
 0x17c   : > { %2168 = vmatmul.mubr.bf16.gmra.mxu0 %v7594_v22 }
 0x17d   : > { %2281 = vmatmul.mubr.bf16.gmra.mxu1 %v7596_v27  ;;  %2320 = vmatpush2.bf16.msra.mxu0 %v7380_v62  ;;  %v6302_v62 = vld [vmem:[#allocation8 + $0xc0] ss:$16 sps:$4 sm:$0xff]  }
 0x17e   : > { %2433 = vmatpush2.bf16.msra.mxu1 %v7382_v63  ;;  %2321 = vmatprep.subr.bf16.mxu0 %v7386_v0 }
 0x17f   : > { %2434 = vmatprep.subr.bf16.mxu1 %v7388_v3  ;;  %2323 = vmatprep.mubr.bf16.mxu0 %v7436_v37  ;;  %v6307_v3 = vld [vmem:[#allocation8 + $0xa4] ss:$16 sps:$4 sm:$0xff]  }
 0x180   : > { %2436 = vmatprep.mubr.bf16.mxu1 %v7438_v33  ;;  %v6305_v33 = vld [vmem:[#allocation8 + $0xa0] ss:$16 sps:$4 sm:$0xff]  }
 0x181   : > { %2322 = vmatpush2.bf16.msra.mxu0 %v7394_v6  ;;  %v6320_v6 = vld [vmem:[#allocation8 + $0x2c0] ss:$16 sps:$4 sm:$0xff]  }
 0x182   : > { %2435 = vmatpush2.bf16.msra.mxu1 %v7396_v7  ;;  %3274 = vmatprep.subr.bf16.mxu0 %v6301_v34  ;;  %v6338_v34 = vld [vmem:[#allocation8 + $0x260] ss:$16 sps:$4 sm:$0xff]  }
 0x183   : > { %3387 = vmatprep.subr.bf16.mxu1 %v6316_v35 }
 0x184   : > { %v7612_v47 = vpop.f32.mrf.mxu0  ;;  %2324 = vmatmul.mubr.bf16.vlgmr.msra.gmra.mxu0 %v7452_v61 }
 0x185   : > { %v7614_v56 = vpop.f32.mrf.mxu1  ;;  %2437 = vmatmul.mubr.bf16.vlgmr.msra.gmra.mxu1 %v7454_v1  ;;  %3275 = vmatpush1.bf16.msra.mxu0 %v6299_v38 }
 0x186   : > { %2333 = vmatprep.mubr.bf16.mxu0 %v7456_v15  ;;  %v7619_v63 = vpop.f32.mrf.mxu0  ;;  %3276 = vmatprep.subr.bf16.mxu0 %v6304_v39  ;;  %v6310_v15 = vld [vmem:[#allocation8 + $0x84] ss:$16 sps:$4 sm:$0xff]  }
 0x187   : > { %v7621_v0 = vpop.f32.mrf.mxu1  ;;  %2446 = vmatprep.mubr.bf16.mxu1 %v7458_v13  ;;  %3388 = vmatpush1.bf16.msra.mxu1 %v6314_v46  ;;  %v6331_v39 = vld [vmem:[#allocation8 + $0x4] ss:$16 sps:$4 sm:$0xff]  }
 0x188   : > { %v7624_v7 = vpop.f32.mrf.mxu0  ;;  %3389 = vmatprep.subr.bf16.mxu1 %v6322_v57  ;;  %v6346_v46 = vld [vmem:[#allocation8 + $0x244] ss:$16 sps:$4 sm:$0xff]  }
 0x189   : > { %v7626_v37 = vpop.f32.mrf.mxu1  ;;  %3277 = vmatpush1.bf16.msra.mxu0 %v6302_v62  ;;  %v6344_v62 = vld [vmem:[#allocation8 + $0x240] ss:$16 sps:$4 sm:$0xff]  }
 0x18a   : > { %v7628_v61 = vpop.f32.mrf.mxu0  ;;  %3278 = vmatprep.subr.bf16.mxu0 %v6307_v3  ;;  %v6329_v3 = vld [vmem:[#allocation8] ss:$16 sps:$4 sm:$0xff]  }
 0x18b   : > { %v7630_v1 = vpop.f32.mrf.mxu1  ;;  %3390 = vmatpush1.bf16.msra.mxu1 %v6320_v6  ;;  %v6352_v6 = vld [vmem:[#allocation8 + $0x224] ss:$16 sps:$4 sm:$0xff]  }
 0x18c   : > { %v7632_v60 = vpop.f32.mrf.mxu0  ;;  %2334 = vmatmul.mubr.bf16.gmra.mxu0 %v7472_v4  ;;  %3391 = vmatprep.subr.bf16.mxu1 %v6328_v8  ;;  %v6337_v8 = vld [vmem:[#allocation8 + $0x1e4] ss:$16 sps:$4 sm:$0xff]  }
 0x18d   : > { %v7634_v13 = vpop.f32.mrf.mxu1  ;;  %2447 = vmatmul.mubr.bf16.gmra.mxu1 %v7474_v5  ;;  %3279 = vmatpush1.bf16.msra.mxu0 %v6305_v33  ;;  %v6311_v5 = vld [vmem:[#allocation8 + $0x60] ss:$16 sps:$4 sm:$0xff]  }
 0x18e   : > { %2343 = vmatprep.mubr.bf16.mxu0 %v7476_v28  ;;  %v7639_v25 = vpop.f32.mrf.mxu0  ;;  %3280 = vmatprep.subr.bf16.mxu0 %v6310_v15 }
 0x18f   : > { %v7641_v54 = vpop.f32.mrf.mxu1  ;;  %2456 = vmatprep.mubr.bf16.mxu1 %v7478_v23  ;;  %3392 = vmatpush1.bf16.msra.mxu1 %v6326_v12 }
 0x190   : > { %v7644_v41 = vpop.f32.mrf.mxu0  ;;  %3393 = vmatprep.subr.bf16.mxu1 %v6334_v18  ;;  %v6343_v18 = vld [vmem:[#allocation8 + $0x1c4] ss:$16 sps:$4 sm:$0xff]  }
 0x191   : > { %v7646_v4 = vpop.f32.mrf.mxu1  ;;  %3281 = vmatpush1.bf16.msra.mxu0 %v6308_v14 }
 0x192   : > { %v7648_v16 = vpop.f32.mrf.mxu0  ;;  %3282 = vmatprep.subr.bf16.mxu0 %v6313_v40  ;;  %v889_v40 = vlaneseq }
 0x193   : > { %v7650_v28 = vpop.f32.mrf.mxu1  ;;  %3394 = vmatpush1.bf16.msra.mxu1 %v6332_v10  ;;  %v6358_v10 = vld [vmem:[#allocation8 + $0x204] ss:$16 sps:$4 sm:$0xff]  }
 0x194   : > { %v7652_v11 = vpop.f32.mrf.mxu0  ;;  %2344 = vmatmul.mubr.bf16.gmra.mxu0 %v7492_v52  ;;  %3395 = vmatprep.subr.bf16.mxu1 %v6340_v31  ;;  %v6341_v31 = vld [vmem:[#allocation8 + $0x1c0] ss:$16 sps:$4 sm:$0xff]  }
 0x195   : > { %v7654_v23 = vpop.f32.mrf.mxu1  ;;  %2457 = vmatmul.mubr.bf16.gmra.mxu1 %v7494_v58  ;;  %3283 = vmatpush1.bf16.msra.mxu0 %v6311_v5  ;;  %v6323_v58 = vld [vmem:[#allocation8 + $0x20] ss:$16 sps:$4 sm:$0xff]  }
 0x196   : > { %2353 = vmatprep.mubr.bf16.mxu0 %v7496_v2  ;;  %v7659_v48 = vpop.f32.mrf.mxu0  ;;  %3284 = vmatprep.subr.bf16.mxu0 %v6319_v17  ;;  %v6350_v5 = vld [vmem:[#allocation8 + $0x220] ss:$16 sps:$4 sm:$0xff]  }
 0x197   : > { %v7661_v45 = vpop.f32.mrf.mxu1  ;;  %2466 = vmatprep.mubr.bf16.mxu1 %v7498_v9  ;;  %3396 = vmatpush1.bf16.msra.mxu1 %v6338_v34  ;;  %v6349_v34 = vld [vmem:[#allocation8 + $0x1a4] ss:$16 sps:$4 sm:$0xff]  }
 0x198   : > { %v7664_v35 = vpop.f32.mrf.mxu0  ;;  %3397 = vmatprep.subr.bf16.mxu1 %v6346_v46 }
 0x199   : > { %v7666_v52 = vpop.f32.mrf.mxu1  ;;  %3285 = vmatpush1.bf16.msra.mxu0 %v6317_v42 }
 0x19a   : > { %v7668_v38 = vpop.f32.mrf.mxu0  ;;  %3286 = vmatprep.subr.bf16.mxu0 %v6325_v43 }
 0x19b   : > { %v7670_v2 = vpop.f32.mrf.mxu1  ;;  %3398 = vmatpush1.bf16.msra.mxu1 %v6344_v62 }
 0x19c   : > { %v7672_v57 = vpop.f32.mrf.mxu0  ;;  %2354 = vmatmul.mubr.bf16.gmra.mxu0 %v7510_v20  ;;  %3399 = vmatprep.subr.bf16.mxu1 %v6352_v6  ;;  %v6364_v6 = vld [vmem:[#allocation8 + $0x3e4] ss:$16 sps:$4 sm:$0xff]  }
 0x19d   : > { %v7674_v9 = vpop.f32.mrf.mxu1  ;;  %2467 = vmatmul.mubr.bf16.gmra.mxu1 %v7512_v49  ;;  %3287 = vmatpush1.bf16.msra.mxu0 %v6323_v58  ;;  %v6335_v49 = vld [vmem:[#allocation8 + $0x1e0] ss:$16 sps:$4 sm:$0xff]   ;;  %v7704_v58 = vshrl.u32 %v889_v40, 7 }
 0x19e   : > { %2363 = vmatprep.mubr.bf16.mxu0 %v7516_v29  ;;  %v7679_v33 = vpop.f32.mrf.mxu0  ;;  %3288 = vmatprep.subr.bf16.mxu0 %v6331_v39  ;;  %v6356_v39 = vld [vmem:[#allocation8 + $0x200] ss:$16 sps:$4 sm:$0xff]  }
 0x19f   : > { %v7681_v15 = vpop.f32.mrf.mxu1  ;;  %2476 = vmatprep.mubr.bf16.mxu1 %v7518_v30  ;;  %9205 = vst [vmem:[#allocation16_spill] sm:$0xff] %v7704_v58  ;;  %3400 = vmatpush1.bf16.msra.mxu1 %v6350_v5  ;;  %v9160_v46 = vsub.s32 1, %v7704_v58  ;;  %v6362_v40 = vld [vmem:[#allocation8 + $0x3e0] ss:$16 sps:$4 sm:$0xff]  }
 0x1a0   : > { %v7684_v12 = vpop.f32.mrf.mxu0  ;;  %3401 = vmatprep.subr.bf16.mxu1 %v6358_v10  ;;  %v6353_v10 = vld [vmem:[#allocation8 + $0x180] ss:$16 sps:$4 sm:$0xff]  }
 0x1a1   : > { %v7686_v20 = vpop.f32.mrf.mxu1  ;;  %3289 = vmatpush1.bf16.msra.mxu0 %v6329_v3 }
 0x1a2   : > { %v7688_v14 = vpop.f32.mrf.mxu0  ;;  %3290 = vmatprep.subr.bf16.mxu0 %v6337_v8  ;;  %v7715_v8 = vld [vmem:[#allocation7] sm:$0xf] }
 0x1a3   : > { %v7690_v29 = vpop.f32.mrf.mxu1  ;;  %3402 = vmatpush1.bf16.msra.mxu1 %v6356_v39  ;;  %v7726_v5 = vrot.slane %v7715_v8, %v9160_v46  ;;  %v6376_v46 = vld [vmem:[#allocation8 + $0x3a4] ss:$16 sps:$4 sm:$0xff]  }
 0x1a4   : > { %v7692_v17 = vpop.f32.mrf.mxu0  ;;  %2364 = vmatmul.mubr.bf16.gmra.mxu0 %v7529_v51  ;;  %3403 = vmatprep.subr.bf16.mxu1 %v6364_v6 }
 0x1a5   : > { %v7694_v30 = vpop.f32.mrf.mxu1  ;;  %2477 = vmatmul.mubr.bf16.gmra.mxu1 %v7531_v59  ;;  %3291 = vmatpush2.bf16.msra.mxu0 %v6335_v49 }
 0x1a6   : > { %2373 = vmatprep.mubr.bf16.mxu0 %v7536_v26  ;;  %v7699_v42 = vpop.f32.mrf.mxu0  ;;  %3292 = vmatprep.subr.bf16.mxu0 %v6343_v18  ;;  %v6347_v26 = vld [vmem:[#allocation8 + $0x1a0] ss:$16 sps:$4 sm:$0xff]  }
 0x1a7   : > { %v7701_v43 = vpop.f32.mrf.mxu1  ;;  %2486 = vmatprep.mubr.bf16.mxu1 %v7538_v53  ;;  %v6355_v53 = vld [vmem:[#allocation8 + $0x184] ss:$16 sps:$4 sm:$0xff]   ;;  %3404 = vmatpush2.bf16.msra.mxu1 %v6362_v40 }
 0x1a8   : > { %v7706_v51 = vpop.f32.mrf.mxu0 }
 0x1a9   : > { %v7708_v59 = vpop.f32.mrf.mxu1  ;;  %3293 = vmatpush2.bf16.msra.mxu0 %v6341_v31  ;;  %v6370_v31 = vld [vmem:[#allocation8 + $0x3c4] ss:$16 sps:$4 sm:$0xff]  }
 0x1aa   : > { %v7711_v62 = vpop.f32.mrf.mxu0  ;;  %3294 = vmatprep.subr.bf16.mxu0 %v6349_v34  ;;  %3405 = vmatprep.subr.bf16.mxu1 %v6370_v31  ;;  %v6365_v31 = vld [vmem:[#allocation8 + $0x140] ss:$16 sps:$4 sm:$0xff]  }
 0x1ab   : > { %v7713_v3 = vpop.f32.mrf.mxu1 }
 0x1ac   : > { %v7717_v49 = vpop.f32.mrf.mxu0  ;;  %2374 = vmatmul.mubr.bf16.gmra.mxu0 %v7549_v21  ;;  %v6361_v21 = vld [vmem:[#allocation8 + $0x164] ss:$16 sps:$4 sm:$0xff]  }
 0x1ad   : > { %9206 = vst [vmem:[#allocation17_spill] sm:$0xff] %v7717_v49  ;;  %v7719_v18 = vpop.f32.mrf.mxu1  ;;  %2487 = vmatmul.mubr.bf16.gmra.mxu1 %v7551_v24  ;;  %3295 = vmatpush2.bf16.msra.mxu0 %v6347_v26  ;;  %v1590_v24 = vadd.f32 %v7628_v61, %v7726_v5  ;;  %v6359_v49 = vld [vmem:[#allocation8 + $0x160] ss:$16 sps:$4 sm:$0xff]   ;;  %v6367_v61 = vld [vmem:[#allocation8 + $0x144] ss:$16 sps:$4 sm:$0xff]  }
 0x1ae   : > { %9207 = vst [vmem:[#allocation18_spill] sm:$0xff] %v7719_v18  ;;  %2383 = vmatprep.mubr.bf16.mxu0 %v7556_v44  ;;  %v7729_v34 = vpop.f32.mrf.mxu0  ;;  %3296 = vmatprep.subr.bf16.mxu0 %v6355_v53  ;;  %v1586_v44 = vadd.f32 %v7619_v63, %v7726_v5  ;;  %v6368_v53 = vld [vmem:[#allocation8 + $0x3c0] ss:$16 sps:$4 sm:$0xff]  }
 0x1af   : > { %v7731_v39 = vpop.f32.mrf.mxu1  ;;  %2496 = vmatprep.mubr.bf16.mxu1 %v7558_v55  ;;  %v1703_v6 = vadd.f32 %v7630_v1, %v1590_v24  ;;  %3406 = vmatpush2.bf16.msra.mxu1 %v6368_v53  ;;  %v6374_v1 = vld [vmem:[#allocation8 + $0x3a0] ss:$16 sps:$4 sm:$0xff]  }
 0x1b0   : > { %9208 = vst [vmem:[#allocation19_spill] sm:$0xff] %v7731_v39  ;;  %v7737_v18 = vpop.f32.mrf.mxu0  ;;  %3407 = vmatprep.subr.bf16.mxu1 %v6376_v46  ;;  %v6371_v53 = vld [vmem:[#allocation8 + $0x120] ss:$16 sps:$4 sm:$0xff]   ;;  %v6379_v46 = vld [vmem:[#allocation8 + $0x104] ss:$16 sps:$4 sm:$0xff]  }
 0x1b1   : > { %9209 = vst [vmem:[#allocation20_spill] sm:$0xff] %v7737_v18  ;;  %v7739_v26 = vpop.f32.mrf.mxu1  ;;  %3297 = vmatpush2.bf16.msra.mxu0 %v6353_v10  ;;  %v9211_v18 = vsub.s32 0, %v7704_v58  ;;  %v1699_v10 = vadd.f32 %v7621_v0, %v1586_v44 }
 0x1b2   : > { %9210 = vst [vmem:[#allocation21_spill] sm:$0xff] %v7739_v26  ;;  %v7743_v55 = vpop.f32.mrf.mxu0  ;;  %3298 = vmatprep.subr.bf16.mxu0 %v6361_v21 }
 0x1b3   : > { %v7745_v39 = vpop.f32.mrf.mxu1  ;;  %v7751_v40 = vrot.slane %v7715_v8, %v9211_v18  ;;  %v2002_v44 = vmax.f32 %v1699_v10, 0.0  ;;  %3408 = vmatpush2.bf16.msra.mxu1 %v6374_v1  ;;  %v6385_v10 = vld [vmem:[#allocation8 + $0x364] ss:$16 sps:$4 sm:$0xff]  }
 0x1b4   : > { %v7753_v26 = vpop.f32.mrf.mxu0  ;;  %2384 = vmatmul.mubr.bf16.gmra.mxu0 %v7569_v19  ;;  %v6382_v19 = vld [vmem:[#allocation8 + $0x384] ss:$16 sps:$4 sm:$0xff]  }
 0x1b5   : > { %9212 = vst [vmem:[#allocation22_spill] sm:$0xff] %v7753_v26  ;;  %v7755_v63 = vpop.f32.mrf.mxu1  ;;  %2497 = vmatmul.mubr.bf16.gmra.mxu1 %v7571_v50  ;;  %3299 = vmatpush2.bf16.msra.mxu0 %v6359_v49  ;;  %v1588_v21 = vadd.f32 %v7624_v7, %v7751_v40  ;;  %v2006_v26 = vmax.f32 %v1703_v6, 0.0  ;;  %v1600_v50 = vadd.f32 %v7648_v16, %v7726_v5 }
 0x1b6   : > { %9213 = vst [vmem:[#allocation23_spill] sm:$0xff] %v7755_v63  ;;  %v7762_v24 = vpop.f32.mrf.mxu0  ;;  %3300 = vmatprep.subr.bf16.mxu0 %v6367_v61  ;;  %2393 = vmatprep.mubr.bf16.mxu0 %v7578_v32  ;;  %v6373_v63 = vld [vmem:[#allocation8 + $0x124] ss:$16 sps:$4 sm:$0xff]   ;;  %v1584_v0 = vadd.f32 %v7612_v47, %v7751_v40  ;;  %v1596_v32 = vadd.f32 %v7639_v25, %v7726_v5  ;;  %v6380_v47 = vld [vmem:[#allocation8 + $0x380] ss:$16 sps:$4 sm:$0xff]  }
 0x1b7   : > { %v7764_v18 = vpop.f32.mrf.mxu1  ;;  %2506 = vmatprep.mubr.bf16.mxu1 %v7580_v36  ;;  %v1701_v61 = vadd.f32 %v7626_v37, %v1588_v21  ;;  %3409 = vmatprep.subr.bf16.mxu1 %v6382_v19  ;;  %v1713_v6 = vadd.f32 %v7650_v28, %v1600_v50  ;;  %v6377_v28 = vld [vmem:[#allocation8 + $0x100] ss:$16 sps:$4 sm:$0xff]  }
 0x1b8   : > { %v7772_v7 = vpop.f32.mrf.mxu0  ;;  %v1697_v25 = vadd.f32 %v7614_v56, %v1584_v0  ;;  %v1709_v37 = vadd.f32 %v7641_v54, %v1596_v32  ;;  %v1610_v56 = vadd.f32 %v7668_v38, %v7726_v5  ;;  %3410 = vmatpush2.bf16.msra.mxu1 %v6380_v47  ;;  %v1594_v54 = vadd.f32 %v7632_v60, %v7751_v40  ;;  %v6391_v0 = vld [vmem:[#allocation8 + $0x344] ss:$16 sps:$4 sm:$0xff]   ;;  %v6386_v60 = vld [vmem:[#allocation8 + $0xe8] ss:$16 sps:$4 sm:$0xff]  }
 0x1b9   : > { %v7774_v49 = vpop.f32.mrf.mxu1  ;;  %3301 = vmatpush2.bf16.msra.mxu0 %v6365_v31  ;;  %3411 = vmatprep.subr.bf16.mxu1 %v6385_v10  ;;  %v1606_v38 = vadd.f32 %v7659_v48, %v7726_v5  ;;  %v6389_v48 = vld [vmem:[#allocation8 + $0x340] ss:$16 sps:$4 sm:$0xff]  }
 0x1ba   : > { %9214 = vst [vmem:[#allocation24_spill] sm:$0xff] %v7774_v49  ;;  %v7779_v16 = vpop.f32.mrf.mxu0  ;;  %3302 = vmatprep.subr.bf16.mxu0 %v6373_v63  ;;  %v7784_v49 = vpack.c.bf16 %v2006_v26, %v2002_v44  ;;  %v1598_v63 = vadd.f32 %v7644_v41, %v7751_v40  ;;  %v2005_v26 = vmax.f32 %v1701_v61, 0.0  ;;  %v2014_v41 = vmax.f32 %v1713_v6, 0.0 }
 0x1bb   : > { %v7781_v36 = vpop.f32.mrf.mxu1  ;;  %v2001_v44 = vmax.f32 %v1697_v25, 0.0  ;;  %v1723_v10 = vadd.f32 %v7670_v2, %v1610_v56  ;;  %v1719_v2 = vadd.f32 %v7661_v45, %v1606_v38  ;;  %v1604_v45 = vadd.f32 %v7652_v11, %v7751_v40  ;;  %v6400_v38 = vld [vmem:[#allocation8 + $0xac] ss:$16 sps:$4 sm:$0xff]  }
 0x1bc   : > { %9215 = vst [vmem:[#allocation25_spill] sm:$0xff] %v7784_v49  ;;  %v7787_v31 = vpop.f32.mrf.mxu0  ;;  %2394 = vmatmul.mubr.bf16.gmra.mxu0 %v7594_v22  ;;  %v6383_v22 = vld [vmem:[#allocation8 + $0x360] ss:$16 sps:$4 sm:$0xff]   ;;  %v1711_v47 = vadd.f32 %v7646_v4, %v1598_v63  ;;  %v9219_v4 = vsub.s32 3, %v7704_v58  ;;  %v6397_v63 = vld [vmem:[#allocation8 + $0x324] ss:$16 sps:$4 sm:$0xff]  }
 0x1bd   : > { %v7789_v1 = vpop.f32.mrf.mxu1  ;;  %2507 = vmatmul.mubr.bf16.gmra.mxu1 %v7596_v27  ;;  %3303 = vmatpush2.bf16.msra.mxu0 %v6371_v53  ;;  %v6388_v27 = vld [vmem:[#allocation8 + $0xec] ss:$16 sps:$4 sm:$0xff]   ;;  %v7814_v6 = vpack.c.bf16 %v2005_v26, %v2001_v44 }
 0x1be   : > { %9216 = vst [vmem:[#allocation26_spill] sm:$0xff] %v7789_v1  ;;  %3306 = vmatprep.mubr.bf16.mxu0 %v7784_v49  ;;  %v7799_v21 = vpop.f32.mrf.mxu0  ;;  %3304 = vmatprep.subr.bf16.mxu0 %v6379_v46  ;;  %v2010_v46 = vmax.f32 %v1709_v37, 0.0  ;;  %v6394_v49 = vld [vmem:[#allocation8 + $0xcc] ss:$16 sps:$4 sm:$0xff]   ;;  %v1707_v1 = vadd.f32 %v7634_v13, %v1594_v54  ;;  %v7827_v37 = vrot.slane %v7715_v8, %v9219_v4  ;;  %v2013_v13 = vmax.f32 %v1711_v47, 0.0 }
 0x1bf   : > { %v7801_v19 = vpop.f32.mrf.mxu1  ;;  %9217 = vst [vmem:[#allocation27_spill] sm:$0xff] %v7814_v6  ;;  %3412 = vmatpush2.bf16.msra.mxu1 %v6383_v22  ;;  %v6392_v54 = vld [vmem:[#allocation8 + $0xc8] ss:$16 sps:$4 sm:$0xff]   ;;  %v1620_v47 = vadd.f32 %v7688_v14, %v7726_v5  ;;  %v6403_v4 = vld [vmem:[#allocation8 + $0x304] ss:$16 sps:$4 sm:$0xff]  }
 0x1c0   : > { %v7808_v32 = vpop.f32.mrf.mxu0  ;;  %v7822_v61 = vpack.c.bf16 %v2014_v41, %v2010_v46  ;;  %3413 = vmatprep.subr.bf16.mxu1 %v6391_v0  ;;  %v2022_v41 = vmax.f32 %v1723_v10, 0.0  ;;  %v2009_v46 = vmax.f32 %v1707_v1, 0.0  ;;  %v6398_v14 = vld [vmem:[#allocation8 + $0xa8] ss:$16 sps:$4 sm:$0xff]  }
 0x1c1   : > { %v7810_v53 = vpop.f32.mrf.mxu1  ;;  %3305 = vmatpush2.bf16.msra.mxu0 %v6377_v28  ;;  %v9220_v28 = vsub.s32 2, %v7704_v58 }
 0x1c2   : > { %v7817_v50 = vpop.f32.mrf.mxu0  ;;  %3500 = vmatprep.subr.bf16.mxu0 %v6388_v27  ;;  %9218 = vst [vmem:[#allocation28_spill] sm:$0xff] %v7822_v61  ;;  %v1608_v27 = vadd.f32 %v7664_v35, %v7751_v40  ;;  %v7845_v10 = vpack.c.bf16 %v2013_v13, %v2009_v46  ;;  %v6401_v13 = vld [vmem:[#allocation8 + $0x300] ss:$16 sps:$4 sm:$0xff]  }
 0x1c3   : > { %v7819_v25 = vpop.f32.mrf.mxu1  ;;  %v7833_v26 = vrot.slane %v7715_v8, %v9220_v28  ;;  %3414 = vmatpush2.bf16.msra.mxu1 %v6389_v48  ;;  %v6395_v8 = vld [vmem:[#allocation8 + $0x320] ss:$16 sps:$4 sm:$0xff]   ;;  %v1616_v48 = vadd.f32 %v7679_v33, %v7726_v5 }
 0x1c4   : > { %v1809_v56 = vpop.f32.mrf.mxu0  ;;  %3307 = vmatmul.mubr.bf16.vlgmr.msra.gmra.mxu0 %v7814_v6  ;;  %3415 = vmatprep.subr.bf16.mxu1 %v6397_v63  ;;  %v1618_v63 = vadd.f32 %v7684_v12, %v7751_v40 }
 0x1c5   : > { %v1922_v22 = vpop.f32.mrf.mxu1  ;;  %3316 = vmatprep.mubr.bf16.mxu0 %v7822_v61  ;;  %3501 = vmatpush1.bf16.msra.mxu0 %v6386_v60  ;;  %v2018_v60 = vmax.f32 %v1719_v2, 0.0  ;;  %v1810_v28 = vadd.f32 %v1809_v56, %v7833_v26 }
 0x1c6   : > { %v1811_v0 = vpop.f32.mrf.mxu0  ;;  %3502 = vmatprep.subr.bf16.mxu0 %v6394_v49  ;;  %v1721_v49 = vadd.f32 %v7666_v52, %v1608_v27  ;;  %v6406_v52 = vld [vmem:[#allocation8 + $0x8c] ss:$16 sps:$4 sm:$0xff]   ;;  %v1733_v27 = vadd.f32 %v7690_v29, %v1620_v47  ;;  %v6404_v29 = vld [vmem:[#allocation8 + $0x88] ss:$16 sps:$4 sm:$0xff]   ;;  %v1731_v47 = vadd.f32 %v7686_v20, %v1618_v63  ;;  %v1626_v20 = vadd.f32 %v7699_v42, %v7726_v5 }
 0x1c7   : > { %v1924_v44 = vpop.f32.mrf.mxu1  ;;  %v1812_v35 = vadd.f32 %v1811_v0, %v7827_v37  ;;  %v1717_v0 = vadd.f32 %v7654_v23, %v1604_v45  ;;  %v7854_v61 = vpack.c.bf16 %v2022_v41, %v2018_v60  ;;  %3416 = vmatpush2.bf16.msra.mxu1 %v6395_v8  ;;  %v1614_v23 = vadd.f32 %v7672_v57, %v7751_v40  ;;  %v6409_v60 = vld [vmem:[#allocation8 + $0x6c] ss:$16 sps:$4 sm:$0xff]  }
 0x1c8   : > { %v1813_v58 = vpop.f32.mrf.mxu0  ;;  %3417 = vmatprep.subr.bf16.mxu1 %v6403_v4  ;;  %v1923_v12 = vadd.f32 %v1922_v22, %v1810_v28  ;;  %v2021_v41 = vmax.f32 %v1721_v49, 0.0  ;;  %v1729_v8 = vadd.f32 %v7681_v15, %v1616_v48  ;;  %v2030_v28 = vmax.f32 %v1733_v27, 0.0 }
 0x1c9   : > { %v1926_v11 = vpop.f32.mrf.mxu1  ;;  %v1814_v1 = vadd.f32 %v1813_v58, %v7833_v26  ;;  %3503 = vmatpush1.bf16.msra.mxu0 %v6392_v54  ;;  %v1925_v33 = vadd.f32 %v1924_v44, %v1812_v35  ;;  %v6412_v54 = vld [vmem:[#allocation8 + $0x2ec] ss:$16 sps:$4 sm:$0xff]   ;;  %v2017_v44 = vmax.f32 %v1717_v0, 0.0  ;;  %v1630_v35 = vadd.f32 %v7711_v62, %v7726_v5 }
 0x1ca   : > { %v1815_v2 = vpop.f32.mrf.mxu0  ;;  %3504 = vmatprep.subr.bf16.mxu0 %v6400_v38  ;;  %v1727_v48 = vadd.f32 %v7674_v9, %v1614_v23  ;;  %v2029_v27 = vmax.f32 %v1731_v47, 0.0  ;;  %v1624_v9 = vadd.f32 %v7692_v17, %v7751_v40  ;;  %v6415_v23 = vld [vmem:[#allocation8 + $0x4c] ss:$16 sps:$4 sm:$0xff]   ;;  %v1739_v17 = vadd.f32 %v7701_v43, %v1626_v20 }
 0x1cb   : > { %v1928_v56 = vpop.f32.mrf.mxu1  ;;  %v1927_v46 = vadd.f32 %v1926_v11, %v1814_v1  ;;  %v1816_v58 = vadd.f32 %v1815_v2, %v7827_v37  ;;  %3418 = vmatpush2.bf16.msra.mxu1 %v6401_v13  ;;  %v2004_v11 = vmax.f32 %v1925_v33, 0.0  ;;  %v2003_v1 = vmax.f32 %v1923_v12, 0.0 }
 0x1cc   : > { %v1819_v45 = vpop.f32.mrf.mxu0  ;;  %3317 = vmatmul.mubr.bf16.gmra.mxu0 %v7845_v10  ;;  %3613 = vmatprep.subr.bf16.mxu1 %v6412_v54  ;;  %v7871_v63 = vpack.c.bf16 %v2021_v41, %v2017_v44  ;;  %v2026_v2 = vmax.f32 %v1729_v8, 0.0  ;;  %v1743_v42 = vadd.f32 %v7713_v3, %v1630_v35  ;;  %v6410_v54 = vld [vmem:[#allocation8 + $0x2e8] ss:$16 sps:$4 sm:$0xff]   ;;  %v1628_v35 = vadd.f32 %v7706_v51, %v7751_v40 }
 0x1cd   : > { %v1932_v6 = vpop.f32.mrf.mxu1  ;;  %v1929_v38 = vadd.f32 %v1928_v56, %v1816_v58  ;;  %3326 = vmatprep.mubr.bf16.mxu0 %v7854_v61  ;;  %3505 = vmatpush1.bf16.msra.mxu0 %v6398_v14  ;;  %v2007_v57 = vmax.f32 %v1927_v46, 0.0  ;;  %v1820_v62 = vadd.f32 %v1819_v45, %v7833_v26  ;;  %v1640_v43 = vadd.f32 %v7743_v55, %v7726_v5 }
 0x1ce   : > { %v1821_v22 = vpop.f32.mrf.mxu0  ;;  %3506 = vmatprep.subr.bf16.mxu0 %v6406_v52  ;;  %v6407_v52 = vld [vmem:[#allocation8 + $0x68] ss:$16 sps:$4 sm:$0xff]   ;;  %v7883_v8 = vpack.c.bf16 %v2030_v28, %v2026_v2  ;;  %v7896_v51 = vadd.f32 %v7694_v30, %v1624_v9  ;;  %v1636_v55 = vadd.f32 %v7729_v34, %v7726_v5  ;;  %v9221_v30 = vld [vmem:[#allocation20_spill] sm:$0xff] }
 0x1cf   : > { %v1934_v4 = vpop.f32.mrf.mxu1  ;;  %v2008_v15 = vmax.f32 %v1929_v38, 0.0  ;;  %v1822_v49 = vadd.f32 %v1821_v22, %v7827_v37  ;;  %v7879_v33 = vpack.c.bf16 %v2007_v57, %v2003_v1  ;;  %v6418_v38 = vld [vmem:[#allocation8 + $0x2cc] ss:$16 sps:$4 sm:$0xff]   ;;  %v1933_v3 = vadd.f32 %v1932_v6, %v1820_v62  ;;  %v6413_v22 = vld [vmem:[#allocation8 + $0x48] ss:$16 sps:$4 sm:$0xff]  }
 0x1d0   : > { %v1823_v14 = vpop.f32.mrf.mxu0  ;;  %v6424_v62 = vld [vmem:[#allocation8 + $0x2ac] ss:$16 sps:$4 sm:$0xff]   ;;  %v1638_v9 = vadd.f32 %v9221_v30, %v7751_v40  ;;  %v1646_v30 = vadd.f32 %v7762_v24, %v7726_v5 }
 0x1d1   : > { %v1936_v0 = vpop.f32.mrf.mxu1  ;;  %v1824_v56 = vadd.f32 %v1823_v14, %v7833_v26  ;;  %3507 = vmatpush1.bf16.msra.mxu0 %v6404_v29  ;;  %v7874_v13 = vpack.c.bf16 %v2008_v15, %v2004_v11  ;;  %v1935_v12 = vadd.f32 %v1934_v4, %v1822_v49  ;;  %v2025_v29 = vmax.f32 %v1727_v48, 0.0  ;;  %v6416_v15 = vld [vmem:[#allocation8 + $0x2c8] ss:$16 sps:$4 sm:$0xff]   ;;  %v6421_v49 = vld [vmem:[#allocation8 + $0x2c] ss:$16 sps:$4 sm:$0xff]  }
 0x1d2   : > { %v1825_v46 = vpop.f32.mrf.mxu0  ;;  %3508 = vmatprep.subr.bf16.mxu0 %v6409_v60  ;;  %v2038_v60 = vmax.f32 %v1743_v42, 0.0  ;;  %v2034_v14 = vmax.f32 %v1739_v17, 0.0 }
 0x1d3   : > { %v1938_v58 = vpop.f32.mrf.mxu1  ;;  %v1937_v45 = vadd.f32 %v1936_v0, %v1824_v56  ;;  %v1826_v41 = vadd.f32 %v1825_v46, %v7827_v37  ;;  %3419 = vmatprep.mubr.bf16.mxu1 %v7874_v13  ;;  %v7891_v4 = vpack.c.bf16 %v2029_v27, %v2025_v29  ;;  %v2012_v48 = vmax.f32 %v1935_v12, 0.0 }
 0x1d4   : > { %v1829_v44 = vpop.f32.mrf.mxu0  ;;  %3327 = vmatmul.mubr.bf16.gmra.mxu0 %v7871_v63  ;;  %3420 = vmatmul.mubr.bf16.vlgmr.msra.gmra.mxu1 %v7879_v33  ;;  %v2011_v0 = vmax.f32 %v1933_v3, 0.0  ;;  %v1741_v27 = vadd.f32 %v7708_v59, %v1628_v35  ;;  %v7913_v59 = vpack.c.bf16 %v2038_v60, %v2034_v14  ;;  %v6430_v3 = vld [vmem:[#allocation8 + $0x28c] ss:$16 sps:$4 sm:$0xff]  }
 0x1d5   : > { %v1942_v47 = vpop.f32.mrf.mxu1  ;;  %v1939_v57 = vadd.f32 %v1938_v58, %v1826_v41  ;;  %3336 = vmatprep.mubr.bf16.mxu0 %v7883_v8  ;;  %3509 = vmatpush1.bf16.msra.mxu0 %v6407_v52  ;;  %v2015_v6 = vmax.f32 %v1937_v45, 0.0  ;;  %v1830_v2 = vadd.f32 %v1829_v44, %v7833_v26  ;;  %v6419_v58 = vld [vmem:[#allocation8 + $0x28] ss:$16 sps:$4 sm:$0xff]   ;;  %v6427_v41 = vld [vmem:[#allocation8 + $0xc] ss:$16 sps:$4 sm:$0xff]  }
 0x1d6   : > { %3614 = vmatpush1.bf16.msra.mxu1 %v6410_v54  ;;  %v1831_v28 = vpop.f32.mrf.mxu0  ;;  %3510 = vmatprep.subr.bf16.mxu0 %v6415_v23  ;;  %v7909_v54 = vadd.f32 %v7745_v39, %v1640_v43  ;;  %v6422_v45 = vld [vmem:[#allocation8 + $0x2a8] ss:$16 sps:$4 sm:$0xff]   ;;  %v2037_v60 = vmax.f32 %v1741_v27, 0.0  ;;  %v6433_v14 = vld [vmem:[#allocation8 + $0x1ec] ss:$16 sps:$4 sm:$0xff]  }
 0x1d7   : > { %v1944_v11 = vpop.f32.mrf.mxu1  ;;  %v2016_v20 = vmax.f32 %v1939_v57, 0.0  ;;  %v1832_v1 = vadd.f32 %v1831_v28, %v7827_v37  ;;  %3615 = vmatprep.subr.bf16.mxu1 %v6418_v38  ;;  %v7911_v34 = vpack.c.bf16 %v2015_v6, %v2011_v0  ;;  %v9222_v39 = vld [vmem:[#allocation19_spill] sm:$0xff]  ;;  %v1943_v35 = vadd.f32 %v1942_v47, %v1830_v2  ;;  %v9223_v43 = vld [vmem:[#allocation17_spill] sm:$0xff] }
 0x1d8   : > { %v1833_v56 = vpop.f32.mrf.mxu0  ;;  %v1749_v44 = vadd.f32 %v9222_v39, %v1636_v55  ;;  %v1634_v6 = vadd.f32 %v9223_v43, %v7751_v40  ;;  %v2046_v47 = vmax.f32 %v7909_v54, 0.0  ;;  %v9224_v55 = vld [vmem:[#allocation21_spill] sm:$0xff] }
 0x1d9   : > { %v1946_v52 = vpop.f32.mrf.mxu1  ;;  %v1834_v42 = vadd.f32 %v1833_v56, %v7833_v26  ;;  %3511 = vmatpush1.bf16.msra.mxu0 %v6413_v22  ;;  %v7906_v46 = vpack.c.bf16 %v2016_v20, %v2012_v48  ;;  %v1945_v38 = vadd.f32 %v1944_v11, %v1832_v1  ;;  %v6425_v11 = vld [vmem:[#allocation8 + $0x8] ss:$16 sps:$4 sm:$0xff]   ;;  %v1650_v48 = vadd.f32 %v7779_v16, %v7726_v5  ;;  %v6436_v27 = vld [vmem:[#allocation8 + $0x26c] ss:$16 sps:$4 sm:$0xff]  }
 0x1da   : > { %3616 = vmatpush1.bf16.msra.mxu1 %v6416_v15  ;;  %v1835_v23 = vpop.f32.mrf.mxu0  ;;  %3512 = vmatprep.subr.bf16.mxu0 %v6421_v49  ;;  %v6428_v15 = vld [vmem:[#allocation8 + $0x288] ss:$16 sps:$4 sm:$0xff]   ;;  %v2033_v49 = vmax.f32 %v7896_v51, 0.0  ;;  %v1751_v0 = vadd.f32 %v9224_v55, %v1638_v9  ;;  %v2042_v51 = vmax.f32 %v1749_v44, 0.0 }
 0x1db   : > { %v1948_v12 = vpop.f32.mrf.mxu1  ;;  %v1947_v29 = vadd.f32 %v1946_v52, %v1834_v42  ;;  %v1836_v17 = vadd.f32 %v1835_v23, %v7827_v37  ;;  %3429 = vmatprep.mubr.bf16.mxu1 %v7906_v46  ;;  %3617 = vmatprep.subr.bf16.mxu1 %v6424_v62  ;;  %v2020_v2 = vmax.f32 %v1945_v38, 0.0  ;;  %v2019_v42 = vmax.f32 %v1943_v35, 0.0  ;;  %v6431_v38 = vld [vmem:[#allocation8 + $0x1e8] ss:$16 sps:$4 sm:$0xff]   ;;  %v6439_v35 = vld [vmem:[#allocation8 + $0x1cc] ss:$16 sps:$4 sm:$0xff]  }
 0x1dc   : > { %v1839_v57 = vpop.f32.mrf.mxu0  ;;  %3337 = vmatmul.mubr.bf16.gmra.mxu0 %v7891_v4  ;;  %3430 = vmatmul.mubr.bf16.gmra.mxu1 %v7911_v34  ;;  %v7932_v23 = vpack.c.bf16 %v2037_v60, %v2033_v49  ;;  %v6434_v39 = vld [vmem:[#allocation8 + $0x268] ss:$16 sps:$4 sm:$0xff]   ;;  %v7943_v44 = vpack.c.bf16 %v2046_v47, %v2042_v51 }
 0x1dd   : > { %v1952_v22 = vpop.f32.mrf.mxu1  ;;  %v1949_v28 = vadd.f32 %v1948_v12, %v1836_v17  ;;  %3346 = vmatprep.mubr.bf16.mxu0 %v7913_v59  ;;  %3513 = vmatpush1.bf16.msra.mxu0 %v6419_v58  ;;  %v2023_v20 = vmax.f32 %v1947_v29, 0.0  ;;  %v1840_v16 = vadd.f32 %v1839_v57, %v7833_v26  ;;  %v9225_v12 = vld [vmem:[#allocation18_spill] sm:$0xff]  ;;  %v7939_v29 = vadd.f32 %v7781_v36, %v1650_v48  ;;  %v6442_v36 = vld [vmem:[#allocation8 + $0x24c] ss:$16 sps:$4 sm:$0xff]  }
 0x1de   : > { %3618 = vmatpush1.bf16.msra.mxu1 %v6422_v45  ;;  %v1841_v1 = vpop.f32.mrf.mxu0  ;;  %3514 = vmatprep.subr.bf16.mxu0 %v6427_v41  ;;  %v1747_v45 = vadd.f32 %v9225_v12, %v1634_v6  ;;  %v2045_v57 = vmax.f32 %v1751_v0, 0.0  ;;  %v9226_v48 = vld [vmem:[#allocation22_spill] sm:$0xff] }
 0x1df   : > { %v1954_v62 = vpop.f32.mrf.mxu1  ;;  %v2024_v56 = vmax.f32 %v1949_v28, 0.0  ;;  %v1842_v52 = vadd.f32 %v1841_v1, %v7827_v37  ;;  %3619 = vmatprep.subr.bf16.mxu1 %v6430_v3  ;;  %v7941_v17 = vpack.c.bf16 %v2023_v20, %v2019_v42  ;;  %v1759_v28 = vadd.f32 %v7764_v18, %v1646_v30  ;;  %v6448_v42 = vld [vmem:[#allocation8 + $0x22c] ss:$16 sps:$4 sm:$0xff]  }
 0x1e0   : > { %v1843_v58 = vpop.f32.mrf.mxu0  ;;  %v2041_v47 = vmax.f32 %v1747_v45, 0.0  ;;  %v1644_v20 = vadd.f32 %v9226_v48, %v7751_v40  ;;  %v1648_v1 = vadd.f32 %v7772_v7, %v7751_v40  ;;  %v2054_v18 = vmax.f32 %v7939_v29, 0.0  ;;  %v9228_v29 = vld [vmem:[#allocation24_spill] sm:$0xff]  ;;  %v6454_v48 = vld [vmem:[#allocation8 + $0x20c] ss:$16 sps:$4 sm:$0xff]  }
 0x1e1   : > { %v1956_v54 = vpop.f32.mrf.mxu1  ;;  %v1844_v9 = vadd.f32 %v1843_v58, %v7833_v26  ;;  %3515 = vmatpush1.bf16.msra.mxu0 %v6425_v11  ;;  %v7936_v41 = vpack.c.bf16 %v2024_v56, %v2020_v2  ;;  %v1955_v60 = vadd.f32 %v1954_v62, %v1842_v52  ;;  %v1953_v11 = vadd.f32 %v1952_v22, %v1840_v16  ;;  %v6440_v56 = vld [vmem:[#allocation8 + $0x248] ss:$16 sps:$4 sm:$0xff]   ;;  %v6445_v52 = vld [vmem:[#allocation8 + $0x1ac] ss:$16 sps:$4 sm:$0xff]  }
 0x1e2   : > { %3620 = vmatpush1.bf16.msra.mxu1 %v6428_v15  ;;  %v1845_v24 = vpop.f32.mrf.mxu0  ;;  %3516 = vmatprep.subr.bf16.mxu0 %v6433_v14  ;;  %v6437_v14 = vld [vmem:[#allocation8 + $0x1c8] ss:$16 sps:$4 sm:$0xff]   ;;  %v1660_v22 = vadd.f32 %v7817_v50, %v7726_v5  ;;  %v2050_v16 = vmax.f32 %v1759_v28, 0.0  ;;  %v1656_v58 = vadd.f32 %v7799_v21, %v7726_v5  ;;  %v6451_v28 = vld [vmem:[#allocation8 + $0x18c] ss:$16 sps:$4 sm:$0xff]  }
 0x1e3   : > { %v1958_v3 = vpop.f32.mrf.mxu1  ;;  %v1957_v43 = vadd.f32 %v1956_v54, %v1844_v9  ;;  %v1846_v6 = vadd.f32 %v1845_v24, %v7827_v37  ;;  %3439 = vmatprep.mubr.bf16.mxu1 %v7936_v41  ;;  %3621 = vmatprep.subr.bf16.mxu1 %v6436_v27  ;;  %v7958_v27 = vpack.c.bf16 %v2045_v57, %v2041_v47  ;;  %v2028_v7 = vmax.f32 %v1955_v60, 0.0  ;;  %v9227_v9 = vld [vmem:[#allocation23_spill] sm:$0xff] }
 0x1e4   : > { %v1849_v15 = vpop.f32.mrf.mxu0  ;;  %3347 = vmatmul.mubr.bf16.gmra.mxu0 %v7932_v23  ;;  %3440 = vmatmul.mubr.bf16.gmra.mxu1 %v7941_v17  ;;  %v2027_v50 = vmax.f32 %v1953_v11, 0.0  ;;  %v1761_v24 = vadd.f32 %v9228_v29, %v1648_v1  ;;  %v1773_v57 = vadd.f32 %v7819_v25, %v1660_v22  ;;  %v1769_v25 = vadd.f32 %v7801_v19, %v1656_v58  ;;  %v6449_v22 = vld [vmem:[#allocation8 + $0x188] ss:$16 sps:$4 sm:$0xff]  }
 0x1e5   : > { %v1962_v49 = vpop.f32.mrf.mxu1  ;;  %v1959_v62 = vadd.f32 %v1958_v3, %v1846_v6  ;;  %3356 = vmatprep.mubr.bf16.mxu0 %v7943_v44  ;;  %3517 = vmatpush2.bf16.msra.mxu0 %v6431_v38  ;;  %v2031_v55 = vmax.f32 %v1957_v43, 0.0  ;;  %v1850_v54 = vadd.f32 %v1849_v15, %v7833_v26  ;;  %v1757_v38 = vadd.f32 %v9227_v9, %v1644_v20  ;;  %v6446_v6 = vld [vmem:[#allocation8 + $0x228] ss:$16 sps:$4 sm:$0xff]  }
 0x1e6   : > { %3622 = vmatpush1.bf16.msra.mxu1 %v6434_v39  ;;  %v1851_v0 = vpop.f32.mrf.mxu0  ;;  %3518 = vmatprep.subr.bf16.mxu0 %v6439_v35  ;;  %v6443_v35 = vld [vmem:[#allocation8 + $0x1a8] ss:$16 sps:$4 sm:$0xff]   ;;  %v1654_v58 = vadd.f32 %v7787_v31, %v7751_v40 }
 0x1e7   : > { %v1964_v2 = vpop.f32.mrf.mxu1  ;;  %v2032_v51 = vmax.f32 %v1959_v62, 0.0  ;;  %v1852_v30 = vadd.f32 %v1851_v0, %v7827_v37  ;;  %3623 = vmatprep.subr.bf16.mxu1 %v6442_v36  ;;  %v7970_v60 = vpack.c.bf16 %v2031_v55, %v2027_v50  ;;  %v7972_v36 = vpack.c.bf16 %v2054_v18, %v2050_v16  ;;  %v6460_v16 = vld [vmem:[#allocation8 + $0x3ec] ss:$16 sps:$4 sm:$0xff]  }
 0x1e8   : > { %v1853_v12 = vpop.f32.mrf.mxu0  ;;  %v1963_v20 = vadd.f32 %v1962_v49, %v1850_v54  ;;  %v1658_v55 = vadd.f32 %v7808_v32, %v7751_v40  ;;  %v2062_v0 = vmax.f32 %v1773_v57, 0.0  ;;  %v2058_v50 = vmax.f32 %v1769_v25, 0.0 }
 0x1e9   : > { %v1966_v45 = vpop.f32.mrf.mxu1  ;;  %v1854_v3 = vadd.f32 %v1853_v12, %v7833_v26  ;;  %3519 = vmatpush2.bf16.msra.mxu0 %v6437_v14  ;;  %v7967_v39 = vpack.c.bf16 %v2032_v51, %v2028_v7  ;;  %v1965_v11 = vadd.f32 %v1964_v2, %v1852_v30  ;;  %v2053_v14 = vmax.f32 %v1761_v24, 0.0  ;;  %v6455_v24 = vld [vmem:[#allocation8 + $0x168] ss:$16 sps:$4 sm:$0xff]  }
 0x1ea   : > { %3624 = vmatpush1.bf16.msra.mxu1 %v6440_v56  ;;  %v1855_v21 = vpop.f32.mrf.mxu0  ;;  %3520 = vmatprep.subr.bf16.mxu0 %v6445_v52  ;;  %v6452_v56 = vld [vmem:[#allocation8 + $0x208] ss:$16 sps:$4 sm:$0xff]   ;;  %v6457_v52 = vld [vmem:[#allocation8 + $0x16c] ss:$16 sps:$4 sm:$0xff]   ;;  %v2049_v7 = vmax.f32 %v1757_v38, 0.0  ;;  %v2035_v32 = vmax.f32 %v1963_v20, 0.0 }
 0x1eb   : > { %v1968_v43 = vpop.f32.mrf.mxu1  ;;  %v1967_v15 = vadd.f32 %v1966_v45, %v1854_v3  ;;  %v1856_v47 = vadd.f32 %v1855_v21, %v7827_v37  ;;  %3449 = vmatprep.mubr.bf16.mxu1 %v7967_v39  ;;  %3625 = vmatprep.subr.bf16.mxu1 %v6448_v42  ;;  %v2036_v51 = vmax.f32 %v1965_v11, 0.0  ;;  %v1771_v3 = vadd.f32 %v7810_v53, %v1658_v55  ;;  %v6458_v21 = vld [vmem:[#allocation8 + $0x3e8] ss:$16 sps:$4 sm:$0xff]  }
 0x1ec   : > { %v1859_v1 = vpop.f32.mrf.mxu0  ;;  %3357 = vmatmul.mubr.bf16.gmra.mxu0 %v7958_v27  ;;  %3450 = vmatmul.mubr.bf16.gmra.mxu1 %v7970_v60  ;;  %v7986_v9 = vpack.c.bf16 %v2053_v14, %v2049_v7  ;;  %v6472_v7 = vld [vmem:[#allocation8 + $0x3ac] ss:$16 sps:$4 sm:$0xff]  }
 0x1ed   : > { %v1972_v62 = vpop.f32.mrf.mxu1  ;;  %v1969_v18 = vadd.f32 %v1968_v43, %v1856_v47  ;;  %3366 = vmatprep.mubr.bf16.mxu0 %v7972_v36  ;;  %3521 = vmatpush2.bf16.msra.mxu0 %v6443_v35  ;;  %v2039_v2 = vmax.f32 %v1967_v15, 0.0  ;;  %v1860_v54 = vadd.f32 %v1859_v1, %v7833_v26  ;;  %v7994_v43 = vpack.c.bf16 %v2062_v0, %v2058_v50  ;;  %v6466_v47 = vld [vmem:[#allocation8 + $0x3cc] ss:$16 sps:$4 sm:$0xff]  }
 0x1ee   : > { %3626 = vmatpush1.bf16.msra.mxu1 %v6446_v6  ;;  %v1861_v19 = vpop.f32.mrf.mxu0  ;;  %3522 = vmatprep.subr.bf16.mxu0 %v6451_v28  ;;  %v6463_v6 = vld [vmem:[#allocation8 + $0x14c] ss:$16 sps:$4 sm:$0xff]  }
 0x1ef   : > { %v1974_v49 = vpop.f32.mrf.mxu1  ;;  %v2040_v30 = vmax.f32 %v1969_v18, 0.0  ;;  %v1862_v42 = vadd.f32 %v1861_v19, %v7827_v37  ;;  %3627 = vmatprep.subr.bf16.mxu1 %v6454_v48  ;;  %v7992_v35 = vpack.c.bf16 %v2039_v2, %v2035_v32  ;;  %v9229_v48 = vld [vmem:[#allocation26_spill] sm:$0xff]  ;;  %v1973_v25 = vadd.f32 %v1972_v62, %v1860_v54  ;;  %v6461_v18 = vld [vmem:[#allocation8 + $0x148] ss:$16 sps:$4 sm:$0xff]  }
 0x1f0   : > { %v1863_v12 = vpop.f32.mrf.mxu0  ;;  %v1767_v53 = vadd.f32 %v9229_v48, %v1654_v58  ;;  %v6464_v19 = vld [vmem:[#allocation8 + $0x3c8] ss:$16 sps:$4 sm:$0xff]  }
 0x1f1   : > { %v1976_v45 = vpop.f32.mrf.mxu1  ;;  %v1864_v29 = vadd.f32 %v1863_v12, %v7833_v26  ;;  %3523 = vmatpush2.bf16.msra.mxu0 %v6449_v22  ;;  %v7989_v38 = vpack.c.bf16 %v2040_v30, %v2036_v51  ;;  %v1975_v28 = vadd.f32 %v1974_v49, %v1862_v42  ;;  %v2061_v22 = vmax.f32 %v1771_v3, 0.0  ;;  %v6469_v49 = vld [vmem:[#allocation8 + $0x12c] ss:$16 sps:$4 sm:$0xff]   ;;  %v6467_v54 = vld [vmem:[#allocation8 + $0x128] ss:$16 sps:$4 sm:$0xff]  }
 0x1f2   : > { %3628 = vmatpush1.bf16.msra.mxu1 %v6452_v56  ;;  %v1865_v31 = vpop.f32.mrf.mxu0  ;;  %3524 = vmatprep.subr.bf16.mxu0 %v6457_v52  ;;  %v2057_v51 = vmax.f32 %v1767_v53, 0.0  ;;  %v2043_v30 = vmax.f32 %v1973_v25, 0.0  ;;  %v6470_v3 = vld [vmem:[#allocation8 + $0x3a8] ss:$16 sps:$4 sm:$0xff]  }
 0x1f3   : > { %v1978_v57 = vpop.f32.mrf.mxu1  ;;  %v1977_v11 = vadd.f32 %v1976_v45, %v1864_v29  ;;  %v1866_v15 = vadd.f32 %v1865_v31, %v7827_v37  ;;  %3459 = vmatprep.mubr.bf16.mxu1 %v7989_v38  ;;  %3629 = vmatprep.subr.bf16.mxu1 %v6460_v16  ;;  %v2044_v62 = vmax.f32 %v1975_v28, 0.0  ;;  %v6475_v31 = vld [vmem:[#allocation8 + $0x10c] ss:$16 sps:$4 sm:$0xff]   ;;  %v6473_v25 = vld [vmem:[#allocation8 + $0x108] ss:$16 sps:$4 sm:$0xff]  }
 0x1f4   : > { %v1869_v20 = vpop.f32.mrf.mxu0  ;;  %3367 = vmatmul.mubr.bf16.gmra.mxu0 %v7986_v9  ;;  %3460 = vmatmul.mubr.bf16.gmra.mxu1 %v7992_v35  ;;  %v8007_v12 = vpack.c.bf16 %v2061_v22, %v2057_v51  ;;  %v6478_v28 = vld [vmem:[#allocation8 + $0x38c] ss:$16 sps:$4 sm:$0xff]   ;;  %v6476_v22 = vld [vmem:[#allocation8 + $0x388] ss:$16 sps:$4 sm:$0xff]  }
 0x1f5   : > { %v1982_v1 = vpop.f32.mrf.mxu1  ;;  %v1979_v14 = vadd.f32 %v1978_v57, %v1866_v15  ;;  %3376 = vmatprep.mubr.bf16.mxu0 %v7994_v43  ;;  %3525 = vmatpush2.bf16.msra.mxu0 %v6455_v24  ;;  %v2047_v55 = vmax.f32 %v1977_v11, 0.0  ;;  %v1870_v42 = vadd.f32 %v1869_v20, %v7833_v26  ;;  %v9230_v53 = vld [vmem:[#allocation25_spill] sm:$0xff] }
 0x1f6   : > { %3630 = vmatpush2.bf16.msra.mxu1 %v6458_v21  ;;  %v1871_v0 = vpop.f32.mrf.mxu0  ;;  %3526 = vmatprep.subr.bf16.mxu0 %v6463_v6 }
 0x1f7   : > { %v1984_v2 = vpop.f32.mrf.mxu1  ;;  %v2048_v56 = vmax.f32 %v1979_v14, 0.0  ;;  %v1872_v52 = vadd.f32 %v1871_v0, %v7827_v37  ;;  %3631 = vmatprep.subr.bf16.mxu1 %v6466_v47  ;;  %v8009_v45 = vpack.c.bf16 %v2047_v55, %v2043_v30  ;;  %v1983_v11 = vadd.f32 %v1982_v1, %v1870_v42 }
 0x1f8   : > { %v1873_v16 = vpop.f32.mrf.mxu0 }
 0x1f9   : > { %v1986_v58 = vpop.f32.mrf.mxu1  ;;  %v1874_v50 = vadd.f32 %v1873_v16, %v7833_v26  ;;  %3527 = vmatpush2.bf16.msra.mxu0 %v6461_v18  ;;  %v8005_v32 = vpack.c.bf16 %v2048_v56, %v2044_v62  ;;  %v1985_v57 = vadd.f32 %v1984_v2, %v1872_v52  ;;  %v6481_v2 = vld [vmem:[#allocation8 + $0x36c] ss:$16 sps:$4 sm:$0xff]   ;;  %v6479_v16 = vld [vmem:[#allocation8 + $0x368] ss:$16 sps:$4 sm:$0xff]  }
 0x1fa   : > { %3632 = vmatpush2.bf16.msra.mxu1 %v6464_v19  ;;  %v1875_v29 = vpop.f32.mrf.mxu0  ;;  %3528 = vmatprep.subr.bf16.mxu0 %v6469_v49  ;;  %v2051_v19 = vmax.f32 %v1983_v11, 0.0  ;;  %v6636_v11 = vld [vmem:[#allocation8 + $0xe0] ss:$16 sps:$4 sm:$0xff]  }
 0x1fb   : > { %v1988_v24 = vpop.f32.mrf.mxu1  ;;  %v1987_v21 = vadd.f32 %v1986_v58, %v1874_v50  ;;  %v1876_v6 = vadd.f32 %v1875_v29, %v7827_v37  ;;  %3469 = vmatprep.mubr.bf16.mxu1 %v8005_v32  ;;  %3633 = vmatprep.subr.bf16.mxu1 %v6472_v7  ;;  %v2052_v55 = vmax.f32 %v1985_v57, 0.0  ;;  %v6635_v58 = vld [vmem:[#allocation8 + $0xe4] ss:$16 sps:$4 sm:$0xff]  }
 0x1fc   : > { %v1879_v15 = vpop.f32.mrf.mxu0  ;;  %3377 = vmatmul.mubr.bf16.gmra.mxu0 %v8007_v12  ;;  %3470 = vmatmul.mubr.bf16.gmra.mxu1 %v8009_v45 }
 0x1fd   : > { %v1992_v47 = vpop.f32.mrf.mxu1  ;;  %v1989_v48 = vadd.f32 %v1988_v24, %v1876_v6  ;;  %3529 = vmatpush2.bf16.msra.mxu0 %v6467_v54  ;;  %3532 = vmatprep.mubr.bf16.mxu0 %v9230_v53  ;;  %v2055_v20 = vmax.f32 %v1987_v21, 0.0  ;;  %v1880_v49 = vadd.f32 %v1879_v15, %v7833_v26  ;;  %v6484_v24 = vld [vmem:[#allocation8 + $0x34c] ss:$16 sps:$4 sm:$0xff]  }
 0x1fe   : > { %3634 = vmatpush2.bf16.msra.mxu1 %v6470_v3  ;;  %v1881_v14 = vpop.f32.mrf.mxu0  ;;  %3530 = vmatprep.subr.bf16.mxu0 %v6475_v31  ;;  %v9231_v21 = vld [vmem:[#allocation27_spill] sm:$0xff] }
 0x1ff   : > { %v1994_v18 = vpop.f32.mrf.mxu1  ;;  %v2056_v0 = vmax.f32 %v1989_v48, 0.0  ;;  %v1882_v1 = vadd.f32 %v1881_v14, %v7827_v37  ;;  %3635 = vmatprep.subr.bf16.mxu1 %v6478_v28  ;;  %v8021_v51 = vpack.c.bf16 %v2055_v20, %v2051_v19  ;;  %v1993_v3 = vadd.f32 %v1992_v47, %v1880_v49  ;;  %v9232_v28 = vld [vmem:[#allocation28_spill] sm:$0xff]  ;;  %v6482_v47 = vld [vmem:[#allocation8 + $0x348] ss:$16 sps:$4 sm:$0xff]  }
 0x200   : > { %v1883_v62 = vpop.f32.mrf.mxu0 }
 0x201   : > { %v1996_v56 = vpop.f32.mrf.mxu1  ;;  %v1884_v52 = vadd.f32 %v1883_v62, %v7833_v26  ;;  %3531 = vmatpush2.bf16.msra.mxu0 %v6473_v25  ;;  %v8019_v7 = vpack.c.bf16 %v2056_v0, %v2052_v55  ;;  %v1995_v50 = vadd.f32 %v1994_v18, %v1882_v1  ;;  %v6637_v25 = vld [vmem:[#allocation8 + $0xc4] ss:$16 sps:$4 sm:$0xff]   ;;  %v6487_v18 = vld [vmem:[#allocation8 + $0x32c] ss:$16 sps:$4 sm:$0xff]   ;;  %v6638_v1 = vld [vmem:[#allocation8 + $0xc0] ss:$16 sps:$4 sm:$0xff]  }
 0x202   : > { %3636 = vmatpush2.bf16.msra.mxu1 %v6476_v22  ;;  %v1885_v30 = vpop.f32.mrf.mxu0  ;;  %3822 = vmatprep.subr.bf16.mxu0 %v6635_v58  ;;  %v2059_v22 = vmax.f32 %v1993_v3, 0.0  ;;  %v6640_v58 = vld [vmem:[#allocation8 + $0xa0] ss:$16 sps:$4 sm:$0xff]  }
 0x203   : > { %v1998_v42 = vpop.f32.mrf.mxu1  ;;  %v1997_v54 = vadd.f32 %v1996_v56, %v1884_v52  ;;  %v1886_v29 = vadd.f32 %v1885_v30, %v7827_v37  ;;  %3479 = vmatprep.mubr.bf16.mxu1 %v8019_v7  ;;  %3637 = vmatprep.subr.bf16.mxu1 %v6481_v2  ;;  %v2060_v20 = vmax.f32 %v1995_v50, 0.0  ;;  %v6485_v56 = vld [vmem:[#allocation8 + $0x328] ss:$16 sps:$4 sm:$0xff]   ;;  %v6639_v52 = vld [vmem:[#allocation8 + $0xa4] ss:$16 sps:$4 sm:$0xff]  }
 0x204   : > { %v8025_v31 = vpop.f32.mrf.mxu0  ;;  %3480 = vmatmul.mubr.bf16.gmra.mxu1 %v8021_v51  ;;  %3533 = vmatmul.mubr.bf16.vlgmr.msra.gmra.mxu0 %v9231_v21  ;;  %v6490_v30 = vld [vmem:[#allocation8 + $0x30c] ss:$16 sps:$4 sm:$0xff]  }
 0x205   : > { %v8027_v57 = vpop.f32.mrf.mxu1  ;;  %v1999_v6 = vadd.f32 %v1998_v42, %v1886_v29  ;;  %3542 = vmatprep.mubr.bf16.mxu0 %v9232_v28  ;;  %3823 = vmatpush1.bf16.msra.mxu0 %v6636_v11  ;;  %v2063_v15 = vmax.f32 %v1997_v54, 0.0  ;;  %v6488_v29 = vld [vmem:[#allocation8 + $0x308] ss:$16 sps:$4 sm:$0xff]   ;;  %v6644_v28 = vld [vmem:[#allocation8 + $0x2e4] ss:$16 sps:$4 sm:$0xff]  }
 0x206   : > { %3638 = vmatpush2.bf16.msra.mxu1 %v6479_v16  ;;  %v8032_v48 = vpop.f32.mrf.mxu0  ;;  %3824 = vmatprep.subr.bf16.mxu0 %v6637_v25 }
 0x207   : > { %v8034_v53 = vpop.f32.mrf.mxu1  ;;  %v2064_v14 = vmax.f32 %v1999_v6, 0.0  ;;  %3639 = vmatprep.subr.bf16.mxu1 %v6484_v24  ;;  %v8042_v19 = vpack.c.bf16 %v2063_v15, %v2059_v22  ;;  %v6641_v24 = vld [vmem:[#allocation8 + $0x84] ss:$16 sps:$4 sm:$0xff]  }
 0x208   : > { %v8036_v55 = vpop.f32.mrf.mxu0  ;;  %v6643_v6 = vld [vmem:[#allocation8 + $0x64] ss:$16 sps:$4 sm:$0xff]  }
 0x209   : > { %v8038_v0 = vpop.f32.mrf.mxu1  ;;  %3825 = vmatpush1.bf16.msra.mxu0 %v6638_v1  ;;  %v8040_v2 = vpack.c.bf16 %v2064_v14, %v2060_v20  ;;  %v6646_v14 = vld [vmem:[#allocation8 + $0x2e0] ss:$16 sps:$4 sm:$0xff]  }
 0x20a   : > { %3640 = vmatpush2.bf16.msra.mxu1 %v6482_v47  ;;  %v8044_v49 = vpop.f32.mrf.mxu0  ;;  %3826 = vmatprep.subr.bf16.mxu0 %v6639_v52  ;;  %v6645_v47 = vld [vmem:[#allocation8 + $0x60] ss:$16 sps:$4 sm:$0xff]   ;;  %v6651_v52 = vld [vmem:[#allocation8 + $0x24] ss:$16 sps:$4 sm:$0xff]  }
 0x20b   : > { %v8046_v62 = vpop.f32.mrf.mxu1  ;;  %3489 = vmatprep.mubr.bf16.mxu1 %v8040_v2  ;;  %3641 = vmatprep.subr.bf16.mxu1 %v6487_v18  ;;  %v6647_v18 = vld [vmem:[#allocation8 + $0x44] ss:$16 sps:$4 sm:$0xff]  }
 0x20c   : > { %v8049_v42 = vpop.f32.mrf.mxu0  ;;  %3490 = vmatmul.mubr.bf16.gmra.mxu1 %v8042_v19  ;;  %3543 = vmatmul.mubr.bf16.gmra.mxu0 %v7845_v10  ;;  %v6642_v10 = vld [vmem:[#allocation8 + $0x80] ss:$16 sps:$4 sm:$0xff]  }
 0x20d   : > { %v8051_v16 = vpop.f32.mrf.mxu1  ;;  %3552 = vmatprep.mubr.bf16.mxu0 %v7854_v61  ;;  %3645 = vmatprep.mubr.bf16.mxu1 %v7874_v13 }
 0x20e   : > { %3642 = vmatpush2.bf16.msra.mxu1 %v6485_v56  ;;  %3827 = vmatpush1.bf16.msra.mxu0 %v6640_v58  ;;  %v8057_v50 = vpop.f32.mrf.mxu0  ;;  %v6650_v56 = vld [vmem:[#allocation8 + $0x2c0] ss:$16 sps:$4 sm:$0xff]  }
 0x20f   : > { %v8059_v54 = vpop.f32.mrf.mxu1  ;;  %3643 = vmatprep.subr.bf16.mxu1 %v6490_v30  ;;  %3828 = vmatprep.subr.bf16.mxu0 %v6641_v24  ;;  %v6653_v24 = vld [vmem:[#allocation8 + $0x20] ss:$16 sps:$4 sm:$0xff]  }
 0x210   : > { %v8061_v3 = vpop.f32.mrf.mxu0 }
 0x211   : > { %v8063_v21 = vpop.f32.mrf.mxu1 }
 0x212   : > { %3644 = vmatpush2.bf16.msra.mxu1 %v6488_v29  ;;  %3829 = vmatpush1.bf16.msra.mxu0 %v6642_v10  ;;  %v8065_v61 = vpop.f32.mrf.mxu0  ;;  %v6652_v29 = vld [vmem:[#allocation8 + $0x2a4] ss:$16 sps:$4 sm:$0xff]  }
 0x213   : > { %v8067_v13 = vpop.f32.mrf.mxu1  ;;  %3830 = vmatprep.subr.bf16.mxu0 %v6643_v6  ;;  %3935 = vmatprep.subr.bf16.mxu1 %v6644_v28  ;;  %v6654_v28 = vld [vmem:[#allocation8 + $0x2a0] ss:$16 sps:$4 sm:$0xff]  }
 0x214   : > { %v8069_v11 = vpop.f32.mrf.mxu0  ;;  %3553 = vmatmul.mubr.bf16.gmra.mxu0 %v7871_v63  ;;  %v6648_v63 = vld [vmem:[#allocation8 + $0x2c4] ss:$16 sps:$4 sm:$0xff]  }
 0x215   : > { %v8071_v15 = vpop.f32.mrf.mxu1  ;;  %3646 = vmatmul.mubr.bf16.vlgmr.msra.gmra.mxu1 %v7879_v33  ;;  %3562 = vmatprep.mubr.bf16.mxu0 %v7883_v8  ;;  %v6649_v33 = vld [vmem:[#allocation8 + $0x40] ss:$16 sps:$4 sm:$0xff]  }
 0x216   : > { %3655 = vmatprep.mubr.bf16.mxu1 %v7906_v46  ;;  %3831 = vmatpush1.bf16.msra.mxu0 %v6645_v47  ;;  %v8077_v25 = vpop.f32.mrf.mxu0  ;;  %v6655_v47 = vld [vmem:[#allocation8 + $0x4] ss:$16 sps:$4 sm:$0xff]  }
 0x217   : > { %v8079_v20 = vpop.f32.mrf.mxu1  ;;  %3936 = vmatpush1.bf16.msra.mxu1 %v6646_v14  ;;  %3832 = vmatprep.subr.bf16.mxu0 %v6647_v18  ;;  %v6656_v18 = vld [vmem:[#allocation8 + $0x284] ss:$16 sps:$4 sm:$0xff]  }
 0x218   : > { %v8081_v22 = vpop.f32.mrf.mxu0  ;;  %3937 = vmatprep.subr.bf16.mxu1 %v6648_v63  ;;  %v6658_v63 = vld [vmem:[#allocation8 + $0x280] ss:$16 sps:$4 sm:$0xff]  }
 0x219   : > { %v8083_v1 = vpop.f32.mrf.mxu1 }
 0x21a   : > { %3833 = vmatpush1.bf16.msra.mxu0 %v6649_v33  ;;  %v8085_v8 = vpop.f32.mrf.mxu0  ;;  %v6659_v33 = vld [vmem:[#allocation8 + $0x1e4] ss:$16 sps:$4 sm:$0xff]  }
 0x21b   : > { %v8087_v46 = vpop.f32.mrf.mxu1  ;;  %3938 = vmatpush1.bf16.msra.mxu1 %v6650_v56  ;;  %3834 = vmatprep.subr.bf16.mxu0 %v6651_v52 }
 0x21c   : > { %v8089_v30 = vpop.f32.mrf.mxu0  ;;  %3563 = vmatmul.mubr.bf16.gmra.mxu0 %v7891_v4  ;;  %3939 = vmatprep.subr.bf16.mxu1 %v6652_v29  ;;  %v6660_v29 = vld [vmem:[#allocation8 + $0x264] ss:$16 sps:$4 sm:$0xff]  }
 0x21d   : > { %v8091_v58 = vpop.f32.mrf.mxu1  ;;  %3656 = vmatmul.mubr.bf16.gmra.mxu1 %v7911_v34  ;;  %3572 = vmatprep.mubr.bf16.mxu0 %v7913_v59  ;;  %v6657_v34 = vld [vmem:[#allocation8] ss:$16 sps:$4 sm:$0xff]  }
 0x21e   : > { %3665 = vmatprep.mubr.bf16.mxu1 %v7936_v41  ;;  %3835 = vmatpush1.bf16.msra.mxu0 %v6653_v24  ;;  %v8097_v10 = vpop.f32.mrf.mxu0  ;;  %v6661_v24 = vld [vmem:[#allocation8 + $0x1e0] ss:$16 sps:$4 sm:$0xff]  }
 0x21f   : > { %v8099_v6 = vpop.f32.mrf.mxu1  ;;  %3940 = vmatpush1.bf16.msra.mxu1 %v6654_v28  ;;  %3836 = vmatprep.subr.bf16.mxu0 %v6655_v47 }
 0x220   : > { %v8101_v14 = vpop.f32.mrf.mxu0  ;;  %3941 = vmatprep.subr.bf16.mxu1 %v6656_v18  ;;  %v6662_v18 = vld [vmem:[#allocation8 + $0x260] ss:$16 sps:$4 sm:$0xff]  }
 0x221   : > { %v8103_v4 = vpop.f32.mrf.mxu1 }
 0x222   : > { %3837 = vmatpush1.bf16.msra.mxu0 %v6657_v34  ;;  %v8105_v59 = vpop.f32.mrf.mxu0  ;;  %v6663_v34 = vld [vmem:[#allocation8 + $0x1c4] ss:$16 sps:$4 sm:$0xff]  }
 0x223   : > { %v8107_v41 = vpop.f32.mrf.mxu1  ;;  %3942 = vmatpush1.bf16.msra.mxu1 %v6658_v63  ;;  %3838 = vmatprep.subr.bf16.mxu0 %v6659_v33  ;;  %v6664_v33 = vld [vmem:[#allocation8 + $0x244] ss:$16 sps:$4 sm:$0xff]  }
 0x224   : > { %v8109_v56 = vpop.f32.mrf.mxu0  ;;  %3573 = vmatmul.mubr.bf16.gmra.mxu0 %v7932_v23  ;;  %3943 = vmatprep.subr.bf16.mxu1 %v6660_v29  ;;  %v6666_v29 = vld [vmem:[#allocation8 + $0x240] ss:$16 sps:$4 sm:$0xff]  }
 0x225   : > { %v8111_v52 = vpop.f32.mrf.mxu1  ;;  %3666 = vmatmul.mubr.bf16.gmra.mxu1 %v7941_v17  ;;  %3582 = vmatprep.mubr.bf16.mxu0 %v7943_v44  ;;  %v6665_v17 = vld [vmem:[#allocation8 + $0x1c0] ss:$16 sps:$4 sm:$0xff]  }
 0x226   : > { %9233 = vst [vmem:[#allocation20_spill] sm:$0xff] %v8111_v52  ;;  %3675 = vmatprep.mubr.bf16.mxu1 %v7967_v39  ;;  %3839 = vmatpush2.bf16.msra.mxu0 %v6661_v24  ;;  %v8117_v28 = vpop.f32.mrf.mxu0  ;;  %v6667_v24 = vld [vmem:[#allocation8 + $0x1a4] ss:$16 sps:$4 sm:$0xff]  }
 0x227   : > { %v8119_v47 = vpop.f32.mrf.mxu1  ;;  %3944 = vmatpush1.bf16.msra.mxu1 %v6662_v18  ;;  %3840 = vmatprep.subr.bf16.mxu0 %v6663_v34  ;;  %v6668_v34 = vld [vmem:[#allocation8 + $0x224] ss:$16 sps:$4 sm:$0xff]  }
 0x228   : > { %v8121_v63 = vpop.f32.mrf.mxu0  ;;  %3945 = vmatprep.subr.bf16.mxu1 %v6664_v33  ;;  %v6669_v33 = vld [vmem:[#allocation8 + $0x1a0] ss:$16 sps:$4 sm:$0xff]  }
 0x229   : > { %v8123_v23 = vpop.f32.mrf.mxu1 }
 0x22a   : > { %3841 = vmatpush2.bf16.msra.mxu0 %v6665_v17  ;;  %v8125_v44 = vpop.f32.mrf.mxu0 }
 0x22b   : > { %v8127_v39 = vpop.f32.mrf.mxu1  ;;  %3946 = vmatpush1.bf16.msra.mxu1 %v6666_v29  ;;  %3842 = vmatprep.subr.bf16.mxu0 %v6667_v24  ;;  %v2106_v24 = vadd.f32 %v8044_v49, %v7726_v5 }
 0x22c   : > { %v8129_v52 = vpop.f32.mrf.mxu0  ;;  %3583 = vmatmul.mubr.bf16.gmra.mxu0 %v7958_v27  ;;  %3947 = vmatprep.subr.bf16.mxu1 %v6668_v34  ;;  %v6671_v27 = vld [vmem:[#allocation8 + $0x184] ss:$16 sps:$4 sm:$0xff]  }
 0x22d   : > { %9234 = vst [vmem:[#allocation19_spill] sm:$0xff] %v8129_v52  ;;  %v8131_v18 = vpop.f32.mrf.mxu1  ;;  %3676 = vmatmul.mubr.bf16.gmra.mxu1 %v7970_v60  ;;  %3592 = vmatprep.mubr.bf16.mxu0 %v7972_v36  ;;  %v6672_v36 = vld [vmem:[#allocation8 + $0x204] ss:$16 sps:$4 sm:$0xff]   ;;  %v2219_v49 = vadd.f32 %v8046_v62, %v2106_v24  ;;  %v6677_v62 = vld [vmem:[#allocation8 + $0x160] ss:$16 sps:$4 sm:$0xff]  }
 0x22e   : > { %9235 = vst [vmem:[#allocation17_spill] sm:$0xff] %v8131_v18  ;;  %3685 = vmatprep.mubr.bf16.mxu1 %v7989_v38  ;;  %3843 = vmatpush2.bf16.msra.mxu0 %v6669_v33  ;;  %v8137_v17 = vpop.f32.mrf.mxu0  ;;  %v6670_v18 = vld [vmem:[#allocation8 + $0x220] ss:$16 sps:$4 sm:$0xff]   ;;  %v2102_v38 = vadd.f32 %v8032_v48, %v7726_v5 }
 0x22f   : > { %v8139_v29 = vpop.f32.mrf.mxu1  ;;  %3948 = vmatpush1.bf16.msra.mxu1 %v6670_v18  ;;  %3844 = vmatprep.subr.bf16.mxu0 %v6671_v27  ;;  %v6673_v33 = vld [vmem:[#allocation8 + $0x180] ss:$16 sps:$4 sm:$0xff]   ;;  %v6675_v27 = vld [vmem:[#allocation8 + $0x164] ss:$16 sps:$4 sm:$0xff]  }
 0x230   : > { %9236 = vst [vmem:[#allocation21_spill] sm:$0xff] %v8139_v29  ;;  %v8143_v34 = vpop.f32.mrf.mxu0  ;;  %3949 = vmatprep.subr.bf16.mxu1 %v6672_v36  ;;  %v6674_v18 = vld [vmem:[#allocation8 + $0x200] ss:$16 sps:$4 sm:$0xff]   ;;  %v6676_v36 = vld [vmem:[#allocation8 + $0x3e4] ss:$16 sps:$4 sm:$0xff]   ;;  %v2215_v48 = vadd.f32 %v8034_v53, %v2102_v38  ;;  %v2100_v38 = vadd.f32 %v8025_v31, %v7751_v40 }
 0x231   : > { %9237 = vst [vmem:[#allocation18_spill] sm:$0xff] %v8143_v34  ;;  %v8145_v60 = vpop.f32.mrf.mxu1  ;;  %v6680_v53 = vld [vmem:[#allocation8 + $0x3c4] ss:$16 sps:$4 sm:$0xff]  }
 0x232   : > { %9238 = vst [vmem:[#allocation22_spill] sm:$0xff] %v8145_v60  ;;  %3845 = vmatpush2.bf16.msra.mxu0 %v6673_v33  ;;  %v8149_v52 = vpop.f32.mrf.mxu0 }
 0x233   : > { %v8151_v29 = vpop.f32.mrf.mxu1  ;;  %3950 = vmatpush1.bf16.msra.mxu1 %v6674_v18  ;;  %3846 = vmatprep.subr.bf16.mxu0 %v6675_v27  ;;  %v2104_v18 = vadd.f32 %v8036_v55, %v7751_v40  ;;  %v6678_v27 = vld [vmem:[#allocation8 + $0x3e0] ss:$16 sps:$4 sm:$0xff]   ;;  %v2112_v55 = vadd.f32 %v8057_v50, %v7726_v5  ;;  %v6684_v50 = vld [vmem:[#allocation8 + $0x3a4] ss:$16 sps:$4 sm:$0xff]  }
 0x234   : > { %v8154_v34 = vpop.f32.mrf.mxu0  ;;  %3593 = vmatmul.mubr.bf16.gmra.mxu0 %v7986_v9  ;;  %3951 = vmatprep.subr.bf16.mxu1 %v6676_v36  ;;  %v2522_v9 = vmax.f32 %v2219_v49, 0.0  ;;  %v6679_v36 = vld [vmem:[#allocation8 + $0x144] ss:$16 sps:$4 sm:$0xff]   ;;  %v6681_v49 = vld [vmem:[#allocation8 + $0x140] ss:$16 sps:$4 sm:$0xff]  }
 0x235   : > { %v8156_v60 = vpop.f32.mrf.mxu1  ;;  %3686 = vmatmul.mubr.bf16.gmra.mxu1 %v7992_v35  ;;  %3602 = vmatprep.mubr.bf16.mxu0 %v7994_v43  ;;  %v2116_v35 = vadd.f32 %v8065_v61, %v7726_v5  ;;  %v2217_v61 = vadd.f32 %v8038_v0, %v2104_v18  ;;  %v2114_v0 = vadd.f32 %v8061_v3, %v7751_v40  ;;  %v6687_v3 = vld [vmem:[#allocation8 + $0x104] ss:$16 sps:$4 sm:$0xff]  }
 0x236   : > { %9239 = vst [vmem:[#allocation23_spill] sm:$0xff] %v8156_v60  ;;  %3695 = vmatprep.mubr.bf16.mxu1 %v8005_v32  ;;  %3847 = vmatpush2.bf16.msra.mxu0 %v6677_v62  ;;  %v8163_v24 = vpop.f32.mrf.mxu0  ;;  %v2518_v62 = vmax.f32 %v2215_v48, 0.0  ;;  %v6682_v60 = vld [vmem:[#allocation8 + $0x3c0] ss:$16 sps:$4 sm:$0xff]  }
 0x237   : > { %v8165_v33 = vpop.f32.mrf.mxu1  ;;  %3952 = vmatpush2.bf16.msra.mxu1 %v6678_v27  ;;  %3848 = vmatprep.subr.bf16.mxu0 %v6679_v36  ;;  %v2229_v31 = vadd.f32 %v8067_v13, %v2116_v35  ;;  %v6685_v13 = vld [vmem:[#allocation8 + $0x120] ss:$16 sps:$4 sm:$0xff]  }
 0x238   : > { %v8171_v43 = vpop.f32.mrf.mxu0  ;;  %3953 = vmatprep.subr.bf16.mxu1 %v6680_v53  ;;  %v8184_v53 = vpack.c.bf16 %v2522_v9, %v2518_v62  ;;  %v2521_v9 = vmax.f32 %v2217_v61, 0.0  ;;  %v6686_v35 = vld [vmem:[#allocation8 + $0x3a0] ss:$16 sps:$4 sm:$0xff]  }
 0x239   : > { %9240 = vst [vmem:[#allocation24_spill] sm:$0xff] %v8171_v43  ;;  %v8173_v32 = vpop.f32.mrf.mxu1 }
 0x23a   : > { %9241 = vst [vmem:[#allocation26_spill] sm:$0xff] %v8173_v32  ;;  %3849 = vmatpush2.bf16.msra.mxu0 %v6681_v49  ;;  %v8179_v27 = vpop.f32.mrf.mxu0  ;;  %v6683_v32 = vld [vmem:[#allocation8 + $0x124] ss:$16 sps:$4 sm:$0xff]   ;;  %9242 = vst [vmem:[#allocation25_spill] sm:$0xff] %v8184_v53  ;;  %v2213_v49 = vadd.f32 %v8027_v57, %v2100_v38  ;;  %v2110_v57 = vadd.f32 %v8049_v42, %v7751_v40  ;;  %v2122_v42 = vadd.f32 %v8077_v25, %v7726_v5 }
 0x23b   : > { %v8181_v36 = vpop.f32.mrf.mxu1  ;;  %3954 = vmatpush2.bf16.msra.mxu1 %v6682_v60  ;;  %3850 = vmatprep.subr.bf16.mxu0 %v6683_v32  ;;  %v2225_v60 = vadd.f32 %v8059_v54, %v2112_v55  ;;  %v2126_v54 = vadd.f32 %v8085_v8, %v7726_v5  ;;  %v6688_v38 = vld [vmem:[#allocation8 + $0x384] ss:$16 sps:$4 sm:$0xff]   ;;  %v2227_v55 = vadd.f32 %v8063_v21, %v2114_v0 }
 0x23c   : > { %v8187_v48 = vpop.f32.mrf.mxu0  ;;  %3603 = vmatmul.mubr.bf16.gmra.mxu0 %v8007_v12  ;;  %3955 = vmatprep.subr.bf16.mxu1 %v6684_v50  ;;  %v2517_v62 = vmax.f32 %v2213_v49, 0.0  ;;  %v6689_v50 = vld [vmem:[#allocation8 + $0x100] ss:$16 sps:$4 sm:$0xff]   ;;  %v2124_v21 = vadd.f32 %v8081_v22, %v7751_v40 }
 0x23d   : > { %v8189_v43 = vpop.f32.mrf.mxu1  ;;  %3696 = vmatmul.mubr.bf16.gmra.mxu1 %v8009_v45  ;;  %3854 = vmatprep.mubr.bf16.mxu0 %v8184_v53  ;;  %v2530_v45 = vmax.f32 %v2229_v31, 0.0  ;;  %v2526_v61 = vmax.f32 %v2225_v60, 0.0  ;;  %v2239_v49 = vadd.f32 %v8087_v46, %v2126_v54  ;;  %v6692_v60 = vld [vmem:[#allocation8 + $0x364] ss:$16 sps:$4 sm:$0xff]   ;;  %v2529_v53 = vmax.f32 %v2227_v55, 0.0 }
 0x23e   : > { %3705 = vmatprep.mubr.bf16.mxu1 %v8019_v7  ;;  %3851 = vmatpush2.bf16.msra.mxu0 %v6685_v13  ;;  %v8199_v18 = vpop.f32.mrf.mxu0  ;;  %v8218_v8 = vpack.c.bf16 %v2521_v9, %v2517_v62  ;;  %v2235_v9 = vadd.f32 %v8079_v20, %v2122_v42  ;;  %v6693_v54 = vld [vmem:[#allocation8 + $0x360] ss:$16 sps:$4 sm:$0xff]   ;;  %v2237_v62 = vadd.f32 %v8083_v1, %v2124_v21  ;;  %v6696_v42 = vld [vmem:[#allocation8 + $0xcc] ss:$16 sps:$4 sm:$0xff]  }
 0x23f   : > { %v8201_v12 = vpop.f32.mrf.mxu1  ;;  %3956 = vmatpush2.bf16.msra.mxu1 %v6686_v35  ;;  %3852 = vmatprep.subr.bf16.mxu0 %v6687_v3  ;;  %v2223_v35 = vadd.f32 %v8051_v16, %v2110_v57  ;;  %v6690_v3 = vld [vmem:[#allocation8 + $0x380] ss:$16 sps:$4 sm:$0xff]   ;;  %v2120_v16 = vadd.f32 %v8069_v11, %v7751_v40  ;;  %v2538_v55 = vmax.f32 %v2239_v49, 0.0  ;;  %v2136_v11 = vadd.f32 %v8105_v59, %v7726_v5 }
 0x240   : > { %v8207_v32 = vpop.f32.mrf.mxu0  ;;  %3957 = vmatprep.subr.bf16.mxu1 %v6688_v38  ;;  %v6691_v38 = vld [vmem:[#allocation8 + $0xec] ss:$16 sps:$4 sm:$0xff]   ;;  %v2132_v1 = vadd.f32 %v8097_v10, %v7726_v5 }
 0x241   : > { %v8209_v7 = vpop.f32.mrf.mxu1  ;;  %v2525_v57 = vmax.f32 %v2223_v35, 0.0 }
 0x242   : > { %3853 = vmatpush2.bf16.msra.mxu0 %v6689_v50  ;;  %v8214_v13 = vpop.f32.mrf.mxu0  ;;  %v8224_v50 = vpack.c.bf16 %v2530_v45, %v2526_v61  ;;  %v6694_v45 = vld [vmem:[#allocation8 + $0xe8] ss:$16 sps:$4 sm:$0xff]  }
 0x243   : > { %v8216_v31 = vpop.f32.mrf.mxu1  ;;  %3958 = vmatpush2.bf16.msra.mxu1 %v6690_v3  ;;  %4048 = vmatprep.subr.bf16.mxu0 %v6691_v38  ;;  %v8237_v3 = vpack.c.bf16 %v2529_v53, %v2525_v57  ;;  %v2233_v38 = vadd.f32 %v8071_v15, %v2120_v16  ;;  %v6698_v53 = vld [vmem:[#allocation8 + $0xc8] ss:$16 sps:$4 sm:$0xff]   ;;  %v8248_v15 = vadd.f32 %v8107_v41, %v2136_v11 }
 0x244   : > { %v2325_v25 = vpop.f32.mrf.mxu0  ;;  %3959 = vmatprep.subr.bf16.mxu1 %v6692_v60  ;;  %v2534_v60 = vmax.f32 %v2235_v9, 0.0 }
 0x245   : > { %v2438_v0 = vpop.f32.mrf.mxu1  ;;  %3706 = vmatmul.mubr.bf16.gmra.mxu1 %v8021_v51  ;;  %3855 = vmatmul.mubr.bf16.vlgmr.msra.gmra.mxu0 %v8218_v8  ;;  %v2326_v21 = vadd.f32 %v2325_v25, %v7833_v26  ;;  %v6699_v25 = vld [vmem:[#allocation8 + $0x324] ss:$16 sps:$4 sm:$0xff]   ;;  %v2533_v41 = vmax.f32 %v2233_v38, 0.0 }
 0x246   : > { %3715 = vmatprep.mubr.bf16.mxu1 %v8040_v2  ;;  %3864 = vmatprep.mubr.bf16.mxu0 %v8224_v50  ;;  %v2327_v22 = vpop.f32.mrf.mxu0  ;;  %v6695_v2 = vld [vmem:[#allocation8 + $0x344] ss:$16 sps:$4 sm:$0xff]  }
 0x247   : > { %v2440_v46 = vpop.f32.mrf.mxu1  ;;  %3960 = vmatpush2.bf16.msra.mxu1 %v6693_v54  ;;  %4049 = vmatpush1.bf16.msra.mxu0 %v6694_v45  ;;  %v2328_v51 = vadd.f32 %v2327_v22, %v7827_v37  ;;  %v2134_v22 = vadd.f32 %v8101_v14, %v7751_v40  ;;  %v6697_v45 = vld [vmem:[#allocation8 + $0x340] ss:$16 sps:$4 sm:$0xff]   ;;  %v8252_v14 = vpack.c.bf16 %v2538_v55, %v2534_v60 }
 0x248   : > { %v2329_v20 = vpop.f32.mrf.mxu0  ;;  %3961 = vmatprep.subr.bf16.mxu1 %v6695_v2  ;;  %4050 = vmatprep.subr.bf16.mxu0 %v6696_v42  ;;  %v6700_v2 = vld [vmem:[#allocation8 + $0xac] ss:$16 sps:$4 sm:$0xff]   ;;  %v2439_v11 = vadd.f32 %v2438_v0, %v2326_v21  ;;  %v2146_v55 = vadd.f32 %v8125_v44, %v7726_v5  ;;  %v2546_v0 = vmax.f32 %v8248_v15, 0.0 }
 0x249   : > { %v2442_v61 = vpop.f32.mrf.mxu1  ;;  %v2330_v35 = vadd.f32 %v2329_v20, %v7833_v26  ;;  %v2441_v54 = vadd.f32 %v2440_v46, %v2328_v51  ;;  %v2537_v20 = vmax.f32 %v2237_v62, 0.0  ;;  %v2130_v46 = vadd.f32 %v8089_v30, %v7751_v40  ;;  %v6702_v30 = vld [vmem:[#allocation8 + $0xa8] ss:$16 sps:$4 sm:$0xff]   ;;  %v6704_v44 = vld [vmem:[#allocation8 + $0x8c] ss:$16 sps:$4 sm:$0xff]  }
 0x24a   : > { %v2331_v49 = vpop.f32.mrf.mxu0  ;;  %v2245_v62 = vadd.f32 %v8099_v6, %v2132_v1  ;;  %v2247_v6 = vadd.f32 %v8103_v4, %v2134_v22  ;;  %v2140_v4 = vadd.f32 %v8109_v56, %v7751_v40  ;;  %v2519_v22 = vmax.f32 %v2439_v11, 0.0  ;;  %v6707_v11 = vld [vmem:[#allocation8 + $0x6c] ss:$16 sps:$4 sm:$0xff]  }
 0x24b   : > { %v2444_v59 = vpop.f32.mrf.mxu1  ;;  %3962 = vmatpush2.bf16.msra.mxu1 %v6697_v45  ;;  %4051 = vmatpush1.bf16.msra.mxu0 %v6698_v53  ;;  %v2332_v57 = vadd.f32 %v2331_v49, %v7827_v37  ;;  %v2443_v16 = vadd.f32 %v2442_v61, %v2330_v35  ;;  %v2520_v35 = vmax.f32 %v2441_v54, 0.0  ;;  %v6701_v49 = vld [vmem:[#allocation8 + $0x320] ss:$16 sps:$4 sm:$0xff]   ;;  %v6703_v45 = vld [vmem:[#allocation8 + $0x304] ss:$16 sps:$4 sm:$0xff]   ;;  %v2243_v54 = vadd.f32 %v8091_v58, %v2130_v46 }
 0x24c   : > { %v2335_v10 = vpop.f32.mrf.mxu0  ;;  %3963 = vmatprep.subr.bf16.mxu1 %v6699_v25  ;;  %4052 = vmatprep.subr.bf16.mxu0 %v6700_v2  ;;  %v2142_v53 = vadd.f32 %v8117_v28, %v7726_v5  ;;  %v2542_v25 = vmax.f32 %v2245_v62, 0.0  ;;  %v6705_v46 = vld [vmem:[#allocation8 + $0x300] ss:$16 sps:$4 sm:$0xff]   ;;  %v6706_v28 = vld [vmem:[#allocation8 + $0x88] ss:$16 sps:$4 sm:$0xff]  }
 0x24d   : > { %v8250_v9 = vpop.f32.mrf.mxu1  ;;  %v2445_v51 = vadd.f32 %v2444_v59, %v2332_v57  ;;  %3716 = vmatmul.mubr.bf16.gmra.mxu1 %v8042_v19  ;;  %3865 = vmatmul.mubr.bf16.gmra.mxu0 %v8237_v3  ;;  %v8263_v59 = vpack.c.bf16 %v2537_v20, %v2533_v41  ;;  %v2523_v38 = vmax.f32 %v2443_v16, 0.0  ;;  %v2336_v15 = vadd.f32 %v2335_v10, %v7833_v26 }
 0x24e   : > { %3874 = vmatprep.mubr.bf16.mxu0 %v8252_v14  ;;  %v2337_v61 = vpop.f32.mrf.mxu0 }
 0x24f   : > { %v2450_v42 = vpop.f32.mrf.mxu1  ;;  %v2524_v60 = vmax.f32 %v2445_v51, 0.0  ;;  %3964 = vmatpush2.bf16.msra.mxu1 %v6701_v49  ;;  %4053 = vmatpush1.bf16.msra.mxu0 %v6702_v30  ;;  %v2338_v19 = vadd.f32 %v2337_v61, %v7827_v37  ;;  %v8277_v51 = vadd.f32 %v8127_v39, %v2146_v55  ;;  %v2545_v61 = vmax.f32 %v2247_v6, 0.0  ;;  %v6708_v49 = vld [vmem:[#allocation8 + $0x2ec] ss:$16 sps:$4 sm:$0xff]  }
 0x250   : > { %v2339_v1 = vpop.f32.mrf.mxu0  ;;  %3965 = vmatprep.subr.bf16.mxu1 %v6703_v45  ;;  %4054 = vmatprep.subr.bf16.mxu0 %v6704_v44  ;;  %v8280_v62 = vpack.c.bf16 %v2523_v38, %v2519_v22  ;;  %v8285_v39 = vpack.c.bf16 %v2546_v0, %v2542_v25  ;;  %v2144_v55 = vadd.f32 %v8121_v63, %v7751_v40  ;;  %v2541_v30 = vmax.f32 %v2243_v54, 0.0  ;;  %v6710_v63 = vld [vmem:[#allocation8 + $0x2e8] ss:$16 sps:$4 sm:$0xff]   ;;  %v9243_v54 = vld [vmem:[#allocation20_spill] sm:$0xff] }
 0x251   : > { %v2452_v21 = vpop.f32.mrf.mxu1  ;;  %v2340_v57 = vadd.f32 %v2339_v1, %v7833_v26  ;;  %v8271_v20 = vpack.c.bf16 %v2524_v60, %v2520_v35  ;;  %v2451_v58 = vadd.f32 %v2450_v42, %v2338_v19  ;;  %v2255_v42 = vadd.f32 %v8119_v47, %v2142_v53 }
 0x252   : > { %v2341_v16 = vpop.f32.mrf.mxu0  ;;  %v2449_v19 = vadd.f32 %v8250_v9, %v2336_v15  ;;  %v2554_v38 = vmax.f32 %v8277_v51, 0.0  ;;  %v8296_v44 = vpack.c.bf16 %v2545_v61, %v2541_v30  ;;  %v8299_v9 = vadd.f32 %v9243_v54, %v2140_v4  ;;  %v6711_v15 = vld [vmem:[#allocation8 + $0x4c] ss:$16 sps:$4 sm:$0xff]  }
 0x253   : > { %v2454_v2 = vpop.f32.mrf.mxu1  ;;  %3966 = vmatpush2.bf16.msra.mxu1 %v6705_v46  ;;  %4055 = vmatpush1.bf16.msra.mxu0 %v6706_v28  ;;  %v2342_v41 = vadd.f32 %v2341_v16, %v7827_v37  ;;  %v2453_v35 = vadd.f32 %v2452_v21, %v2340_v57  ;;  %v2528_v47 = vmax.f32 %v2451_v58, 0.0  ;;  %v6709_v21 = vld [vmem:[#allocation8 + $0x68] ss:$16 sps:$4 sm:$0xff]   ;;  %v2156_v53 = vadd.f32 %v8149_v52, %v7726_v5  ;;  %v6712_v16 = vld [vmem:[#allocation8 + $0x2cc] ss:$16 sps:$4 sm:$0xff]   ;;  %v9244_v28 = vld [vmem:[#allocation18_spill] sm:$0xff] }
 0x254   : > { %3967 = vmatprep.mubr.bf16.mxu1 %v8271_v20  ;;  %v2345_v56 = vpop.f32.mrf.mxu0  ;;  %4056 = vmatprep.subr.bf16.mxu0 %v6707_v11  ;;  %v2257_v51 = vadd.f32 %v8123_v23, %v2144_v55  ;;  %v2152_v4 = vadd.f32 %v8137_v17, %v7726_v5  ;;  %v2154_v52 = vadd.f32 %v9244_v28, %v7751_v40 }
 0x255   : > { %v8283_v10 = vpop.f32.mrf.mxu1  ;;  %v2455_v60 = vadd.f32 %v2454_v2, %v2342_v41  ;;  %3875 = vmatmul.mubr.bf16.gmra.mxu0 %v8263_v59  ;;  %4161 = vmatprep.subr.bf16.mxu1 %v6708_v49  ;;  %v2531_v57 = vmax.f32 %v2453_v35, 0.0  ;;  %v2550_v2 = vmax.f32 %v2255_v42, 0.0  ;;  %v2527_v41 = vmax.f32 %v2449_v19, 0.0  ;;  %v6713_v49 = vld [vmem:[#allocation8 + $0x48] ss:$16 sps:$4 sm:$0xff]  }
 0x256   : > { %3968 = vmatmul.mubr.bf16.vlgmr.msra.gmra.mxu1 %v8280_v62  ;;  %3884 = vmatprep.mubr.bf16.mxu0 %v8285_v39  ;;  %v2347_v6 = vpop.f32.mrf.mxu0  ;;  %v2346_v61 = vadd.f32 %v2345_v56, %v7833_v26  ;;  %v6714_v42 = vld [vmem:[#allocation8 + $0x2c8] ss:$16 sps:$4 sm:$0xff]   ;;  %v8316_v30 = vadd.f32 %v8151_v29, %v2156_v53 }
 0x257   : > { %v2460_v0 = vpop.f32.mrf.mxu1  ;;  %v2532_v1 = vmax.f32 %v2455_v60, 0.0  ;;  %4057 = vmatpush1.bf16.msra.mxu0 %v6709_v21  ;;  %4162 = vmatpush1.bf16.msra.mxu1 %v6710_v63  ;;  %v2348_v45 = vadd.f32 %v2347_v6, %v7827_v37  ;;  %v8313_v55 = vpack.c.bf16 %v2554_v38, %v2550_v2  ;;  %v8318_v17 = vpack.c.bf16 %v2531_v57, %v2527_v41  ;;  %v6716_v21 = vld [vmem:[#allocation8 + $0x2ac] ss:$16 sps:$4 sm:$0xff]   ;;  %v6717_v2 = vld [vmem:[#allocation8 + $0x28] ss:$16 sps:$4 sm:$0xff]  }
 0x258   : > { %v2349_v25 = vpop.f32.mrf.mxu0  ;;  %4058 = vmatprep.subr.bf16.mxu0 %v6711_v15  ;;  %4163 = vmatprep.subr.bf16.mxu1 %v6712_v16  ;;  %v2549_v38 = vmax.f32 %v8299_v9, 0.0  ;;  %v9245_v29 = vld [vmem:[#allocation19_spill] sm:$0xff]  ;;  %v2459_v53 = vadd.f32 %v8283_v10, %v2346_v61  ;;  %v2562_v10 = vmax.f32 %v8316_v30, 0.0 }
 0x259   : > { %v2462_v22 = vpop.f32.mrf.mxu1  ;;  %v2350_v58 = vadd.f32 %v2349_v25, %v7833_v26  ;;  %v8305_v46 = vpack.c.bf16 %v2532_v1, %v2528_v47  ;;  %v2461_v60 = vadd.f32 %v2460_v0, %v2348_v45  ;;  %v6715_v0 = vld [vmem:[#allocation8 + $0x2c] ss:$16 sps:$4 sm:$0xff]   ;;  %v2553_v47 = vmax.f32 %v2257_v51, 0.0  ;;  %v6718_v9 = vld [vmem:[#allocation8 + $0x2a8] ss:$16 sps:$4 sm:$0xff]  }
 0x25a   : > { %v2351_v35 = vpop.f32.mrf.mxu0  ;;  %v2150_v63 = vadd.f32 %v9245_v29, %v7751_v40  ;;  %v9246_v45 = vld [vmem:[#allocation21_spill] sm:$0xff]  ;;  %v2535_v30 = vmax.f32 %v2459_v53, 0.0 }
 0x25b   : > { %v2464_v11 = vpop.f32.mrf.mxu1  ;;  %4059 = vmatpush1.bf16.msra.mxu0 %v6713_v49  ;;  %4164 = vmatpush1.bf16.msra.mxu1 %v6714_v42  ;;  %v2352_v23 = vadd.f32 %v2351_v35, %v7827_v37  ;;  %v2463_v6 = vadd.f32 %v2462_v22, %v2350_v58  ;;  %v2265_v54 = vadd.f32 %v9246_v45, %v2152_v4  ;;  %v2536_v15 = vmax.f32 %v2461_v60, 0.0  ;;  %v9247_v58 = vld [vmem:[#allocation22_spill] sm:$0xff]  ;;  %v6719_v35 = vld [vmem:[#allocation8 + $0xc] ss:$16 sps:$4 sm:$0xff]   ;;  %v6722_v45 = vld [vmem:[#allocation8 + $0x288] ss:$16 sps:$4 sm:$0xff]  }
 0x25c   : > { %3977 = vmatprep.mubr.bf16.mxu1 %v8305_v46  ;;  %v2355_v56 = vpop.f32.mrf.mxu0  ;;  %4060 = vmatprep.subr.bf16.mxu0 %v6715_v0  ;;  %v2166_v22 = vadd.f32 %v8179_v27, %v7726_v5  ;;  %v2267_v4 = vadd.f32 %v9247_v58, %v2154_v52  ;;  %v8336_v27 = vpack.c.bf16 %v2553_v47, %v2549_v38  ;;  %v6721_v38 = vld [vmem:[#allocation8 + $0x8] ss:$16 sps:$4 sm:$0xff]   ;;  %v6723_v53 = vld [vmem:[#allocation8 + $0x1ec] ss:$16 sps:$4 sm:$0xff]  }
 0x25d   : > { %v8321_v19 = vpop.f32.mrf.mxu1  ;;  %v2465_v1 = vadd.f32 %v2464_v11, %v2352_v23  ;;  %3885 = vmatmul.mubr.bf16.gmra.mxu0 %v8296_v44  ;;  %4165 = vmatprep.subr.bf16.mxu1 %v6716_v21  ;;  %v2539_v28 = vmax.f32 %v2463_v6, 0.0  ;;  %v6720_v11 = vld [vmem:[#allocation8 + $0x28c] ss:$16 sps:$4 sm:$0xff]   ;;  %v2162_v60 = vadd.f32 %v8163_v24, %v7726_v5  ;;  %v2558_v0 = vmax.f32 %v2265_v54, 0.0 }
 0x25e   : > { %3978 = vmatmul.mubr.bf16.gmra.mxu1 %v8318_v17  ;;  %3894 = vmatprep.mubr.bf16.mxu0 %v8313_v55  ;;  %v2357_v57 = vpop.f32.mrf.mxu0  ;;  %v9248_v23 = vld [vmem:[#allocation17_spill] sm:$0xff]  ;;  %v2356_v6 = vadd.f32 %v2355_v56, %v7833_v26  ;;  %v8346_v29 = vadd.f32 %v8181_v36, %v2166_v22 }
 0x25f   : > { %v2470_v25 = vpop.f32.mrf.mxu1  ;;  %v2540_v16 = vmax.f32 %v2465_v1, 0.0  ;;  %4061 = vmatpush1.bf16.msra.mxu0 %v6717_v2  ;;  %4166 = vmatpush1.bf16.msra.mxu1 %v6718_v9  ;;  %v2358_v51 = vadd.f32 %v2357_v57, %v7827_v37  ;;  %v2263_v52 = vadd.f32 %v9248_v23, %v2150_v63  ;;  %v2561_v57 = vmax.f32 %v2267_v4, 0.0  ;;  %v6724_v2 = vld [vmem:[#allocation8 + $0x26c] ss:$16 sps:$4 sm:$0xff]  }
 0x260   : > { %v2359_v41 = vpop.f32.mrf.mxu0  ;;  %4062 = vmatprep.subr.bf16.mxu0 %v6719_v35  ;;  %4167 = vmatprep.subr.bf16.mxu1 %v6720_v11  ;;  %v8354_v36 = vpack.c.bf16 %v2562_v10, %v2558_v0  ;;  %v2275_v22 = vadd.f32 %v8165_v33, %v2162_v60  ;;  %v2469_v4 = vadd.f32 %v8321_v19, %v2356_v6  ;;  %v6726_v35 = vld [vmem:[#allocation8 + $0x268] ss:$16 sps:$4 sm:$0xff]   ;;  %v6727_v0 = vld [vmem:[#allocation8 + $0x1cc] ss:$16 sps:$4 sm:$0xff]  }
 0x261   : > { %v2472_v61 = vpop.f32.mrf.mxu1  ;;  %v2360_v49 = vadd.f32 %v2359_v41, %v7833_v26  ;;  %v8341_v42 = vpack.c.bf16 %v2540_v16, %v2536_v15  ;;  %v2471_v47 = vadd.f32 %v2470_v25, %v2358_v51  ;;  %v8349_v15 = vpack.c.bf16 %v2539_v28, %v2535_v30  ;;  %v9249_v51 = vld [vmem:[#allocation24_spill] sm:$0xff]  ;;  %v6728_v30 = vld [vmem:[#allocation8 + $0x24c] ss:$16 sps:$4 sm:$0xff]  }
 0x262   : > { %v2361_v1 = vpop.f32.mrf.mxu0  ;;  %v2160_v25 = vadd.f32 %v8154_v34, %v7751_v40  ;;  %v2557_v9 = vmax.f32 %v2263_v52, 0.0  ;;  %v2164_v58 = vadd.f32 %v9249_v51, %v7751_v40  ;;  %v2570_v34 = vmax.f32 %v8346_v29, 0.0  ;;  %v9250_v6 = vld [vmem:[#allocation23_spill] sm:$0xff] }
 0x263   : > { %v2474_v21 = vpop.f32.mrf.mxu1  ;;  %4063 = vmatpush1.bf16.msra.mxu0 %v6721_v38  ;;  %4168 = vmatpush1.bf16.msra.mxu1 %v6722_v45  ;;  %v2362_v24 = vadd.f32 %v2361_v1, %v7827_v37  ;;  %v2473_v63 = vadd.f32 %v2472_v61, %v2360_v49  ;;  %v2544_v33 = vmax.f32 %v2471_v47, 0.0  ;;  %v6725_v61 = vld [vmem:[#allocation8 + $0x1e8] ss:$16 sps:$4 sm:$0xff]   ;;  %v2176_v19 = vadd.f32 %v8214_v13, %v7726_v5  ;;  %v9251_v38 = vld [vmem:[#allocation26_spill] sm:$0xff] }
 0x264   : > { %3987 = vmatprep.mubr.bf16.mxu1 %v8341_v42  ;;  %v2365_v54 = vpop.f32.mrf.mxu0  ;;  %4064 = vmatprep.subr.bf16.mxu0 %v6723_v53  ;;  %v8367_v60 = vpack.c.bf16 %v2561_v57, %v2557_v9  ;;  %v2273_v1 = vadd.f32 %v9250_v6, %v2160_v25  ;;  %v2277_v45 = vadd.f32 %v9251_v38, %v2164_v58  ;;  %v2543_v13 = vmax.f32 %v2469_v4, 0.0  ;;  %v6730_v9 = vld [vmem:[#allocation8 + $0x248] ss:$16 sps:$4 sm:$0xff]  }
 0x265   : > { %v8352_v56 = vpop.f32.mrf.mxu1  ;;  %v2475_v16 = vadd.f32 %v2474_v21, %v2362_v24  ;;  %3895 = vmatmul.mubr.bf16.gmra.mxu0 %v8336_v27  ;;  %4169 = vmatprep.subr.bf16.mxu1 %v6724_v2  ;;  %v2547_v49 = vmax.f32 %v2473_v63, 0.0  ;;  %v2566_v21 = vmax.f32 %v2275_v22, 0.0  ;;  %v2172_v24 = vadd.f32 %v8199_v18, %v7726_v5  ;;  %v6729_v2 = vld [vmem:[#allocation8 + $0x1c8] ss:$16 sps:$4 sm:$0xff]  }
 0x266   : > { %3988 = vmatmul.mubr.bf16.gmra.mxu1 %v8349_v15  ;;  %3904 = vmatprep.mubr.bf16.mxu0 %v8354_v36  ;;  %v2367_v10 = vpop.f32.mrf.mxu0  ;;  %v2366_v57 = vadd.f32 %v2365_v54, %v7833_v26  ;;  %v2289_v51 = vadd.f32 %v8216_v31, %v2176_v19  ;;  %v6731_v54 = vld [vmem:[#allocation8 + $0x1ac] ss:$16 sps:$4 sm:$0xff]  }
 0x267   : > { %v2480_v28 = vpop.f32.mrf.mxu1  ;;  %v2548_v41 = vmax.f32 %v2475_v16, 0.0  ;;  %4065 = vmatpush2.bf16.msra.mxu0 %v6725_v61  ;;  %4170 = vmatpush1.bf16.msra.mxu1 %v6726_v35  ;;  %v2368_v11 = vadd.f32 %v2367_v10, %v7827_v37  ;;  %v8380_v22 = vpack.c.bf16 %v2570_v34, %v2566_v21  ;;  %v8383_v58 = vpack.c.bf16 %v2547_v49, %v2543_v13  ;;  %v6733_v49 = vld [vmem:[#allocation8 + $0x1a8] ss:$16 sps:$4 sm:$0xff]   ;;  %v6735_v21 = vld [vmem:[#allocation8 + $0x18c] ss:$16 sps:$4 sm:$0xff]  }
 0x268   : > { %v2369_v23 = vpop.f32.mrf.mxu0  ;;  %4066 = vmatprep.subr.bf16.mxu0 %v6727_v0  ;;  %4171 = vmatprep.subr.bf16.mxu1 %v6728_v30  ;;  %v2285_v34 = vadd.f32 %v8201_v12, %v2172_v24  ;;  %v2174_v35 = vadd.f32 %v8207_v32, %v7751_v40  ;;  %v2565_v12 = vmax.f32 %v2273_v1, 0.0  ;;  %v2578_v0 = vmax.f32 %v2289_v51, 0.0 }
 0x269   : > { %v2482_v52 = vpop.f32.mrf.mxu1  ;;  %v2370_v29 = vadd.f32 %v2369_v23, %v7833_v26  ;;  %v8373_v47 = vpack.c.bf16 %v2548_v41, %v2544_v33  ;;  %v2481_v16 = vadd.f32 %v2480_v28, %v2368_v11  ;;  %v6732_v28 = vld [vmem:[#allocation8 + $0x22c] ss:$16 sps:$4 sm:$0xff]   ;;  %v2569_v33 = vmax.f32 %v2277_v45, 0.0  ;;  %v6734_v23 = vld [vmem:[#allocation8 + $0x228] ss:$16 sps:$4 sm:$0xff]  }
 0x26a   : > { %v2371_v63 = vpop.f32.mrf.mxu0  ;;  %v2479_v41 = vadd.f32 %v8352_v56, %v2366_v57  ;;  %v2170_v32 = vadd.f32 %v8187_v48, %v7751_v40  ;;  %v2574_v13 = vmax.f32 %v2285_v34, 0.0 }
 0x26b   : > { %v2484_v53 = vpop.f32.mrf.mxu1  ;;  %4067 = vmatpush2.bf16.msra.mxu0 %v6729_v2  ;;  %4172 = vmatpush1.bf16.msra.mxu1 %v6730_v9  ;;  %v2372_v25 = vadd.f32 %v2371_v63, %v7827_v37  ;;  %v2483_v10 = vadd.f32 %v2482_v52, %v2370_v29  ;;  %v2552_v11 = vmax.f32 %v2481_v16, 0.0  ;;  %v6736_v29 = vld [vmem:[#allocation8 + $0x20c] ss:$16 sps:$4 sm:$0xff]   ;;  %v8399_v24 = vpack.c.bf16 %v2569_v33, %v2565_v12  ;;  %v6737_v9 = vld [vmem:[#allocation8 + $0x188] ss:$16 sps:$4 sm:$0xff]  }
 0x26c   : > { %3997 = vmatprep.mubr.bf16.mxu1 %v8373_v47  ;;  %v2375_v5 = vpop.f32.mrf.mxu0  ;;  %4068 = vmatprep.subr.bf16.mxu0 %v6731_v54  ;;  %v2551_v57 = vmax.f32 %v2479_v41, 0.0  ;;  %v2287_v16 = vadd.f32 %v8209_v7, %v2174_v35  ;;  %v2283_v7 = vadd.f32 %v8189_v43, %v2170_v32  ;;  %v6740_v33 = vld [vmem:[#allocation8 + $0x3ec] ss:$16 sps:$4 sm:$0xff]  }
 0x26d   : > { %v2488_v18 = vpop.f32.mrf.mxu1  ;;  %v2485_v4 = vadd.f32 %v2484_v53, %v2372_v25  ;;  %3905 = vmatmul.mubr.bf16.gmra.mxu0 %v8367_v60  ;;  %4173 = vmatprep.subr.bf16.mxu1 %v6732_v28  ;;  %v2555_v56 = vmax.f32 %v2483_v10, 0.0  ;;  %v2376_v1 = vadd.f32 %v2375_v5, %v7833_v26  ;;  %v6738_v25 = vld [vmem:[#allocation8 + $0x208] ss:$16 sps:$4 sm:$0xff]   ;;  %v8407_v5 = vpack.c.bf16 %v2578_v0, %v2574_v13  ;;  %v6743_v0 = vld [vmem:[#allocation8 + $0x14c] ss:$16 sps:$4 sm:$0xff]  }
 0x26e   : > { %3998 = vmatmul.mubr.bf16.gmra.mxu1 %v8383_v58  ;;  %3914 = vmatprep.mubr.bf16.mxu0 %v8380_v22  ;;  %v2377_v31 = vpop.f32.mrf.mxu0 }
 0x26f   : > { %v2490_v61 = vpop.f32.mrf.mxu1  ;;  %v2556_v19 = vmax.f32 %v2485_v4, 0.0  ;;  %4069 = vmatpush2.bf16.msra.mxu0 %v6733_v49  ;;  %4174 = vmatpush1.bf16.msra.mxu1 %v6734_v23  ;;  %v2378_v52 = vadd.f32 %v2377_v31, %v7827_v37  ;;  %v8404_v48 = vpack.c.bf16 %v2555_v56, %v2551_v57  ;;  %v6739_v4 = vld [vmem:[#allocation8 + $0x16c] ss:$16 sps:$4 sm:$0xff]   ;;  %v2489_v34 = vadd.f32 %v2488_v18, %v2376_v1  ;;  %v6742_v49 = vld [vmem:[#allocation8 + $0x3e8] ss:$16 sps:$4 sm:$0xff]  }
 0x270   : > { %v2379_v30 = vpop.f32.mrf.mxu0  ;;  %4070 = vmatprep.subr.bf16.mxu0 %v6735_v21  ;;  %4175 = vmatprep.subr.bf16.mxu1 %v6736_v29  ;;  %v6744_v18 = vld [vmem:[#allocation8 + $0x3cc] ss:$16 sps:$4 sm:$0xff]   ;;  %v2573_v56 = vmax.f32 %v2283_v7, 0.0  ;;  %v6745_v1 = vld [vmem:[#allocation8 + $0x148] ss:$16 sps:$4 sm:$0xff]  }
 0x271   : > { %v2492_v6 = vpop.f32.mrf.mxu1  ;;  %v2380_v38 = vadd.f32 %v2379_v30, %v7833_v26  ;;  %v8397_v45 = vpack.c.bf16 %v2556_v19, %v2552_v11  ;;  %v2491_v2 = vadd.f32 %v2490_v61, %v2378_v52  ;;  %v2577_v61 = vmax.f32 %v2287_v16, 0.0  ;;  %v6741_v19 = vld [vmem:[#allocation8 + $0x168] ss:$16 sps:$4 sm:$0xff]  }
 0x272   : > { %v2381_v63 = vpop.f32.mrf.mxu0  ;;  %v2559_v21 = vmax.f32 %v2489_v34, 0.0  ;;  %v9252_v7 = vld [vmem:[#allocation25_spill] sm:$0xff] }
 0x273   : > { %v2494_v53 = vpop.f32.mrf.mxu1  ;;  %4071 = vmatpush2.bf16.msra.mxu0 %v6737_v9  ;;  %4176 = vmatpush1.bf16.msra.mxu1 %v6738_v25  ;;  %v2382_v40 = vadd.f32 %v2381_v63, %v7827_v37  ;;  %v2493_v51 = vadd.f32 %v2492_v6, %v2380_v38  ;;  %v2560_v35 = vmax.f32 %v2491_v2, 0.0  ;;  %v8418_v13 = vpack.c.bf16 %v2577_v61, %v2573_v56  ;;  %v6746_v63 = vld [vmem:[#allocation8 + $0x3c8] ss:$16 sps:$4 sm:$0xff]  }
 0x274   : > { %4007 = vmatprep.mubr.bf16.mxu1 %v8397_v45  ;;  %v2385_v10 = vpop.f32.mrf.mxu0  ;;  %4072 = vmatprep.subr.bf16.mxu0 %v6739_v4  ;;  %v6750_v61 = vld [vmem:[#allocation8 + $0x3a8] ss:$16 sps:$4 sm:$0xff]  }
 0x275   : > { %v2498_v54 = vpop.f32.mrf.mxu1  ;;  %v2495_v28 = vadd.f32 %v2494_v53, %v2382_v40  ;;  %3915 = vmatmul.mubr.bf16.gmra.mxu0 %v8399_v24  ;;  %4177 = vmatprep.subr.bf16.mxu1 %v6740_v33  ;;  %v2563_v23 = vmax.f32 %v2493_v51, 0.0  ;;  %v2386_v29 = vadd.f32 %v2385_v10, %v7833_v26  ;;  %v6747_v40 = vld [vmem:[#allocation8 + $0x12c] ss:$16 sps:$4 sm:$0xff]  }
 0x276   : > { %4008 = vmatmul.mubr.bf16.gmra.mxu1 %v8404_v48  ;;  %3924 = vmatprep.mubr.bf16.mxu0 %v8407_v5  ;;  %v2387_v41 = vpop.f32.mrf.mxu0  ;;  %v6748_v10 = vld [vmem:[#allocation8 + $0x3ac] ss:$16 sps:$4 sm:$0xff]  }
 0x277   : > { %v2500_v31 = vpop.f32.mrf.mxu1  ;;  %v2564_v11 = vmax.f32 %v2495_v28, 0.0  ;;  %4073 = vmatpush2.bf16.msra.mxu0 %v6741_v19  ;;  %4178 = vmatpush2.bf16.msra.mxu1 %v6742_v49  ;;  %v2388_v43 = vadd.f32 %v2387_v41, %v7827_v37  ;;  %v8421_v16 = vpack.c.bf16 %v2563_v23, %v2559_v21  ;;  %v2499_v4 = vadd.f32 %v2498_v54, %v2386_v29  ;;  %v6752_v54 = vld [vmem:[#allocation8 + $0x38c] ss:$16 sps:$4 sm:$0xff]   ;;  %v6753_v21 = vld [vmem:[#allocation8 + $0x108] ss:$16 sps:$4 sm:$0xff]  }
 0x278   : > { %v2389_v52 = vpop.f32.mrf.mxu0  ;;  %4074 = vmatprep.subr.bf16.mxu0 %v6743_v0  ;;  %4179 = vmatprep.subr.bf16.mxu1 %v6744_v18  ;;  %v6754_v29 = vld [vmem:[#allocation8 + $0x388] ss:$16 sps:$4 sm:$0xff]  }
 0x279   : > { %v2502_v12 = vpop.f32.mrf.mxu1  ;;  %v2390_v30 = vadd.f32 %v2389_v52, %v7833_v26  ;;  %v8415_v6 = vpack.c.bf16 %v2564_v11, %v2560_v35  ;;  %v2501_v57 = vadd.f32 %v2500_v31, %v2388_v43  ;;  %v6749_v31 = vld [vmem:[#allocation8 + $0x128] ss:$16 sps:$4 sm:$0xff]   ;;  %v6751_v43 = vld [vmem:[#allocation8 + $0x10c] ss:$16 sps:$4 sm:$0xff]   ;;  %v2567_v0 = vmax.f32 %v2499_v4, 0.0 }
 0x27a   : > { %v2391_v32 = vpop.f32.mrf.mxu0  ;;  %v6756_v4 = vld [vmem:[#allocation8 + $0x368] ss:$16 sps:$4 sm:$0xff]  }
 0x27b   : > { %v2504_v38 = vpop.f32.mrf.mxu1  ;;  %4075 = vmatpush2.bf16.msra.mxu0 %v6745_v1  ;;  %4180 = vmatpush2.bf16.msra.mxu1 %v6746_v63  ;;  %v2392_v53 = vadd.f32 %v2391_v32, %v7827_v37  ;;  %v2503_v2 = vadd.f32 %v2502_v12, %v2390_v30  ;;  %v2568_v34 = vmax.f32 %v2501_v57, 0.0  ;;  %v8431_v12 = vld [vmem:[#allocation10 + $0x78] sm:$0xff]  }
 0x27c   : > { %4017 = vmatprep.mubr.bf16.mxu1 %v8415_v6  ;;  %v2395_v9 = vpop.f32.mrf.mxu0  ;;  %4076 = vmatprep.subr.bf16.mxu0 %v6747_v40 }
 0x27d   : > { %v2508_v25 = vpop.f32.mrf.mxu1  ;;  %v2505_v51 = vadd.f32 %v2504_v38, %v2392_v53  ;;  %3925 = vmatmul.mubr.bf16.gmra.mxu0 %v8418_v13  ;;  %4181 = vmatprep.subr.bf16.mxu1 %v6748_v10  ;;  %v2571_v11 = vmax.f32 %v2503_v2, 0.0  ;;  %v2396_v18 = vadd.f32 %v2395_v9, %v7833_v26  ;;  %v6755_v53 = vld [vmem:[#allocation8 + $0x36c] ss:$16 sps:$4 sm:$0xff]   ;;  %v8443_v9 = vld [vmem:[#allocation10 + $0x70] sm:$0xff]  }
 0x27e   : > { %4018 = vmatmul.mubr.bf16.gmra.mxu1 %v8421_v16  ;;  %4080 = vmatprep.mubr.bf16.mxu0 %v9252_v7  ;;  %v2397_v28 = vpop.f32.mrf.mxu0  ;;  %v8440_v2 = vld [vmem:[#allocation10 + $0x38] sm:$0xff]  }
 0x27f   : > { %v2510_v33 = vpop.f32.mrf.mxu1  ;;  %v2572_v41 = vmax.f32 %v2505_v51, 0.0  ;;  %4077 = vmatpush2.bf16.msra.mxu0 %v6749_v31  ;;  %4182 = vmatpush2.bf16.msra.mxu1 %v6750_v61  ;;  %v2398_v35 = vadd.f32 %v2397_v28, %v7827_v37  ;;  %v8435_v38 = vpack.c.bf16 %v2571_v11, %v2567_v0  ;;  %v2509_v40 = vadd.f32 %v2508_v25, %v2396_v18  ;;  %v8453_v25 = vld [vmem:[#allocation10 + $0x30] sm:$0xff]   ;;  %v6759_v11 = vld [vmem:[#allocation8 + $0x32c] ss:$16 sps:$4 sm:$0xff]  }
 0x280   : > { %v2399_v19 = vpop.f32.mrf.mxu0  ;;  %4078 = vmatprep.subr.bf16.mxu0 %v6751_v43  ;;  %4183 = vmatprep.subr.bf16.mxu1 %v6752_v54  ;;  %v8475_v43 = vld [vmem:[#allocation10 + $0x60] sm:$0xff]   ;;  %v6760_v54 = vld [vmem:[#allocation8 + $0x328] ss:$16 sps:$4 sm:$0xff]   ;;  %v6761_v0 = vld [vmem:[#allocation8 + $0x30c] ss:$16 sps:$4 sm:$0xff]  }
 0x281   : > { %v2512_v49 = vpop.f32.mrf.mxu1  ;;  %v2400_v23 = vadd.f32 %v2399_v19, %v7833_v26  ;;  %v8429_v52 = vpack.c.bf16 %v2572_v41, %v2568_v34  ;;  %v2511_v30 = vadd.f32 %v2510_v33, %v2398_v35  ;;  %v6757_v33 = vld [vmem:[#allocation8 + $0x34c] ss:$16 sps:$4 sm:$0xff]   ;;  %v2575_v41 = vmax.f32 %v2509_v40, 0.0 }
 0x282   : > { %v2401_v56 = vpop.f32.mrf.mxu0  ;;  %v8469_v19 = vld [vmem:[#allocation10 + $0x28] sm:$0xff]   ;;  %v8481_v18 = vld [vmem:[#allocation10 + $0xf8] sm:$0xff]  }
 0x283   : > { %4079 = vmatpush2.bf16.msra.mxu0 %v6753_v21  ;;  %4184 = vmatpush2.bf16.msra.mxu1 %v6754_v29  ;;  %v2402_v32 = vadd.f32 %v2401_v56, %v7827_v37  ;;  %v2513_v57 = vadd.f32 %v2512_v49, %v2400_v23  ;;  %v2514_v1 = vpop.f32.mrf.mxu1  ;;  %v2576_v51 = vmax.f32 %v2511_v30, 0.0  ;;  %v8484_v56 = vld [vmem:[#allocation10 + $0x20] sm:$0xff]   ;;  %v6762_v30 = vld [vmem:[#allocation8 + $0x308] ss:$16 sps:$4 sm:$0xff]  }
 0x284   : > { %4027 = vmatprep.mubr.bf16.mxu1 %v8429_v52  ;;  %v8438_v63 = vpop.f32.mrf.mxu0  ;;  %4185 = vmatprep.subr.bf16.mxu1 %v6755_v53  ;;  %v8496_v29 = vld [vmem:[#allocation10 + $0xb8] sm:$0xff]  }
 0x285   : > { %v2515_v26 = vadd.f32 %v2514_v1, %v2402_v32  ;;  %5763 = vmatprep.subr.bf16.mxu0 %v8431_v12  ;;  %v2579_v7 = vmax.f32 %v2513_v57, 0.0  ;;  %9253 = vst [vmem:[#allocation27_spill] sm:$0xff] %v8496_v29  ;;  %v8499_v32 = vld [vmem:[#allocation10 + $0x18] sm:$0xff]   ;;  %v8501_v57 = vld [vmem:[#allocation10 + $0xf0] sm:$0xff]  }
 0x286   : > { %4028 = vmatmul.mubr.bf16.gmra.mxu1 %v8435_v38  ;;  %4081 = vmatmul.mubr.bf16.vlgmr.msra.gmra.mxu0 %v8218_v8  ;;  %v8447_v37 = vpop.f32.mrf.mxu0  ;;  %v8458_v8 = vld [vmem:[#allocation10 + $0x68] sm:$0xff]   ;;  %9254 = vst [vmem:[#allocation28_spill] sm:$0xff] %v8499_v32  ;;  %9255 = vst [vmem:[#allocation20_spill] sm:$0xff] %v8501_v57 }
 0x287   : > { %v2580_v10 = vmax.f32 %v2515_v26, 0.0  ;;  %4090 = vmatprep.mubr.bf16.mxu0 %v8224_v50  ;;  %4186 = vmatpush2.bf16.msra.mxu1 %v6756_v4  ;;  %v6758_v50 = vld [vmem:[#allocation8 + $0x348] ss:$16 sps:$4 sm:$0xff]   ;;  %v8463_v61 = vpack.c.bf16 %v2579_v7, %v2575_v41  ;;  %v8509_v26 = vld [vmem:[#allocation10 + $0x50] sm:$0xff]  }
 0x288   : > { %v8450_v28 = vpop.f32.mrf.mxu0  ;;  %4187 = vmatprep.subr.bf16.mxu1 %v6757_v33  ;;  %5764 = vmatpush3.bf16.msra.mxu0 %v8440_v2  ;;  %9256 = vst [vmem:[#allocation18_spill] sm:$0xff] %v8509_v26  ;;  %v8536_v33 = vld [vmem:[#allocation10 + $0x48] sm:$0xff]  }
 0x289   : > { %v8455_v34 = vpack.c.bf16 %v2580_v10, %v2576_v51  ;;  %5765 = vmatprep.subr.bf16.mxu0 %v8443_v9  ;;  %v8525_v10 = vld [vmem:[#allocation10 + $0xe8] sm:$0xff]   ;;  %9260 = vst [vmem:[#allocation17_spill] sm:$0xff] %v8536_v33 }
 0x28a   : > { %v8460_v31 = vpop.f32.mrf.mxu0  ;;  %9259 = vst [vmem:[#allocation22_spill] sm:$0xff] %v8525_v10  ;;  %v8539_v41 = vld [vmem:[#allocation10 + $0xa8] sm:$0xff]  }
 0x28b   : > { %4188 = vmatpush2.bf16.msra.mxu1 %v6758_v50  ;;  %4037 = vmatprep.mubr.bf16.mxu1 %v8455_v34  ;;  %9261 = vst [vmem:[#allocation24_spill] sm:$0xff] %v8539_v41  ;;  %v8542_v50 = vld [vmem:[#allocation10 + $0x8] sm:$0xff]  }
 0x28c   : > { %v8465_v35 = vpop.f32.mrf.mxu0  ;;  %4189 = vmatprep.subr.bf16.mxu1 %v6759_v11  ;;  %5766 = vmatpush3.bf16.msra.mxu0 %v8453_v25  ;;  %9262 = vst [vmem:[#allocation23_spill] sm:$0xff] %v8542_v50  ;;  %v8545_v11 = vld [vmem:[#allocation10 + $0xe0] sm:$0xff]  }
 0x28d   : > { %5767 = vmatprep.subr.bf16.mxu0 %v8458_v8  ;;  %9263 = vst [vmem:[#allocation26_spill] sm:$0xff] %v8545_v11 }
 0x28e   : > { %4038 = vmatmul.mubr.bf16.gmra.mxu1 %v8463_v61  ;;  %4091 = vmatmul.mubr.bf16.gmra.mxu0 %v8237_v3  ;;  %v8473_v49 = vpop.f32.mrf.mxu0 }
 0x28f   : > { %4100 = vmatprep.mubr.bf16.mxu0 %v8252_v14  ;;  %4190 = vmatpush2.bf16.msra.mxu1 %v6760_v54 }
 0x290   : > { %4193 = vmatprep.mubr.bf16.mxu1 %v8271_v20  ;;  %v8479_v23 = vpop.f32.mrf.mxu0  ;;  %4191 = vmatprep.subr.bf16.mxu1 %v6761_v0  ;;  %v8493_v20 = vld [vmem:[#allocation10 + $0x58] sm:$0xff]  }
 0x291   : > { %5768 = vmatpush3.bf16.msra.mxu0 %v8469_v19 }
 0x292   : > { %v8486_v3 = vpop.f32.mrf.mxu0  ;;  %5769 = vmatprep.subr.bf16.mxu0 %v8475_v43 }
 0x293   : > { %4192 = vmatpush2.bf16.msra.mxu1 %v6762_v30  ;;  %v8553_v30 = vld [vmem:[#allocation10 + $0x40] sm:$0xff]  }
 0x294   : > { %v8489_v14 = vpop.f32.mrf.mxu0  ;;  %v8491_v21 = vpop.f32.mrf.mxu1  ;;  %5827 = vmatprep.subr.bf16.mxu1 %v8481_v18  ;;  %9264 = vst [vmem:[#allocation25_spill] sm:$0xff] %v8553_v30 }
 0x295   : > { %5770 = vmatpush3.bf16.msra.mxu0 %v8484_v56 }
 0x296   : > { %4101 = vmatmul.mubr.bf16.gmra.mxu0 %v8263_v59  ;;  %4194 = vmatmul.mubr.bf16.vlgmr.msra.gmra.mxu1 %v8280_v62  ;;  %v8505_v1 = vpop.f32.mrf.mxu0  ;;  %v8507_v53 = vpop.f32.mrf.mxu1  ;;  %v8519_v59 = vld [vmem:[#allocation10 + $0xb0] sm:$0xff]  }
 0x297   : > { %4110 = vmatprep.mubr.bf16.mxu0 %v8285_v39  ;;  %4203 = vmatprep.mubr.bf16.mxu1 %v8305_v46  ;;  %9257 = vst [vmem:[#allocation19_spill] sm:$0xff] %v8519_v59  ;;  %v8522_v62 = vld [vmem:[#allocation10 + $0x10] sm:$0xff]  }
 0x298   : > { %v8513_v40 = vpop.f32.mrf.mxu0  ;;  %v8515_v51 = vpop.f32.mrf.mxu1  ;;  %5771 = vmatprep.subr.bf16.mxu0 %v8493_v20  ;;  %5828 = vmatpush3.bf16.msra.mxu1 %v8496_v29  ;;  %9258 = vst [vmem:[#allocation21_spill] sm:$0xff] %v8522_v62 }
 0x299   : > { %5772 = vmatpush3.bf16.msra.mxu0 %v8499_v32  ;;  %5829 = vmatprep.subr.bf16.mxu1 %v8501_v57 }
 0x29a   : > { %v8527_v39 = vpop.f32.mrf.mxu0  ;;  %v8529_v46 = vpop.f32.mrf.mxu1  ;;  %5773 = vmatprep.subr.bf16.mxu0 %v8509_v26 }
 0x29c   : > { %v8532_v4 = vpop.f32.mrf.mxu0  ;;  %v8534_v7 = vpop.f32.mrf.mxu1  ;;  %5830 = vmatpush3.bf16.msra.mxu1 %v8519_v59 }
 0x29d   : > { %5774 = vmatpush3.bf16.msra.mxu0 %v8522_v62  ;;  %5831 = vmatprep.subr.bf16.mxu1 %v8525_v10  ;;  %v8569_v10 = vld [vmem:[#allocation10 + $0xd8] sm:$0xff]  }
 0x29e   : > { %4111 = vmatmul.mubr.bf16.gmra.mxu0 %v8296_v44  ;;  %4204 = vmatmul.mubr.bf16.gmra.mxu1 %v8318_v17  ;;  %v8549_v54 = vpop.f32.mrf.mxu0  ;;  %v8551_v0 = vpop.f32.mrf.mxu1  ;;  %v8563_v44 = vld [vmem:[#allocation10 + $0xa0] sm:$0xff]   ;;  %9267 = vst [vmem:[#allocation31_spill] sm:$0xff] %v8569_v10 }
 0x29f   : > { %4120 = vmatprep.mubr.bf16.mxu0 %v8313_v55  ;;  %4213 = vmatprep.mubr.bf16.mxu1 %v8341_v42  ;;  %9265 = vst [vmem:[#allocation29_spill] sm:$0xff] %v8563_v44  ;;  %v8566_v17 = vld [vmem:[#allocation10] sm:$0xff]  }
 0x2a0   : > { %v8557_v59 = vpop.f32.mrf.mxu0  ;;  %v8559_v57 = vpop.f32.mrf.mxu1  ;;  %5775 = vmatprep.subr.bf16.mxu0 %v8536_v33  ;;  %5832 = vmatpush3.bf16.msra.mxu1 %v8539_v41  ;;  %9266 = vst [vmem:[#allocation30_spill] sm:$0xff] %v8566_v17  ;;  %v8581_v41 = vld [vmem:[#allocation10 + $0x98] sm:$0xff]  }
 0x2a1   : > { %5776 = vmatpush3.bf16.msra.mxu0 %v8542_v50  ;;  %5833 = vmatprep.subr.bf16.mxu1 %v8545_v11  ;;  %9269 = vst [vmem:[#allocation33_spill] sm:$0xff] %v8581_v41  ;;  %v8585_v11 = vld [vmem:[#allocation10 + $0xd0] sm:$0xff]  }
 0x2a2   : > { %v8571_v55 = vpop.f32.mrf.mxu0  ;;  %v8573_v42 = vpop.f32.mrf.mxu1  ;;  %5777 = vmatprep.subr.bf16.mxu0 %v8553_v30  ;;  %9270 = vst [vmem:[#allocation34_spill] sm:$0xff] %v8585_v11 }
 0x2a4   : > { %v8576_v29 = vpop.f32.mrf.mxu0  ;;  %v8578_v33 = vpop.f32.mrf.mxu1  ;;  %5834 = vmatpush3.bf16.msra.mxu1 %v8563_v44 }
 0x2a5   : > { %9268 = vst [vmem:[#allocation32_spill] sm:$0xff] %v8576_v29  ;;  %5778 = vmatpush3.bf16.msra.mxu0 %v8566_v17  ;;  %5835 = vmatprep.subr.bf16.mxu1 %v8569_v10  ;;  %v8600_v10 = vld [vmem:[#allocation10 + $0x90] sm:$0xff]   ;;  %v8615_v29 = vld [vmem:[#allocation10 + $0x88] sm:$0xff]  }
 0x2a6   : > { %4121 = vmatmul.mubr.bf16.gmra.mxu0 %v8336_v27  ;;  %4214 = vmatmul.mubr.bf16.gmra.mxu1 %v8349_v15  ;;  %v8589_v50 = vpop.f32.mrf.mxu0  ;;  %v8591_v30 = vpop.f32.mrf.mxu1  ;;  %9272 = vst [vmem:[#allocation36_spill] sm:$0xff] %v8600_v10  ;;  %v8604_v27 = vld [vmem:[#allocation10 + $0xc8] sm:$0xff]   ;;  %9275 = vst [vmem:[#allocation39_spill] sm:$0xff] %v8615_v29 }
 0x2a7   : > { %4130 = vmatprep.mubr.bf16.mxu0 %v8354_v36  ;;  %4223 = vmatprep.mubr.bf16.mxu1 %v8373_v47  ;;  %9273 = vst [vmem:[#allocation37_spill] sm:$0xff] %v8604_v27 }
 0x2a8   : > { %v8595_v44 = vpop.f32.mrf.mxu0  ;;  %v8597_v62 = vpop.f32.mrf.mxu1  ;;  %5836 = vmatpush3.bf16.msra.mxu1 %v8581_v41  ;;  %5891 = vmatprep.subr.bf16.mxu0 %v8431_v12  ;;  %v8618_v41 = vld [vmem:[#allocation10 + $0xc0] sm:$0xff]  }
 0x2a9   : > { %9271 = vst [vmem:[#allocation35_spill] sm:$0xff] %v8595_v44  ;;  %5837 = vmatprep.subr.bf16.mxu1 %v8585_v11  ;;  %9276 = vst [vmem:[#allocation40_spill] sm:$0xff] %v8618_v41 }
 0x2aa   : > { %v8606_v15 = vpop.f32.mrf.mxu0  ;;  %v8608_v17 = vpop.f32.mrf.mxu1 }
 0x2ac   : > { %v8610_v36 = vpop.f32.mrf.mxu0  ;;  %v8612_v47 = vpop.f32.mrf.mxu1  ;;  %5838 = vmatpush3.bf16.msra.mxu1 %v8600_v10  ;;  %v8631_v10 = vld [vmem:[%s9153_s4] sm:$0xf] }
 0x2ad   : > { %9274 = vst [vmem:[#allocation38_spill] sm:$0xff] %v8610_v36  ;;  %5839 = vmatprep.subr.bf16.mxu1 %v8604_v27 }
 0x2ae   : > { %4131 = vmatmul.mubr.bf16.gmra.mxu0 %v8367_v60  ;;  %4224 = vmatmul.mubr.bf16.gmra.mxu1 %v8383_v58  ;;  %v8622_v12 = vpop.f32.mrf.mxu0  ;;  %v8624_v11 = vpop.f32.mrf.mxu1  ;;  %v8638_v60 = vld [vmem:[#allocation10 + $0x80] sm:$0xff]  }
 0x2af   : > { %9277 = vst [vmem:[#allocation41_spill] sm:$0xff] %v8622_v12  ;;  %4140 = vmatprep.mubr.bf16.mxu0 %v8380_v22  ;;  %4233 = vmatprep.mubr.bf16.mxu1 %v8397_v45  ;;  %9279 = vst [vmem:[#allocation43_spill] sm:$0xff] %v8638_v60  ;;  %v9280_v58 = vld [vmem:[#allocation16_spill] sm:$0xff] }
 0x2b0   : > { %v8633_v27 = vpop.f32.mrf.mxu0  ;;  %v8635_v36 = vpop.f32.mrf.mxu1  ;;  %5840 = vmatpush3.bf16.msra.mxu1 %v8615_v29  ;;  %v9281_v12 = vsub.s32 1, %v9280_v58 }
 0x2b1   : > { %9278 = vst [vmem:[#allocation42_spill] sm:$0xff] %v8633_v27  ;;  %5841 = vmatprep.subr.bf16.mxu1 %v8618_v41 }
 0x2b2   : > { %v8643_v26 = vrot.slane %v8631_v10, %v9281_v12  ;;  %v8646_v22 = vpop.f32.mrf.mxu0  ;;  %v8648_v45 = vpop.f32.mrf.mxu1 }
 0x2b4   : > { %v3315_v27 = vadd.f32 %v8460_v31, %v8643_v26  ;;  %v8652_v44 = vpop.f32.mrf.mxu0  ;;  %v8654_v32 = vpop.f32.mrf.mxu1  ;;  %5842 = vmatpush3.bf16.msra.mxu1 %v8638_v60  ;;  %v3311_v29 = vadd.f32 %v8447_v37, %v8643_v26  ;;  %v9285_v37 = vsub.s32 0, %v9280_v58 }
 0x2b5   : > { %9282 = vst [vmem:[#allocation16_spill] sm:$0xff] %v8652_v44  ;;  %9283 = vst [vmem:[#allocation44_spill] sm:$0xff] %v8654_v32  ;;  %5955 = vmatprep.subr.bf16.mxu1 %v8481_v18 }
 0x2b6   : > { %v3428_v12 = vadd.f32 %v8529_v46, %v3315_v27  ;;  %4141 = vmatmul.mubr.bf16.gmra.mxu0 %v8399_v24  ;;  %4234 = vmatmul.mubr.bf16.gmra.mxu1 %v8404_v48  ;;  %v8663_v41 = vpop.f32.mrf.mxu0  ;;  %v8665_v31 = vpop.f32.mrf.mxu1  ;;  %v3424_v44 = vadd.f32 %v8507_v53, %v3311_v29  ;;  %v8673_v46 = vrot.slane %v8631_v10, %v9285_v37 }
 0x2b7   : > { %9284 = vst [vmem:[#allocation45_spill] sm:$0xff] %v8663_v41  ;;  %4150 = vmatprep.mubr.bf16.mxu0 %v8407_v5  ;;  %4243 = vmatprep.mubr.bf16.mxu1 %v8415_v6  ;;  %v3325_v5 = vadd.f32 %v8486_v3, %v8643_v26 }
 0x2b8   : > { %v8675_v18 = vpop.f32.mrf.mxu0  ;;  %v8677_v24 = vpop.f32.mrf.mxu1  ;;  %v3731_v48 = vmax.f32 %v3428_v12, 0.0  ;;  %v3313_v27 = vadd.f32 %v8450_v28, %v8673_v46  ;;  %v3727_v6 = vmax.f32 %v3424_v44, 0.0  ;;  %v3309_v53 = vadd.f32 %v8438_v63, %v8673_v46 }
 0x2b9   : > { %9286 = vst [vmem:[#allocation46_spill] sm:$0xff] %v8675_v18  ;;  %v3321_v28 = vadd.f32 %v8473_v49, %v8643_v26  ;;  %v3438_v12 = vadd.f32 %v8573_v42, %v3325_v5 }
 0x2ba   : > { %v8681_v60 = vpop.f32.mrf.mxu0  ;;  %v8683_v29 = vpop.f32.mrf.mxu1  ;;  %v3426_v37 = vadd.f32 %v8515_v51, %v3313_v27  ;;  %v3422_v32 = vadd.f32 %v8491_v21, %v3309_v53 }
 0x2bb   : > { %9287 = vst [vmem:[#allocation47_spill] sm:$0xff] %v8681_v60  ;;  %v4339_v60 = vpack.c.bf16 %v3731_v48, %v3727_v6  ;;  %v3434_v51 = vadd.f32 %v8551_v0, %v3321_v28  ;;  %v3739_v48 = vmax.f32 %v3438_v12, 0.0  ;;  %v3335_v0 = vadd.f32 %v8527_v39, %v8643_v26 }
 0x2bc   : > { %v8690_v18 = vpop.f32.mrf.mxu0  ;;  %v8692_v41 = vpop.f32.mrf.mxu1  ;;  %v3730_v44 = vmax.f32 %v3426_v37, 0.0  ;;  %v3726_v21 = vmax.f32 %v3422_v32, 0.0 }
 0x2bd   : > { %v3735_v5 = vmax.f32 %v3434_v51, 0.0  ;;  %v3448_v32 = vadd.f32 %v8608_v17, %v3335_v0 }
 0x2be   : > { %4151 = vmatmul.mubr.bf16.gmra.mxu0 %v8418_v13  ;;  %4244 = vmatmul.mubr.bf16.gmra.mxu1 %v8421_v16  ;;  %v8700_v3 = vpop.f32.mrf.mxu0  ;;  %v8702_v63 = vpop.f32.mrf.mxu1  ;;  %v3323_v13 = vadd.f32 %v8479_v23, %v8673_v46  ;;  %v3331_v23 = vadd.f32 %v8505_v1, %v8643_v26 }
 0x2bf   : > { %4253 = vmatprep.mubr.bf16.mxu1 %v8429_v52  ;;  %4600 = vmatprep.mubr.bf16.mxu0 %v4339_v60  ;;  %v3319_v52 = vadd.f32 %v8465_v35, %v8673_v46  ;;  %v4338_v60 = vpack.c.bf16 %v3730_v44, %v3726_v21  ;;  %v4343_v28 = vpack.c.bf16 %v3739_v48, %v3735_v5  ;;  %v3747_v17 = vmax.f32 %v3448_v32, 0.0 }
 0x2c0   : > { %v8706_v49 = vpop.f32.mrf.mxu0  ;;  %v8708_v42 = vpop.f32.mrf.mxu1  ;;  %v3436_v6 = vadd.f32 %v8559_v57, %v3323_v13  ;;  %v3444_v57 = vadd.f32 %v8591_v30, %v3331_v23  ;;  %v3329_v21 = vadd.f32 %v8489_v14, %v8673_v46 }
 0x2c1   : > { %v3432_v12 = vadd.f32 %v8534_v7, %v3319_v52 }
 0x2c2   : > { %v8712_v16 = vpop.f32.mrf.mxu0  ;;  %v8714_v27 = vpop.f32.mrf.mxu1  ;;  %v3738_v51 = vmax.f32 %v3436_v6, 0.0  ;;  %v3743_v30 = vmax.f32 %v3444_v57, 0.0 }
 0x2c3   : > { %v3734_v7 = vmax.f32 %v3432_v12, 0.0  ;;  %v3339_v12 = vadd.f32 %v8532_v4, %v8673_v46 }
 0x2c4   : > { %v8721_v53 = vpop.f32.mrf.mxu1  ;;  %v8723_v37 = vpop.f32.mrf.mxu0 }
 0x2c5   : > { %v4342_v0 = vpack.c.bf16 %v3738_v51, %v3734_v7 }
 0x2c6   : > { %4254 = vmatmul.mubr.bf16.gmra.mxu1 %v8435_v38  ;;  %4601 = vmatmul.mubr.bf16.vlgmr.msra.gmra.mxu0 %v4338_v60  ;;  %v8730_v39 = vpop.f32.mrf.mxu1  ;;  %v8732_v35 = vpop.f32.mrf.mxu0  ;;  %v3333_v38 = vadd.f32 %v8513_v40, %v8673_v46  ;;  %v3341_v40 = vadd.f32 %v8549_v54, %v8643_v26  ;;  %v4347_v60 = vpack.c.bf16 %v3747_v17, %v3743_v30 }
 0x2c7   : > { %4263 = vmatprep.mubr.bf16.mxu1 %v8455_v34  ;;  %4608 = vmatprep.mubr.bf16.mxu0 %v4343_v28  ;;  %v3345_v34 = vadd.f32 %v8571_v55, %v8643_v26  ;;  %v3442_v55 = vadd.f32 %v8578_v33, %v3329_v21  ;;  %v3351_v17 = vadd.f32 %v8589_v50, %v8643_v26 }
 0x2c8   : > { %v8736_v44 = vpop.f32.mrf.mxu1  ;;  %v3538_v1 = vpop.f32.mrf.mxu0  ;;  %5892 = vmatpush3.bf16.msra.mxu0 %v8440_v2  ;;  %v3446_v2 = vadd.f32 %v8597_v62, %v3333_v38  ;;  %v3454_v6 = vadd.f32 %v8624_v11, %v3341_v40  ;;  %v3355_v11 = vadd.f32 %v8606_v15, %v8643_v26  ;;  %v9289_v38 = vsub.s32 2, %v9280_v58 }
 0x2c9   : > { %5893 = vmatprep.subr.bf16.mxu0 %v8443_v9  ;;  %v3458_v52 = vadd.f32 %v8648_v45, %v3345_v34  ;;  %v3742_v33 = vmax.f32 %v3442_v55, 0.0  ;;  %v3452_v34 = vadd.f32 %v8612_v47, %v3339_v12 }
 0x2ca   : > { %v8742_v48 = vpop.f32.mrf.mxu1  ;;  %v3540_v13 = vpop.f32.mrf.mxu0  ;;  %v3751_v28 = vmax.f32 %v3454_v6, 0.0  ;;  %v3468_v15 = vadd.f32 %v8683_v29, %v3355_v11  ;;  %v8796_v4 = vrot.slane %v8631_v10, %v9289_v38  ;;  %v9293_v11 = vld [vmem:[#allocation32_spill] sm:$0xff] }
 0x2cc   : > { %v8749_v5 = vpop.f32.mrf.mxu1  ;;  %v8751_v9 = vpop.f32.mrf.mxu0  ;;  %5894 = vmatpush3.bf16.msra.mxu0 %v8453_v25  ;;  %v3746_v25 = vmax.f32 %v3446_v2, 0.0  ;;  %v3763_v2 = vmax.f32 %v3468_v15, 0.0  ;;  %v3535_v40 = vadd.f32 %v8723_v37, %v8796_v4 }
 0x2cd   : > { %5895 = vmatprep.subr.bf16.mxu0 %v8458_v8  ;;  %v3755_v8 = vmax.f32 %v3458_v52, 0.0  ;;  %v9292_v52 = vld [vmem:[#allocation18_spill] sm:$0xff] }
 0x2ce   : > { %4264 = vmatmul.mubr.bf16.gmra.mxu1 %v8463_v61  ;;  %4609 = vmatmul.mubr.bf16.gmra.mxu0 %v4342_v0  ;;  %v8760_v14 = vpop.f32.mrf.mxu1  ;;  %v8762_v62 = vpop.f32.mrf.mxu0  ;;  %v3343_v61 = vadd.f32 %v8557_v59, %v8673_v46  ;;  %v4346_v57 = vpack.c.bf16 %v3746_v25, %v3742_v33  ;;  %v9290_v0 = vld [vmem:[#allocation28_spill] sm:$0xff]  ;;  %v3365_v25 = vadd.f32 %v8646_v22, %v8643_v26 }
 0x2cf   : > { %4616 = vmatprep.mubr.bf16.mxu0 %v4347_v60  ;;  %v4351_v7 = vpack.c.bf16 %v3755_v8, %v3751_v28  ;;  %v3750_v60 = vmax.f32 %v3452_v34, 0.0  ;;  %v3349_v28 = vadd.f32 %v9293_v11, %v8673_v46  ;;  %v9297_v34 = vld [vmem:[#allocation44_spill] sm:$0xff]  ;;  %v9301_v11 = vld [vmem:[#allocation38_spill] sm:$0xff] }
 0x2d0   : > { %v8765_v23 = vpop.f32.mrf.mxu1  ;;  %v8767_v54 = vpop.f32.mrf.mxu0  ;;  %5896 = vmatpush3.bf16.msra.mxu0 %v8469_v19  ;;  %v3456_v19 = vadd.f32 %v8635_v36, %v3343_v61  ;;  %v3478_v15 = vadd.f32 %v8714_v27, %v3365_v25  ;;  %v9300_v25 = vld [vmem:[#allocation25_spill] sm:$0xff] }
 0x2d1   : > { %5897 = vmatprep.subr.bf16.mxu0 %v8475_v43  ;;  %v9288_v43 = vsub.s32 3, %v9280_v58 }
 0x2d2   : > { %v8773_v45 = vpop.f32.mrf.mxu1  ;;  %v8775_v32 = vpop.f32.mrf.mxu0  ;;  %v3754_v21 = vmax.f32 %v3456_v19, 0.0 }
 0x2d3   : > { %v8785_v51 = vrot.slane %v8631_v10, %v9288_v43  ;;  %v3539_v10 = vadd.f32 %v3538_v1, %v8796_v4  ;;  %v9295_v43 = vld [vmem:[#allocation41_spill] sm:$0xff] }
 0x2d4   : > { %v8787_v59 = vpop.f32.mrf.mxu0  ;;  %5898 = vmatpush3.bf16.msra.mxu0 %v8484_v56  ;;  %v3464_v56 = vadd.f32 %v8665_v31, %v3351_v17  ;;  %v4350_v37 = vpack.c.bf16 %v3754_v21, %v3750_v60  ;;  %v3361_v17 = vadd.f32 %v9295_v43, %v8643_v26 }
 0x2d5   : > { %v3647_v36 = vpop.f32.mrf.mxu1  ;;  %5899 = vmatprep.subr.bf16.mxu0 %v8493_v20  ;;  %v3537_v58 = vadd.f32 %v8732_v35, %v8785_v51  ;;  %v9291_v20 = vld [vmem:[#allocation35_spill] sm:$0xff]  ;;  %v3541_v55 = vadd.f32 %v3540_v13, %v8785_v51  ;;  %v9294_v13 = vld [vmem:[#allocation21_spill] sm:$0xff]  ;;  %v3547_v27 = vadd.f32 %v8762_v62, %v8785_v51 }
 0x2d6   : > { %4617 = vmatmul.mubr.bf16.gmra.mxu0 %v4346_v57  ;;  %v8800_v30 = vpop.f32.mrf.mxu0  ;;  %v3353_v47 = vadd.f32 %v9291_v20, %v8673_v46  ;;  %v3759_v8 = vmax.f32 %v3464_v56, 0.0  ;;  %v3648_v61 = vadd.f32 %v3647_v36, %v3535_v40  ;;  %v3462_v56 = vadd.f32 %v9297_v34, %v3349_v28 }
 0x2d7   : > { %4624 = vmatprep.mubr.bf16.mxu0 %v4351_v7  ;;  %v3649_v50 = vpop.f32.mrf.mxu1  ;;  %v9296_v7 = vld [vmem:[#allocation17_spill] sm:$0xff]  ;;  %v3359_v28 = vadd.f32 %v9301_v11, %v8673_v46 }
 0x2d8   : > { %v8806_v29 = vpop.f32.mrf.mxu0  ;;  %5900 = vmatpush3.bf16.msra.mxu0 %v9290_v0  ;;  %v3650_v35 = vadd.f32 %v3649_v50, %v3537_v58  ;;  %v3466_v12 = vadd.f32 %v8677_v24, %v3353_v47  ;;  %v4355_v36 = vpack.c.bf16 %v3763_v2, %v3759_v8  ;;  %v3474_v58 = vadd.f32 %v8702_v63, %v3361_v17 }
 0x2d9   : > { %v3651_v31 = vpop.f32.mrf.mxu1  ;;  %5901 = vmatprep.subr.bf16.mxu0 %v9292_v52  ;;  %v3549_v47 = vadd.f32 %v8767_v54, %v8796_v4  ;;  %v9299_v52 = vld [vmem:[#allocation42_spill] sm:$0xff]  ;;  %v3545_v63 = vadd.f32 %v8751_v9, %v8796_v4  ;;  %v3758_v62 = vmax.f32 %v3462_v56, 0.0  ;;  %v3551_v54 = vadd.f32 %v8775_v32, %v8785_v51 }
 0x2da   : > { %v3652_v6 = vadd.f32 %v3651_v31, %v3539_v10  ;;  %v8815_v1 = vpop.f32.mrf.mxu0  ;;  %v3729_v50 = vmax.f32 %v3650_v35, 0.0  ;;  %v3728_v10 = vmax.f32 %v3648_v61, 0.0  ;;  %v3762_v20 = vmax.f32 %v3466_v12, 0.0  ;;  %v9298_v31 = vld [vmem:[#allocation23_spill] sm:$0xff] }
 0x2db   : > { %v3653_v33 = vpop.f32.mrf.mxu1  ;;  %v3363_v60 = vadd.f32 %v9299_v52, %v8673_v46  ;;  %v3767_v9 = vmax.f32 %v3474_v58, 0.0  ;;  %v9306_v58 = vld [vmem:[#allocation20_spill] sm:$0xff]  ;;  %v3559_v52 = vadd.f32 %v8806_v29, %v8796_v4  ;;  %v3561_v29 = vadd.f32 %v8815_v1, %v8785_v51 }
 0x2dc   : > { %v3654_v57 = vadd.f32 %v3653_v33, %v3541_v55  ;;  %v8822_v19 = vpop.f32.mrf.mxu0  ;;  %5902 = vmatpush3.bf16.msra.mxu0 %v9294_v13  ;;  %v3732_v22 = vmax.f32 %v3652_v6, 0.0  ;;  %v3771_v55 = vmax.f32 %v3478_v15, 0.0  ;;  %v4354_v43 = vpack.c.bf16 %v3762_v20, %v3758_v62 }
 0x2dd   : > { %v3657_v38 = vpop.f32.mrf.mxu1  ;;  %5903 = vmatprep.subr.bf16.mxu0 %v9296_v7  ;;  %v3476_v17 = vadd.f32 %v8708_v42, %v3363_v60  ;;  %v9305_v7 = vld [vmem:[#allocation45_spill] sm:$0xff] }
 0x2de   : > { %v3733_v21 = vmax.f32 %v3654_v57, 0.0  ;;  %4625 = vmatmul.mubr.bf16.gmra.mxu0 %v4350_v37  ;;  %v8830_v24 = vpop.f32.mrf.mxu0  ;;  %v4340_v35 = vpack.c.bf16 %v3732_v22, %v3728_v10  ;;  %v9302_v37 = vld [vmem:[#allocation47_spill] sm:$0xff]  ;;  %v3658_v57 = vadd.f32 %v3657_v38, %v3545_v63  ;;  %v9303_v22 = vld [vmem:[#allocation30_spill] sm:$0xff]  ;;  %v3371_v34 = vadd.f32 %v9305_v7, %v8643_v26 }
 0x2df   : > { %4632 = vmatprep.mubr.bf16.mxu0 %v4355_v36  ;;  %v3659_v0 = vpop.f32.mrf.mxu1  ;;  %v3375_v12 = vadd.f32 %v9302_v37, %v8643_v26  ;;  %v9304_v36 = vld [vmem:[#allocation27_spill] sm:$0xff]  ;;  %v4359_v38 = vpack.c.bf16 %v3771_v55, %v3767_v9  ;;  %v3472_v10 = vadd.f32 %v8692_v41, %v3359_v28  ;;  %v9308_v63 = vld [vmem:[#allocation46_spill] sm:$0xff]  ;;  %v3385_v28 = vadd.f32 %v8712_v16, %v8643_v26 }
 0x2e0   : > { %v8837_v2 = vpop.f32.mrf.mxu0  ;;  %v4341_v40 = vpack.c.bf16 %v3733_v21, %v3729_v50  ;;  %5904 = vmatpush3.bf16.msra.mxu0 %v9298_v31  ;;  %v3660_v8 = vadd.f32 %v3659_v0, %v3547_v27  ;;  %v3484_v27 = vadd.f32 %v8730_v39, %v3371_v34  ;;  %v3770_v31 = vmax.f32 %v3476_v17, 0.0  ;;  %v9307_v55 = vld [vmem:[#allocation19_spill] sm:$0xff] }
 0x2e1   : > { %v3661_v6 = vpop.f32.mrf.mxu1  ;;  %5905 = vmatprep.subr.bf16.mxu0 %v9300_v25  ;;  %v3488_v56 = vadd.f32 %v8742_v48, %v3375_v12  ;;  %v3557_v48 = vadd.f32 %v8800_v30, %v8785_v51  ;;  %v3555_v39 = vadd.f32 %v8787_v59, %v8796_v4  ;;  %v3766_v30 = vmax.f32 %v3472_v10, 0.0  ;;  %v9310_v59 = vld [vmem:[#allocation16_spill] sm:$0xff] }
 0x2e2   : > { %v3662_v61 = vadd.f32 %v3661_v6, %v3549_v47  ;;  %4697 = vmatprep.mubr.bf16.mxu1 %v4341_v40  ;;  %v8847_v33 = vpop.f32.mrf.mxu0  ;;  %v3737_v42 = vmax.f32 %v3660_v8, 0.0  ;;  %v3736_v47 = vmax.f32 %v3658_v57, 0.0  ;;  %v3775_v37 = vmax.f32 %v3484_v27, 0.0 }
 0x2e3   : > { %v3663_v13 = vpop.f32.mrf.mxu1  ;;  %4698 = vmatmul.mubr.bf16.vlgmr.msra.gmra.mxu1 %v4340_v35  ;;  %v3373_v35 = vadd.f32 %v9308_v63, %v8673_v46  ;;  %v3779_v6 = vmax.f32 %v3488_v56, 0.0  ;;  %v3369_v57 = vadd.f32 %v9310_v59, %v8673_v46  ;;  %v3498_v16 = vadd.f32 %v8773_v45, %v3385_v28  ;;  %v9312_v56 = vld [vmem:[#allocation26_spill] sm:$0xff] }
 0x2e4   : > { %v3664_v15 = vadd.f32 %v3663_v13, %v3551_v54  ;;  %v8854_v32 = vpop.f32.mrf.mxu0  ;;  %5906 = vmatpush3.bf16.msra.mxu0 %v9303_v22  ;;  %5956 = vmatpush3.bf16.msra.mxu1 %v9304_v36  ;;  %v3740_v50 = vmax.f32 %v3662_v61, 0.0  ;;  %v9309_v54 = vld [vmem:[#allocation22_spill] sm:$0xff]  ;;  %v4358_v13 = vpack.c.bf16 %v3770_v31, %v3766_v30  ;;  %v3381_v22 = vadd.f32 %v8700_v3, %v8643_v26 }
 0x2e5   : > { %v3667_v21 = vpop.f32.mrf.mxu1  ;;  %5957 = vmatprep.subr.bf16.mxu1 %v9306_v58  ;;  %v4363_v34 = vpack.c.bf16 %v3779_v6, %v3775_v37  ;;  %v3567_v45 = vadd.f32 %v8830_v24, %v8785_v51  ;;  %v3787_v31 = vmax.f32 %v3498_v16, 0.0  ;;  %v9316_v28 = vld [vmem:[#allocation34_spill] sm:$0xff] }
 0x2e6   : > { %v3741_v0 = vmax.f32 %v3664_v15, 0.0  ;;  %4633 = vmatmul.mubr.bf16.gmra.mxu0 %v4354_v43  ;;  %v8863_v20 = vpop.f32.mrf.mxu0  ;;  %v4344_v25 = vpack.c.bf16 %v3740_v50, %v3736_v47  ;;  %v3668_v12 = vadd.f32 %v3667_v21, %v3555_v39  ;;  %v3486_v43 = vadd.f32 %v8736_v44, %v3373_v35  ;;  %v9311_v15 = vld [vmem:[#allocation24_spill] sm:$0xff]  ;;  %v9313_v47 = vld [vmem:[#allocation29_spill] sm:$0xff] }
 0x2e7   : > { %4640 = vmatprep.mubr.bf16.mxu0 %v4359_v38  ;;  %v3669_v40 = vpop.f32.mrf.mxu1  ;;  %v3482_v50 = vadd.f32 %v8721_v53, %v3369_v57  ;;  %v3494_v58 = vadd.f32 %v8760_v14, %v3381_v22  ;;  %v3565_v14 = vadd.f32 %v8822_v19, %v8796_v4  ;;  %v3379_v19 = vadd.f32 %v8690_v18, %v8673_v46  ;;  %v9317_v22 = vld [vmem:[#allocation36_spill] sm:$0xff] }
 0x2e8   : > { %v8870_v60 = vpop.f32.mrf.mxu0  ;;  %v4345_v41 = vpack.c.bf16 %v3741_v0, %v3737_v42  ;;  %5958 = vmatpush3.bf16.msra.mxu1 %v9307_v55  ;;  %v3670_v8 = vadd.f32 %v3669_v40, %v3557_v48  ;;  %v3744_v10 = vmax.f32 %v3668_v12, 0.0  ;;  %v3778_v3 = vmax.f32 %v3486_v43, 0.0 }
 0x2e9   : > { %v3671_v62 = vpop.f32.mrf.mxu1  ;;  %5959 = vmatprep.subr.bf16.mxu1 %v9309_v54  ;;  %v3569_v0 = vadd.f32 %v8837_v2, %v8796_v4  ;;  %v3383_v40 = vadd.f32 %v8706_v49, %v8673_v46  ;;  %v3774_v24 = vmax.f32 %v3482_v50, 0.0  ;;  %v3571_v2 = vadd.f32 %v8847_v33, %v8785_v51 }
 0x2ea   : > { %v3672_v61 = vadd.f32 %v3671_v62, %v3559_v52  ;;  %4705 = vmatprep.mubr.bf16.mxu1 %v4345_v41  ;;  %v8880_v11 = vpop.f32.mrf.mxu0  ;;  %v3745_v21 = vmax.f32 %v3670_v8, 0.0  ;;  %v9314_v41 = vld [vmem:[#allocation31_spill] sm:$0xff]  ;;  %v3783_v6 = vmax.f32 %v3494_v58, 0.0  ;;  %v3492_v37 = vadd.f32 %v8749_v5, %v3379_v19 }
 0x2eb   : > { %v3673_v9 = vpop.f32.mrf.mxu1  ;;  %4706 = vmatmul.mubr.bf16.gmra.mxu1 %v4344_v25  ;;  %v4362_v25 = vpack.c.bf16 %v3778_v3, %v3774_v24  ;;  %v3496_v62 = vadd.f32 %v8765_v23, %v3383_v40  ;;  %v3579_v43 = vadd.f32 %v8870_v60, %v8796_v4  ;;  %v3575_v5 = vadd.f32 %v8854_v32, %v8796_v4  ;;  %v9319_v32 = vld [vmem:[#allocation39_spill] sm:$0xff] }
 0x2ec   : > { %v3674_v17 = vadd.f32 %v3673_v9, %v3561_v29  ;;  %v8887_v1 = vpop.f32.mrf.mxu0  ;;  %5960 = vmatpush3.bf16.msra.mxu1 %v9311_v15  ;;  %v3748_v36 = vmax.f32 %v3672_v61, 0.0  ;;  %v9315_v29 = vld [vmem:[#allocation33_spill] sm:$0xff]  ;;  %v4367_v61 = vpack.c.bf16 %v3787_v31, %v3783_v6  ;;  %v9321_v24 = vld [vmem:[#allocation43_spill] sm:$0xff] }
 0x2ed   : > { %v3677_v7 = vpop.f32.mrf.mxu1  ;;  %5961 = vmatprep.subr.bf16.mxu1 %v9312_v56  ;;  %v3786_v23 = vmax.f32 %v3496_v62, 0.0  ;;  %v3581_v56 = vadd.f32 %v8880_v11, %v8785_v51 }
 0x2ee   : > { %v3749_v38 = vmax.f32 %v3674_v17, 0.0  ;;  %4641 = vmatmul.mubr.bf16.gmra.mxu0 %v4358_v13  ;;  %v8895_v44 = vpop.f32.mrf.mxu0  ;;  %v4348_v48 = vpack.c.bf16 %v3748_v36, %v3744_v10  ;;  %v3678_v39 = vadd.f32 %v3677_v7, %v3565_v14  ;;  %v3577_v13 = vadd.f32 %v8863_v20, %v8785_v51  ;;  %v9318_v7 = vld [vmem:[#allocation37_spill] sm:$0xff] }
 0x2ef   : > { %4648 = vmatprep.mubr.bf16.mxu0 %v4363_v34  ;;  %v3679_v42 = vpop.f32.mrf.mxu1  ;;  %v3782_v34 = vmax.f32 %v3492_v37, 0.0  ;;  %v3587_v14 = vadd.f32 %v8895_v44, %v8785_v51 }
 0x2f0   : > { %v8902_v27 = vpop.f32.mrf.mxu0  ;;  %v4349_v53 = vpack.c.bf16 %v3749_v38, %v3745_v21  ;;  %5962 = vmatpush3.bf16.msra.mxu1 %v9313_v47  ;;  %v3680_v55 = vadd.f32 %v3679_v42, %v3567_v45  ;;  %v3752_v18 = vmax.f32 %v3678_v39, 0.0 }
 0x2f1   : > { %v3681_v52 = vpop.f32.mrf.mxu1  ;;  %5963 = vmatprep.subr.bf16.mxu1 %v9314_v41  ;;  %v4366_v58 = vpack.c.bf16 %v3786_v23, %v3782_v34 }
 0x2f2   : > { %v3682_v63 = vadd.f32 %v3681_v52, %v3569_v0  ;;  %4713 = vmatprep.mubr.bf16.mxu1 %v4349_v53  ;;  %v8912_v35 = vpop.f32.mrf.mxu0  ;;  %v3753_v12 = vmax.f32 %v3680_v55, 0.0  ;;  %v9320_v0 = vld [vmem:[#allocation40_spill] sm:$0xff] }
 0x2f3   : > { %v3683_v49 = vpop.f32.mrf.mxu1  ;;  %4714 = vmatmul.mubr.bf16.gmra.mxu1 %v4348_v48  ;;  %v3589_v48 = vadd.f32 %v8902_v27, %v8796_v4  ;;  %v3591_v6 = vadd.f32 %v8912_v35, %v8785_v51 }
 0x2f4   : > { %v3684_v54 = vadd.f32 %v3683_v49, %v3571_v2  ;;  %v8917_v30 = vpop.f32.mrf.mxu0  ;;  %5964 = vmatpush3.bf16.msra.mxu1 %v9315_v29  ;;  %v3756_v33 = vmax.f32 %v3682_v63, 0.0  ;;  %v3585_v2 = vadd.f32 %v8887_v1, %v8796_v4 }
 0x2f5   : > { %v3687_v8 = vpop.f32.mrf.mxu1  ;;  %5965 = vmatprep.subr.bf16.mxu1 %v9316_v28 }
 0x2f6   : > { %v3757_v9 = vmax.f32 %v3684_v54, 0.0  ;;  %4649 = vmatmul.mubr.bf16.gmra.mxu0 %v4362_v25  ;;  %v3596_v59 = vpop.f32.mrf.mxu0  ;;  %v4352_v16 = vpack.c.bf16 %v3756_v33, %v3752_v18  ;;  %v3688_v60 = vadd.f32 %v3687_v8, %v3575_v5 }
 0x2f7   : > { %4656 = vmatprep.mubr.bf16.mxu0 %v4367_v61  ;;  %v3689_v57 = vpop.f32.mrf.mxu1  ;;  %v3597_v37 = vadd.f32 %v3596_v59, %v8785_v51 }
 0x2f8   : > { %v3598_v17 = vpop.f32.mrf.mxu0  ;;  %v4353_v15 = vpack.c.bf16 %v3757_v9, %v3753_v12  ;;  %5966 = vmatpush3.bf16.msra.mxu1 %v9317_v22  ;;  %v3690_v50 = vadd.f32 %v3689_v57, %v3577_v13  ;;  %v3760_v40 = vmax.f32 %v3688_v60, 0.0  ;;  %v3595_v9 = vadd.f32 %v8917_v30, %v8796_v4 }
 0x2f9   : > { %v3691_v36 = vpop.f32.mrf.mxu1  ;;  %5967 = vmatprep.subr.bf16.mxu1 %v9318_v7  ;;  %v3599_v35 = vadd.f32 %v3598_v17, %v8796_v4 }
 0x2fa   : > { %v3692_v20 = vadd.f32 %v3691_v36, %v3579_v43  ;;  %4721 = vmatprep.mubr.bf16.mxu1 %v4353_v15  ;;  %v3600_v21 = vpop.f32.mrf.mxu0  ;;  %v3761_v53 = vmax.f32 %v3690_v50, 0.0 }
 0x2fb   : > { %v3693_v38 = vpop.f32.mrf.mxu1  ;;  %4722 = vmatmul.mubr.bf16.gmra.mxu1 %v4352_v16  ;;  %v3601_v13 = vadd.f32 %v3600_v21, %v8785_v51 }
 0x2fc   : > { %v3694_v10 = vadd.f32 %v3693_v38, %v3581_v56  ;;  %v8932_v42 = vpop.f32.mrf.mxu0  ;;  %5968 = vmatpush3.bf16.msra.mxu1 %v9319_v32  ;;  %v3764_v3 = vmax.f32 %v3692_v20, 0.0 }
 0x2fd   : > { %v3697_v45 = vpop.f32.mrf.mxu1  ;;  %5969 = vmatprep.subr.bf16.mxu1 %v9320_v0 }
 0x2fe   : > { %v3765_v47 = vmax.f32 %v3694_v10, 0.0  ;;  %4657 = vmatmul.mubr.bf16.gmra.mxu0 %v4366_v58  ;;  %v3606_v11 = vpop.f32.mrf.mxu0  ;;  %v4356_v55 = vpack.c.bf16 %v3764_v3, %v3760_v40  ;;  %v3698_v44 = vadd.f32 %v3697_v45, %v3585_v2  ;;  %v3605_v58 = vadd.f32 %v8932_v42, %v8796_v4 }
 0x2ff   : > { %v3699_v31 = vpop.f32.mrf.mxu1  ;;  %v3607_v60 = vadd.f32 %v3606_v11, %v8785_v51 }
 0x300   : > { %v3608_v52 = vpop.f32.mrf.mxu0  ;;  %v4357_v41 = vpack.c.bf16 %v3765_v47, %v3761_v53  ;;  %5970 = vmatpush3.bf16.msra.mxu1 %v9321_v24  ;;  %v3700_v39 = vadd.f32 %v3699_v31, %v3587_v14  ;;  %v3768_v61 = vmax.f32 %v3698_v44, 0.0 }
 0x301   : > { %v3701_v63 = vpop.f32.mrf.mxu1  ;;  %v3609_v21 = vadd.f32 %v3608_v52, %v8796_v4 }
 0x302   : > { %v3702_v49 = vadd.f32 %v3701_v63, %v3589_v48  ;;  %4729 = vmatprep.mubr.bf16.mxu1 %v4357_v41  ;;  %v3610_v19 = vpop.f32.mrf.mxu0  ;;  %v3769_v33 = vmax.f32 %v3700_v39, 0.0 }
 0x303   : > { %v3703_v25 = vpop.f32.mrf.mxu1  ;;  %4730 = vmatmul.mubr.bf16.gmra.mxu1 %v4356_v55  ;;  %v3611_v45 = vadd.f32 %v3610_v19, %v8785_v51 }
 0x304   : > { %v3704_v27 = vadd.f32 %v3703_v25, %v3591_v6  ;;  %v3772_v62 = vmax.f32 %v3702_v49, 0.0 }
 0x305   : > { %v3707_v54 = vpop.f32.mrf.mxu1  ;;  %v3856_v29 = vpop.f32.mrf.mxu0 }
 0x306   : > { %v3773_v8 = vmax.f32 %v3704_v27, 0.0  ;;  %v4360_v18 = vpack.c.bf16 %v3772_v62, %v3768_v61  ;;  %v3708_v22 = vadd.f32 %v3707_v54, %v3595_v9  ;;  %v3857_v44 = vadd.f32 %v3856_v29, %v8673_v46 }
 0x307   : > { %v3709_v1 = vpop.f32.mrf.mxu1  ;;  %v3858_v28 = vpop.f32.mrf.mxu0 }
 0x308   : > { %v4361_v12 = vpack.c.bf16 %v3773_v8, %v3769_v33  ;;  %v3710_v43 = vadd.f32 %v3709_v1, %v3597_v37  ;;  %v3776_v50 = vmax.f32 %v3708_v22, 0.0  ;;  %v3859_v6 = vadd.f32 %v3858_v28, %v8643_v26 }
 0x309   : > { %v3711_v57 = vpop.f32.mrf.mxu1  ;;  %v3860_v23 = vpop.f32.mrf.mxu0 }
 0x30a   : > { %v3712_v15 = vadd.f32 %v3711_v57, %v3599_v35  ;;  %4737 = vmatprep.mubr.bf16.mxu1 %v4361_v12  ;;  %v3777_v34 = vmax.f32 %v3710_v43, 0.0  ;;  %v3861_v39 = vadd.f32 %v3860_v23, %v8673_v46 }
 0x30b   : > { %v3713_v5 = vpop.f32.mrf.mxu1  ;;  %v3862_v16 = vpop.f32.mrf.mxu0  ;;  %4738 = vmatmul.mubr.bf16.gmra.mxu1 %v4360_v18 }
 0x30c   : > { %v3714_v36 = vadd.f32 %v3713_v5, %v3601_v13  ;;  %v3780_v59 = vmax.f32 %v3712_v15, 0.0  ;;  %v3863_v27 = vadd.f32 %v3862_v16, %v8643_v26 }
 0x30d   : > { %v3717_v7 = vpop.f32.mrf.mxu1  ;;  %v3866_v17 = vpop.f32.mrf.mxu0 }
 0x30e   : > { %v3781_v56 = vmax.f32 %v3714_v36, 0.0  ;;  %v4364_v10 = vpack.c.bf16 %v3780_v59, %v3776_v50  ;;  %v3718_v47 = vadd.f32 %v3717_v7, %v3605_v58  ;;  %v3867_v22 = vadd.f32 %v3866_v17, %v8673_v46 }
 0x30f   : > { %v3719_v30 = vpop.f32.mrf.mxu1  ;;  %v3868_v20 = vpop.f32.mrf.mxu0 }
 0x310   : > { %v4365_v38 = vpack.c.bf16 %v3781_v56, %v3777_v34  ;;  %v3720_v0 = vadd.f32 %v3719_v30, %v3607_v60  ;;  %v3784_v2 = vmax.f32 %v3718_v47, 0.0  ;;  %v3869_v29 = vadd.f32 %v3868_v20, %v8643_v26 }
 0x311   : > { %v3721_v32 = vpop.f32.mrf.mxu1  ;;  %v3870_v3 = vpop.f32.mrf.mxu0 }
 0x312   : > { %v3722_v53 = vadd.f32 %v3721_v32, %v3609_v21  ;;  %4745 = vmatprep.mubr.bf16.mxu1 %v4365_v38  ;;  %v3785_v52 = vmax.f32 %v3720_v0, 0.0  ;;  %v3871_v13 = vadd.f32 %v3870_v3, %v8673_v46 }
 0x313   : > { %v3723_v40 = vpop.f32.mrf.mxu1  ;;  %v3872_v31 = vpop.f32.mrf.mxu0  ;;  %4746 = vmatmul.mubr.bf16.gmra.mxu1 %v4364_v10 }
 0x314   : > { %v3724_v14 = vadd.f32 %v3723_v40, %v3611_v45  ;;  %v3788_v11 = vmax.f32 %v3722_v53, 0.0  ;;  %v3873_v36 = vadd.f32 %v3872_v31, %v8643_v26 }
 0x315   : > { %v3876_v48 = vpop.f32.mrf.mxu0 }
 0x316   : > { %v3789_v41 = vmax.f32 %v3724_v14, 0.0  ;;  %v3969_v24 = vpop.f32.mrf.mxu1  ;;  %v4368_v49 = vpack.c.bf16 %v3788_v11, %v3784_v2  ;;  %v3877_v47 = vadd.f32 %v3876_v48, %v8673_v46 }
 0x317   : > { %v3878_v42 = vpop.f32.mrf.mxu0  ;;  %v3970_v8 = vadd.f32 %v3969_v24, %v3857_v44 }
 0x318   : > { %v3971_v55 = vpop.f32.mrf.mxu1  ;;  %v4369_v63 = vpack.c.bf16 %v3789_v41, %v3785_v52  ;;  %v3879_v3 = vadd.f32 %v3878_v42, %v8643_v26 }
 0x319   : > { %v3880_v19 = vpop.f32.mrf.mxu0  ;;  %v3972_v62 = vadd.f32 %v3971_v55, %v3859_v6  ;;  %v4274_v57 = vmax.f32 %v3970_v8, 0.0 }
 0x31a   : > { %v3973_v25 = vpop.f32.mrf.mxu1  ;;  %4753 = vmatprep.mubr.bf16.mxu1 %v4369_v63  ;;  %v3881_v45 = vadd.f32 %v3880_v19, %v8673_v46 }
 0x31b   : > { %v3974_v54 = vadd.f32 %v3973_v25, %v3861_v39  ;;  %v3882_v33 = vpop.f32.mrf.mxu0  ;;  %4754 = vmatmul.mubr.bf16.gmra.mxu1 %v4368_v49  ;;  %v4275_v12 = vmax.f32 %v3972_v62, 0.0 }
 0x31c   : > { %v3975_v61 = vpop.f32.mrf.mxu1  ;;  %v3883_v14 = vadd.f32 %v3882_v33, %v8643_v26 }
 0x31d   : > { %v3976_v1 = vadd.f32 %v3975_v61, %v3863_v27  ;;  %v3886_v37 = vpop.f32.mrf.mxu0  ;;  %v4278_v35 = vmax.f32 %v3974_v54, 0.0 }
 0x31e   : > { %v3979_v28 = vpop.f32.mrf.mxu1  ;;  %v3887_v33 = vadd.f32 %v3886_v37, %v8673_v46 }
 0x31f   : > { %v4279_v9 = vmax.f32 %v3976_v1, 0.0  ;;  %v3888_v18 = vpop.f32.mrf.mxu0  ;;  %v4842_v5 = vpack.c.bf16 %v4278_v35, %v4274_v57  ;;  %v3980_v56 = vadd.f32 %v3979_v28, %v3867_v22 }
 0x320   : > { %v3981_v23 = vpop.f32.mrf.mxu1  ;;  %v3889_v25 = vadd.f32 %v3888_v18, %v8643_v26 }
 0x321   : > { %v3890_v43 = vpop.f32.mrf.mxu0  ;;  %v4843_v15 = vpack.c.bf16 %v4279_v9, %v4275_v12  ;;  %v3982_v59 = vadd.f32 %v3981_v23, %v3869_v29  ;;  %v4282_v32 = vmax.f32 %v3980_v56, 0.0 }
 0x322   : > { %v3983_v16 = vpop.f32.mrf.mxu1  ;;  %v3891_v27 = vadd.f32 %v3890_v43, %v8673_v46 }
 0x323   : > { %v3984_v7 = vadd.f32 %v3983_v16, %v3871_v13  ;;  %4906 = vmatprep.mubr.bf16.mxu0 %v4843_v15  ;;  %v3892_v34 = vpop.f32.mrf.mxu0  ;;  %v4283_v38 = vmax.f32 %v3982_v59, 0.0 }
 0x324   : > { %v3985_v50 = vpop.f32.mrf.mxu1  ;;  %4907 = vmatmul.mubr.bf16.vlgmr.msra.gmra.mxu0 %v4842_v5  ;;  %v3893_v1 = vadd.f32 %v3892_v34, %v8643_v26 }
 0x325   : > { %v3986_v30 = vadd.f32 %v3985_v50, %v3873_v36  ;;  %v3896_v60 = vpop.f32.mrf.mxu0  ;;  %v4286_v20 = vmax.f32 %v3984_v7, 0.0 }
 0x326   : > { %v3989_v21 = vpop.f32.mrf.mxu1  ;;  %v3897_v34 = vadd.f32 %v3896_v60, %v8673_v46 }
 0x327   : > { %v4287_v58 = vmax.f32 %v3986_v30, 0.0  ;;  %v3898_v10 = vpop.f32.mrf.mxu0  ;;  %v4846_v40 = vpack.c.bf16 %v4286_v20, %v4282_v32  ;;  %v3990_v24 = vadd.f32 %v3989_v21, %v3877_v47 }
 0x328   : > { %v3991_v17 = vpop.f32.mrf.mxu1  ;;  %v3899_v16 = vadd.f32 %v3898_v10, %v8643_v26 }
 0x329   : > { %v3900_v0 = vpop.f32.mrf.mxu0  ;;  %v4847_v53 = vpack.c.bf16 %v4287_v58, %v4283_v38  ;;  %v3992_v11 = vadd.f32 %v3991_v17, %v3879_v3  ;;  %v4290_v44 = vmax.f32 %v3990_v24, 0.0 }
 0x32a   : > { %v3993_v31 = vpop.f32.mrf.mxu1  ;;  %v3901_v36 = vadd.f32 %v3900_v0, %v8673_v46 }
 0x32b   : > { %v3994_v52 = vadd.f32 %v3993_v31, %v3881_v45  ;;  %4914 = vmatprep.mubr.bf16.mxu0 %v4847_v53  ;;  %v3902_v41 = vpop.f32.mrf.mxu0  ;;  %v4291_v39 = vmax.f32 %v3992_v11, 0.0 }
 0x32c   : > { %v3995_v2 = vpop.f32.mrf.mxu1  ;;  %4915 = vmatmul.mubr.bf16.gmra.mxu0 %v4846_v40  ;;  %v3903_v30 = vadd.f32 %v3902_v41, %v8643_v26 }
 0x32d   : > { %v3996_v55 = vadd.f32 %v3995_v2, %v3883_v14  ;;  %v3906_v63 = vpop.f32.mrf.mxu0  ;;  %v4294_v42 = vmax.f32 %v3994_v52, 0.0 }
 0x32e   : > { %v3999_v6 = vpop.f32.mrf.mxu1  ;;  %v3907_v41 = vadd.f32 %v3906_v63, %v8673_v46 }
 0x32f   : > { %v4295_v49 = vmax.f32 %v3996_v55, 0.0  ;;  %v3908_v19 = vpop.f32.mrf.mxu0  ;;  %v4850_v8 = vpack.c.bf16 %v4294_v42, %v4290_v44  ;;  %v4000_v9 = vadd.f32 %v3999_v6, %v3887_v33 }
 0x330   : > { %v4001_v48 = vpop.f32.mrf.mxu1  ;;  %v3909_v31 = vadd.f32 %v3908_v19, %v8643_v26 }
 0x331   : > { %v3910_v62 = vpop.f32.mrf.mxu0  ;;  %v4851_v54 = vpack.c.bf16 %v4295_v49, %v4291_v39  ;;  %v4002_v35 = vadd.f32 %v4001_v48, %v3889_v25  ;;  %v4298_v5 = vmax.f32 %v4000_v9, 0.0 }
 0x332   : > { %v4003_v61 = vpop.f32.mrf.mxu1  ;;  %v3911_v14 = vadd.f32 %v3910_v62, %v8673_v46 }
 0x333   : > { %v4004_v28 = vadd.f32 %v4003_v61, %v3891_v27  ;;  %4922 = vmatprep.mubr.bf16.mxu0 %v4851_v54  ;;  %v3912_v12 = vpop.f32.mrf.mxu0  ;;  %v4299_v43 = vmax.f32 %v4002_v35, 0.0 }
 0x334   : > { %v4005_v57 = vpop.f32.mrf.mxu1  ;;  %4923 = vmatmul.mubr.bf16.gmra.mxu0 %v4850_v8  ;;  %v3913_v55 = vadd.f32 %v3912_v12, %v8643_v26 }
 0x335   : > { %v4006_v23 = vadd.f32 %v4005_v57, %v3893_v1  ;;  %v3916_v29 = vpop.f32.mrf.mxu0  ;;  %v4302_v18 = vmax.f32 %v4004_v28, 0.0 }
 0x336   : > { %v4009_v13 = vpop.f32.mrf.mxu1  ;;  %v3917_v28 = vadd.f32 %v3916_v29, %v8673_v46 }
 0x337   : > { %v4303_v15 = vmax.f32 %v4006_v23, 0.0  ;;  %v3918_v22 = vpop.f32.mrf.mxu0  ;;  %v4854_v56 = vpack.c.bf16 %v4302_v18, %v4298_v5  ;;  %v4010_v58 = vadd.f32 %v4009_v13, %v3897_v34 }
 0x338   : > { %v4011_v37 = vpop.f32.mrf.mxu1  ;;  %v3919_v61 = vadd.f32 %v3918_v22, %v8643_v26 }
 0x339   : > { %v3920_v59 = vpop.f32.mrf.mxu0  ;;  %v4855_v7 = vpack.c.bf16 %v4303_v15, %v4299_v43  ;;  %v4012_v20 = vadd.f32 %v4011_v37, %v3899_v16  ;;  %v4306_v40 = vmax.f32 %v4010_v58, 0.0 }
 0x33a   : > { %v4013_v50 = vpop.f32.mrf.mxu1  ;;  %v3921_v1 = vadd.f32 %v3920_v59, %v8673_v46 }
 0x33b   : > { %v4014_v21 = vadd.f32 %v4013_v50, %v3901_v36  ;;  %4930 = vmatprep.mubr.bf16.mxu0 %v4855_v7  ;;  %v3922_v38 = vpop.f32.mrf.mxu0  ;;  %v4307_v0 = vmax.f32 %v4012_v20, 0.0 }
 0x33c   : > { %v4015_v32 = vpop.f32.mrf.mxu1  ;;  %4931 = vmatmul.mubr.bf16.gmra.mxu0 %v4854_v56  ;;  %v3923_v23 = vadd.f32 %v3922_v38, %v8643_v26 }
 0x33d   : > { %v4016_v17 = vadd.f32 %v4015_v32, %v3903_v30  ;;  %v3926_v3 = vpop.f32.mrf.mxu0  ;;  %v4310_v10 = vmax.f32 %v4014_v21, 0.0 }
 0x33e   : > { %v4019_v45 = vpop.f32.mrf.mxu1  ;;  %v3927_v21 = vadd.f32 %v3926_v3, %v8673_v46 }
 0x33f   : > { %v4311_v53 = vmax.f32 %v4016_v17, 0.0  ;;  %v3928_v47 = vpop.f32.mrf.mxu0  ;;  %v4858_v24 = vpack.c.bf16 %v4310_v10, %v4306_v40  ;;  %v4020_v49 = vadd.f32 %v4019_v45, %v3907_v41 }
 0x340   : > { %v4021_v60 = vpop.f32.mrf.mxu1  ;;  %v3929_v50 = vadd.f32 %v3928_v47, %v8643_v26 }
 0x341   : > { %v4859_v11 = vpack.c.bf16 %v4311_v53, %v4307_v0  ;;  %v3930_v52 = vpop.f32.mrf.mxu0  ;;  %v4022_v42 = vadd.f32 %v4021_v60, %v3909_v31  ;;  %v4314_v33 = vmax.f32 %v4020_v49, 0.0 }
 0x342   : > { %v4023_v2 = vpop.f32.mrf.mxu1  ;;  %v3931_v30 = vadd.f32 %v3930_v52, %v8673_v46 }
 0x343   : > { %v4024_v6 = vadd.f32 %v4023_v2, %v3911_v14  ;;  %4938 = vmatprep.mubr.bf16.mxu0 %v4859_v11  ;;  %v3932_v39 = vpop.f32.mrf.mxu0  ;;  %v4315_v62 = vmax.f32 %v4022_v42, 0.0 }
 0x344   : > { %v4025_v44 = vpop.f32.mrf.mxu1  ;;  %4939 = vmatmul.mubr.bf16.gmra.mxu0 %v4858_v24  ;;  %v3933_v17 = vadd.f32 %v3932_v39, %v8643_v26 }
 0x345   : > { %v4026_v48 = vadd.f32 %v4025_v44, %v3913_v55  ;;  %v4318_v25 = vmax.f32 %v4024_v6, 0.0 }
 0x346   : > { %v4029_v19 = vpop.f32.mrf.mxu1  ;;  %v4082_v27 = vpop.f32.mrf.mxu0 }
 0x347   : > { %v4319_v54 = vmax.f32 %v4026_v48, 0.0  ;;  %v4862_v12 = vpack.c.bf16 %v4318_v25, %v4314_v33  ;;  %v4030_v43 = vadd.f32 %v4029_v19, %v3917_v28  ;;  %v4083_v55 = vadd.f32 %v4082_v27, %v8796_v4 }
 0x348   : > { %v4031_v8 = vpop.f32.mrf.mxu1  ;;  %v4084_v63 = vpop.f32.mrf.mxu0 }
 0x349   : > { %v4863_v35 = vpack.c.bf16 %v4319_v54, %v4315_v62  ;;  %v4032_v18 = vadd.f32 %v4031_v8, %v3919_v61  ;;  %v4322_v34 = vmax.f32 %v4030_v43, 0.0  ;;  %v4085_v24 = vadd.f32 %v4084_v63, %v8785_v51 }
 0x34a   : > { %v4033_v9 = vpop.f32.mrf.mxu1  ;;  %v4086_v57 = vpop.f32.mrf.mxu0 }
 0x34b   : > { %v4034_v13 = vadd.f32 %v4033_v9, %v3921_v1  ;;  %4946 = vmatprep.mubr.bf16.mxu0 %v4863_v35  ;;  %v4323_v59 = vmax.f32 %v4032_v18, 0.0  ;;  %v4087_v26 = vadd.f32 %v4086_v57, %v8796_v4 }
 0x34c   : > { %v4035_v15 = vpop.f32.mrf.mxu1  ;;  %v4088_v5 = vpop.f32.mrf.mxu0  ;;  %4947 = vmatmul.mubr.bf16.gmra.mxu0 %v4862_v12 }
 0x34d   : > { %v4036_v37 = vadd.f32 %v4035_v15, %v3923_v23  ;;  %v4326_v16 = vmax.f32 %v4034_v13, 0.0  ;;  %v4089_v49 = vadd.f32 %v4088_v5, %v8785_v51 }
 0x34e   : > { %v4039_v22 = vpop.f32.mrf.mxu1  ;;  %v4092_v36 = vpop.f32.mrf.mxu0 }
 0x34f   : > { %v4327_v7 = vmax.f32 %v4036_v37, 0.0  ;;  %v4866_v38 = vpack.c.bf16 %v4326_v16, %v4322_v34  ;;  %v4040_v0 = vadd.f32 %v4039_v22, %v3927_v21  ;;  %v4093_v23 = vadd.f32 %v4092_v36, %v8796_v4 }
 0x350   : > { %v4041_v29 = vpop.f32.mrf.mxu1  ;;  %v4094_v56 = vpop.f32.mrf.mxu0 }
 0x351   : > { %v4867_v20 = vpack.c.bf16 %v4327_v7, %v4323_v59  ;;  %v4042_v10 = vadd.f32 %v4041_v29, %v3929_v50  ;;  %v4330_v41 = vmax.f32 %v4040_v0, 0.0  ;;  %v4095_v12 = vadd.f32 %v4094_v56, %v8785_v51 }
 0x352   : > { %v4043_v58 = vpop.f32.mrf.mxu1  ;;  %v4096_v32 = vpop.f32.mrf.mxu0 }
 0x353   : > { %v4044_v45 = vadd.f32 %v4043_v58, %v3931_v30  ;;  %4954 = vmatprep.mubr.bf16.mxu0 %v4867_v20  ;;  %v4331_v11 = vmax.f32 %v4042_v10, 0.0  ;;  %v4097_v9 = vadd.f32 %v4096_v32, %v8796_v4 }
 0x354   : > { %v4045_v53 = vpop.f32.mrf.mxu1  ;;  %v4098_v40 = vpop.f32.mrf.mxu0  ;;  %4955 = vmatmul.mubr.bf16.gmra.mxu0 %v4866_v38 }
 0x355   : > { %v4046_v60 = vadd.f32 %v4045_v53, %v3933_v17  ;;  %v4334_v31 = vmax.f32 %v4044_v45, 0.0  ;;  %v4099_v15 = vadd.f32 %v4098_v40, %v8785_v51 }
 0x356   : > { %v4102_v47 = vpop.f32.mrf.mxu0  ;;  %v4195_v14 = vpop.f32.mrf.mxu1 }
 0x357   : > { %v4335_v52 = vmax.f32 %v4046_v60, 0.0  ;;  %v4870_v42 = vpack.c.bf16 %v4334_v31, %v4330_v41  ;;  %v4196_v25 = vadd.f32 %v4195_v14, %v4083_v55  ;;  %v4103_v17 = vadd.f32 %v4102_v47, %v8796_v4 }
 0x358   : > { %v4104_v46 = vpop.f32.mrf.mxu0  ;;  %v4197_v3 = vpop.f32.mrf.mxu1 }
 0x359   : > { %v4871_v2 = vpack.c.bf16 %v4335_v52, %v4331_v11  ;;  %v4198_v44 = vadd.f32 %v4197_v3, %v4085_v24  ;;  %v4276_v35 = vmax.f32 %v4196_v25, 0.0  ;;  %v4105_v38 = vadd.f32 %v4104_v46, %v8785_v51 }
 0x35a   : > { %v4106_v6 = vpop.f32.mrf.mxu0  ;;  %v4199_v39 = vpop.f32.mrf.mxu1 }
 0x35b   : > { %v4200_v48 = vadd.f32 %v4199_v39, %v4087_v26  ;;  %4962 = vmatprep.mubr.bf16.mxu0 %v4871_v2  ;;  %v4277_v61 = vmax.f32 %v4198_v44, 0.0  ;;  %v4107_v58 = vadd.f32 %v4106_v6, %v8796_v4 }
 0x35c   : > { %v4108_v19 = vpop.f32.mrf.mxu0  ;;  %v4201_v62 = vpop.f32.mrf.mxu1  ;;  %4963 = vmatmul.mubr.bf16.gmra.mxu0 %v4870_v42 }
 0x35d   : > { %v4202_v54 = vadd.f32 %v4201_v62, %v4089_v49  ;;  %v4280_v33 = vmax.f32 %v4200_v48, 0.0  ;;  %v4109_v53 = vadd.f32 %v4108_v19, %v8785_v51 }
 0x35e   : > { %v4112_v8 = vpop.f32.mrf.mxu0  ;;  %v4205_v63 = vpop.f32.mrf.mxu1 }
 0x35f   : > { %v4281_v1 = vmax.f32 %v4202_v54, 0.0  ;;  %v4844_v18 = vpack.c.bf16 %v4280_v33, %v4276_v35  ;;  %v4206_v16 = vadd.f32 %v4205_v63, %v4093_v23  ;;  %v4113_v49 = vadd.f32 %v4112_v8, %v8796_v4 }
 0x360   : > { %v4114_v27 = vpop.f32.mrf.mxu0  ;;  %v4207_v28 = vpop.f32.mrf.mxu1 }
 0x361   : > { %v4845_v57 = vpack.c.bf16 %v4281_v1, %v4277_v61  ;;  %v4208_v5 = vadd.f32 %v4207_v28, %v4095_v12  ;;  %v4284_v20 = vmax.f32 %v4206_v16, 0.0  ;;  %v4115_v42 = vadd.f32 %v4114_v27, %v8785_v51 }
 0x362   : > { %v4116_v13 = vpop.f32.mrf.mxu0  ;;  %v4209_v43 = vpop.f32.mrf.mxu1 }
 0x363   : > { %v4210_v37 = vadd.f32 %v4209_v43, %v4097_v9  ;;  %5003 = vmatprep.mubr.bf16.mxu1 %v4845_v57  ;;  %v4285_v50 = vmax.f32 %v4208_v5, 0.0  ;;  %v4117_v6 = vadd.f32 %v4116_v13, %v8796_v4 }
 0x364   : > { %v4118_v22 = vpop.f32.mrf.mxu0  ;;  %v4211_v59 = vpop.f32.mrf.mxu1  ;;  %5004 = vmatmul.mubr.bf16.vlgmr.msra.gmra.mxu1 %v4844_v18 }
 0x365   : > { %v4212_v7 = vadd.f32 %v4211_v59, %v4099_v15  ;;  %v4288_v34 = vmax.f32 %v4210_v37, 0.0  ;;  %v4119_v19 = vadd.f32 %v4118_v22, %v8785_v51 }
 0x366   : > { %v4122_v29 = vpop.f32.mrf.mxu0  ;;  %v4215_v56 = vpop.f32.mrf.mxu1 }
 0x367   : > { %v4289_v30 = vmax.f32 %v4212_v7, 0.0  ;;  %v4848_v10 = vpack.c.bf16 %v4288_v34, %v4284_v20  ;;  %v4216_v31 = vadd.f32 %v4215_v56, %v4103_v17  ;;  %v4123_v15 = vadd.f32 %v4122_v29, %v8796_v4 }
 0x368   : > { %v4124_v36 = vpop.f32.mrf.mxu0  ;;  %v4217_v21 = vpop.f32.mrf.mxu1 }
 0x369   : > { %v4849_v32 = vpack.c.bf16 %v4289_v30, %v4285_v50  ;;  %v4218_v40 = vadd.f32 %v4217_v21, %v4105_v38  ;;  %v4292_v2 = vmax.f32 %v4216_v31, 0.0  ;;  %v4125_v18 = vadd.f32 %v4124_v36, %v8785_v51 }
 0x36a   : > { %v4126_v45 = vpop.f32.mrf.mxu0  ;;  %v4219_v0 = vpop.f32.mrf.mxu1 }
 0x36b   : > { %v4220_v60 = vadd.f32 %v4219_v0, %v4107_v58  ;;  %5011 = vmatprep.mubr.bf16.mxu1 %v4849_v32  ;;  %v4293_v24 = vmax.f32 %v4218_v40, 0.0  ;;  %v4127_v13 = vadd.f32 %v4126_v45, %v8796_v4 }
 0x36c   : > { %v4128_v14 = vpop.f32.mrf.mxu0  ;;  %v4221_v11 = vpop.f32.mrf.mxu1  ;;  %5012 = vmatmul.mubr.bf16.gmra.mxu1 %v4848_v10 }
 0x36d   : > { %v4222_v52 = vadd.f32 %v4221_v11, %v4109_v53  ;;  %v4296_v41 = vmax.f32 %v4220_v60, 0.0  ;;  %v4129_v22 = vadd.f32 %v4128_v14, %v8785_v51 }
 0x36e   : > { %v4132_v46 = vpop.f32.mrf.mxu0  ;;  %v4225_v3 = vpop.f32.mrf.mxu1 }
 0x36f   : > { %v4297_v26 = vmax.f32 %v4222_v52, 0.0  ;;  %v4852_v44 = vpack.c.bf16 %v4296_v41, %v4292_v2  ;;  %v4226_v33 = vadd.f32 %v4225_v3, %v4113_v49  ;;  %v4133_v53 = vadd.f32 %v4132_v46, %v8796_v4 }
 0x370   : > { %v4134_v47 = vpop.f32.mrf.mxu0  ;;  %v4227_v55 = vpop.f32.mrf.mxu1 }
 0x371   : > { %v4853_v39 = vpack.c.bf16 %v4297_v26, %v4293_v24  ;;  %v4228_v62 = vadd.f32 %v4227_v55, %v4115_v42  ;;  %v4300_v57 = vmax.f32 %v4226_v33, 0.0  ;;  %v4135_v10 = vadd.f32 %v4134_v47, %v8785_v51 }
 0x372   : > { %v4136_v48 = vpop.f32.mrf.mxu0  ;;  %v4229_v25 = vpop.f32.mrf.mxu1 }
 0x373   : > { %v4230_v54 = vadd.f32 %v4229_v25, %v4117_v6  ;;  %5019 = vmatprep.mubr.bf16.mxu1 %v4853_v39  ;;  %v4301_v12 = vmax.f32 %v4228_v62, 0.0  ;;  %v4137_v45 = vadd.f32 %v4136_v48, %v8796_v4 }
 0x374   : > { %v4138_v63 = vpop.f32.mrf.mxu0  ;;  %v4231_v61 = vpop.f32.mrf.mxu1  ;;  %5020 = vmatmul.mubr.bf16.gmra.mxu1 %v4852_v44 }
 0x375   : > { %v4232_v1 = vadd.f32 %v4231_v61, %v4119_v19  ;;  %v4304_v35 = vmax.f32 %v4230_v54, 0.0  ;;  %v4139_v14 = vadd.f32 %v4138_v63, %v8785_v51 }
 0x376   : > { %v4142_v27 = vpop.f32.mrf.mxu0  ;;  %v4235_v28 = vpop.f32.mrf.mxu1 }
 0x377   : > { %v4305_v9 = vmax.f32 %v4232_v1, 0.0  ;;  %v4856_v5 = vpack.c.bf16 %v4304_v35, %v4300_v57  ;;  %v4236_v34 = vadd.f32 %v4235_v28, %v4123_v15  ;;  %v4143_v19 = vadd.f32 %v4142_v27, %v8796_v4 }
 0x378   : > { %v4144_v8 = vpop.f32.mrf.mxu0  ;;  %v4237_v23 = vpop.f32.mrf.mxu1 }
 0x379   : > { %v4857_v43 = vpack.c.bf16 %v4305_v9, %v4301_v12  ;;  %v4238_v59 = vadd.f32 %v4237_v23, %v4125_v18  ;;  %v4308_v32 = vmax.f32 %v4236_v34, 0.0  ;;  %v4145_v44 = vadd.f32 %v4144_v8, %v8785_v51 }
 0x37a   : > { %v4146_v37 = vpop.f32.mrf.mxu0  ;;  %v4239_v16 = vpop.f32.mrf.mxu1 }
 0x37b   : > { %v4240_v7 = vadd.f32 %v4239_v16, %v4127_v13  ;;  %5027 = vmatprep.mubr.bf16.mxu1 %v4857_v43  ;;  %v4309_v38 = vmax.f32 %v4238_v59, 0.0  ;;  %v4147_v48 = vadd.f32 %v4146_v37, %v8796_v4 }
 0x37c   : > { %v4148_v56 = vpop.f32.mrf.mxu0  ;;  %v4241_v50 = vpop.f32.mrf.mxu1  ;;  %5028 = vmatmul.mubr.bf16.gmra.mxu1 %v4856_v5 }
 0x37d   : > { %v4242_v30 = vadd.f32 %v4241_v50, %v4129_v22  ;;  %v4312_v20 = vmax.f32 %v4240_v7, 0.0  ;;  %v4149_v63 = vadd.f32 %v4148_v56, %v8785_v51 }
 0x37e   : > { %v4152_v36 = vpop.f32.mrf.mxu0  ;;  %v4245_v21 = vpop.f32.mrf.mxu1 }
 0x37f   : > { %v4313_v58 = vmax.f32 %v4242_v30, 0.0  ;;  %v4860_v40 = vpack.c.bf16 %v4312_v20, %v4308_v32  ;;  %v4246_v41 = vadd.f32 %v4245_v21, %v4133_v53  ;;  %v4153_v22 = vadd.f32 %v4152_v36, %v8796_v4 }
 0x380   : > { %v4154_v29 = vpop.f32.mrf.mxu0  ;;  %v4247_v17 = vpop.f32.mrf.mxu1 }
 0x381   : > { %v4861_v0 = vpack.c.bf16 %v4313_v58, %v4309_v38  ;;  %v4248_v11 = vadd.f32 %v4247_v17, %v4135_v10  ;;  %v4316_v46 = vmax.f32 %v4246_v41, 0.0  ;;  %v4155_v5 = vadd.f32 %v4154_v29, %v8785_v51 }
 0x382   : > { %v4156_v60 = vpop.f32.mrf.mxu0  ;;  %v4249_v31 = vpop.f32.mrf.mxu1 }
 0x383   : > { %v4250_v52 = vadd.f32 %v4249_v31, %v4137_v45  ;;  %5035 = vmatprep.mubr.bf16.mxu1 %v4861_v0  ;;  %v4317_v42 = vmax.f32 %v4248_v11, 0.0  ;;  %v4157_v37 = vadd.f32 %v4156_v60, %v8796_v4 }
 0x384   : > { %v4158_v3 = vpop.f32.mrf.mxu0  ;;  %v4251_v24 = vpop.f32.mrf.mxu1  ;;  %5036 = vmatmul.mubr.bf16.gmra.mxu1 %v4860_v40 }
 0x385   : > { %v4252_v26 = vadd.f32 %v4251_v24, %v4139_v14  ;;  %v4320_v2 = vmax.f32 %v4250_v52, 0.0  ;;  %v4159_v56 = vadd.f32 %v4158_v3, %v8785_v51 }
 0x386   : > { %v4255_v47 = vpop.f32.mrf.mxu1  ;;  %v9011_v55 = vpop.f32.mrf.mxu0 }
 0x387   : > { %v4321_v6 = vmax.f32 %v4252_v26, 0.0  ;;  %v4864_v62 = vpack.c.bf16 %v4320_v2, %v4316_v46  ;;  %v4256_v35 = vadd.f32 %v4255_v47, %v4143_v19  ;;  %v9027_v26 = vld [vmem:[%s9155_s6] ss:$0 sm:$0xff] }
 0x388   : > { %v4257_v39 = vpop.f32.mrf.mxu1  ;;  %v5780_v49 = vpop.f32.mrf.mxu0 }
 0x389   : > { %v4865_v25 = vpack.c.bf16 %v4321_v6, %v4317_v42  ;;  %v4258_v61 = vadd.f32 %v4257_v39, %v4145_v44  ;;  %v4324_v43 = vmax.f32 %v4256_v35, 0.0  ;;  %v5781_v41 = vadd.f32 %v5780_v49, %v9011_v55 }
 0x38a   : > { %v4259_v54 = vpop.f32.mrf.mxu1  ;;  %v5782_v33 = vpop.f32.mrf.mxu0 }
 0x38b   : > { %v4260_v1 = vadd.f32 %v4259_v54, %v4147_v48  ;;  %5043 = vmatprep.mubr.bf16.mxu1 %v4865_v25  ;;  %v4325_v18 = vmax.f32 %v4258_v61, 0.0  ;;  %v4603_v46 = vadd.f32 %v5781_v41, %v9027_v26 }
 0x38c   : > { %v4261_v28 = vpop.f32.mrf.mxu1  ;;  %v5783_v12 = vpop.f32.mrf.mxu0  ;;  %5044 = vmatmul.mubr.bf16.gmra.mxu1 %v4864_v62 }
 0x38d   : > { %v4262_v9 = vadd.f32 %v4261_v28, %v4149_v63  ;;  %v4328_v57 = vmax.f32 %v4260_v1, 0.0  ;;  %v5784_v3 = vadd.f32 %v5783_v12, %v5782_v33 }
 0x38e   : > { %v4265_v8 = vpop.f32.mrf.mxu1  ;;  %v5785_v23 = vpop.f32.mrf.mxu0 }
 0x38f   : > { %v4329_v13 = vmax.f32 %v4262_v9, 0.0  ;;  %v4868_v59 = vpack.c.bf16 %v4328_v57, %v4324_v43  ;;  %v4266_v20 = vadd.f32 %v4265_v8, %v4153_v22  ;;  %v4606_v39 = vadd.f32 %v5784_v3, %v9027_v26 }
 0x390   : > { %v4267_v27 = vpop.f32.mrf.mxu1  ;;  %v5786_v15 = vpop.f32.mrf.mxu0 }
 0x391   : > { %v4869_v16 = vpack.c.bf16 %v4329_v13, %v4325_v18  ;;  %v4268_v50 = vadd.f32 %v4267_v27, %v4155_v5  ;;  %v4332_v45 = vmax.f32 %v4266_v20, 0.0  ;;  %v5787_v54 = vadd.f32 %v5786_v15, %v5785_v23 }
 0x392   : > { %v4269_v7 = vpop.f32.mrf.mxu1  ;;  %v5788_v34 = vpop.f32.mrf.mxu0 }
 0x393   : > { %v4270_v30 = vadd.f32 %v4269_v7, %v4157_v37  ;;  %5051 = vmatprep.mubr.bf16.mxu1 %v4869_v16  ;;  %v4333_v17 = vmax.f32 %v4268_v50, 0.0  ;;  %v4611_v12 = vadd.f32 %v5787_v54, %v9027_v26 }
 0x394   : > { %v4271_v21 = vpop.f32.mrf.mxu1  ;;  %v5789_v38 = vpop.f32.mrf.mxu0  ;;  %5052 = vmatmul.mubr.bf16.gmra.mxu1 %v4868_v59 }
 0x395   : > { %v4272_v58 = vadd.f32 %v4271_v21, %v4159_v56  ;;  %v4336_v32 = vmax.f32 %v4270_v30, 0.0  ;;  %v5790_v33 = vadd.f32 %v5789_v38, %v5788_v34 }
 0x396   : > { %v5791_v29 = vpop.f32.mrf.mxu0 }
 0x397   : > { %v4337_v10 = vmax.f32 %v4272_v58, 0.0  ;;  %v4872_v36 = vpack.c.bf16 %v4336_v32, %v4332_v45  ;;  %v4614_v9 = vadd.f32 %v5790_v33, %v9027_v26 }
 0x398   : > { %v5792_v0 = vpop.f32.mrf.mxu0 }
 0x399   : > { %v4873_v4 = vpack.c.bf16 %v4337_v10, %v4333_v17  ;;  %v5793_v27 = vadd.f32 %v5792_v0, %v5791_v29 }
 0x39a   : > { %v5794_v53 = vpop.f32.mrf.mxu0 }
 0x39b   : > { %5059 = vmatprep.mubr.bf16.mxu1 %v4873_v4  ;;  %v4619_v7 = vadd.f32 %v5793_v27, %v9027_v26 }
 0x39c   : > { %v5795_v40 = vpop.f32.mrf.mxu0  ;;  %5060 = vmatmul.mubr.bf16.gmra.mxu1 %v4872_v36 }
 0x39d   : > { %v5796_v15 = vadd.f32 %v5795_v40, %v5794_v53 }
 0x39e   : > { %v5797_v51 = vpop.f32.mrf.mxu0 }
 0x39f   : > { %v4622_v34 = vadd.f32 %v5796_v15, %v9027_v26 }
 0x3a0   : > { %v5798_v60 = vpop.f32.mrf.mxu0 }
 0x3a1   : > { %v5799_v58 = vadd.f32 %v5798_v60, %v5797_v51 }
 0x3a2   : > { %v5800_v31 = vpop.f32.mrf.mxu0 }
 0x3a3   : > { %v5843_v14 = vpop.f32.mrf.mxu1  ;;  %v4627_v4 = vadd.f32 %v5799_v58, %v9027_v26 }
 0x3a4   : > { %v5801_v11 = vpop.f32.mrf.mxu0 }
 0x3a5   : > { %v5844_v52 = vpop.f32.mrf.mxu1  ;;  %v5802_v32 = vadd.f32 %v5801_v11, %v5800_v31 }
 0x3a6   : > { %v9022_v24 = vpop.f32.mrf.mxu0  ;;  %v5845_v47 = vadd.f32 %v5844_v52, %v5843_v14 }
 0x3a7   : > { %v5846_v2 = vpop.f32.mrf.mxu1  ;;  %v4630_v36 = vadd.f32 %v5802_v32, %v9027_v26 }
 0x3a8   : > { %v5804_v42 = vpop.f32.mrf.mxu0  ;;  %v4700_v49 = vadd.f32 %v5845_v47, %v4603_v46 }
 0x3a9   : > { %v5847_v6 = vpop.f32.mrf.mxu1  ;;  %v5805_v51 = vadd.f32 %v5804_v42, %v9022_v24 }
 0x3aa   : > { %v5806_v44 = vpop.f32.mrf.mxu0  ;;  %v5848_v48 = vadd.f32 %v5847_v6, %v5846_v2 }
 0x3ab   : > { %v5849_v55 = vpop.f32.mrf.mxu1  ;;  %v4635_v46 = vadd.f32 %v5805_v51, %v9027_v26 }
 0x3ac   : > { %v4703_v25 = vadd.f32 %v5848_v48, %v4606_v39  ;;  %v5807_v19 = vpop.f32.mrf.mxu0 }
 0x3ad   : > { %v5850_v62 = vpop.f32.mrf.mxu1  ;;  %v5808_v60 = vadd.f32 %v5807_v19, %v5806_v44 }
 0x3ae   : > { %v5671_v63 = vpack.c.bf16 %v4703_v25, %v4700_v49  ;;  %v5809_v61 = vpop.f32.mrf.mxu0  ;;  %v5851_v35 = vadd.f32 %v5850_v62, %v5849_v55 }
 0x3af   : > { %v5852_v1 = vpop.f32.mrf.mxu1  ;;  %v4638_v39 = vadd.f32 %v5808_v60, %v9027_v26 }
 0x3b0   : > { %5672 = vst [vmem:[%s9032_s19] sm:$0xff] %v5671_v63   ;;  %v5810_v8 = vpop.f32.mrf.mxu0  ;;  %v4708_v13 = vadd.f32 %v5851_v35, %v4611_v12 }
 0x3b1   : > { %v5853_v28 = vpop.f32.mrf.mxu1  ;;  %v5811_v33 = vadd.f32 %v5810_v8, %v5809_v61 }
 0x3b2   : > { %v5854_v57 = vadd.f32 %v5853_v28, %v5852_v1  ;;  %v5812_v37 = vpop.f32.mrf.mxu0 }
 0x3b3   : > { %v5855_v18 = vpop.f32.mrf.mxu1  ;;  %v4643_v35 = vadd.f32 %v5811_v33, %v9027_v26 }
 0x3b4   : > { %v4711_v23 = vadd.f32 %v5854_v57, %v4614_v9  ;;  %v5813_v50 = vpop.f32.mrf.mxu0 }
 0x3b5   : > { %v5856_v43 = vpop.f32.mrf.mxu1  ;;  %v5814_v24 = vadd.f32 %v5813_v50, %v5812_v37 }
 0x3b6   : > { %v5676_v5 = vpack.c.bf16 %v4711_v23, %v4708_v13  ;;  %v5857_v22 = vadd.f32 %v5856_v43, %v5855_v18  ;;  %v5815_v17 = vpop.f32.mrf.mxu0 }
 0x3b7   : > { %v5858_v16 = vpop.f32.mrf.mxu1  ;;  %v4646_v28 = vadd.f32 %v5814_v24, %v9027_v26 }
 0x3b8   : > { %5748 = vst [vmem:[%s9032_s19 + $0x8] sm:$0xff] %v5676_v5   ;;  %v4716_v20 = vadd.f32 %v5857_v22, %v4619_v7  ;;  %v5816_v40 = vpop.f32.mrf.mxu0 }
 0x3b9   : > { %v5859_v59 = vpop.f32.mrf.mxu1  ;;  %v5817_v43 = vadd.f32 %v5816_v40, %v5815_v17 }
 0x3ba   : > { %v5860_v56 = vadd.f32 %v5859_v59, %v5858_v16  ;;  %v5818_v11 = vpop.f32.mrf.mxu0 }
 0x3bb   : > { %v5861_v30 = vpop.f32.mrf.mxu1  ;;  %v4651_v16 = vadd.f32 %v5817_v43, %v9027_v26 }
 0x3bc   : > { %v4719_v21 = vadd.f32 %v5860_v56, %v4622_v34  ;;  %v5819_v55 = vpop.f32.mrf.mxu0 }
 0x3bd   : > { %v5862_v38 = vpop.f32.mrf.mxu1  ;;  %v5820_v61 = vadd.f32 %v5819_v55, %v5818_v11 }
 0x3be   : > { %v5681_v29 = vpack.c.bf16 %v4719_v21, %v4716_v20  ;;  %v5863_v45 = vadd.f32 %v5862_v38, %v5861_v30  ;;  %v5821_v44 = vpop.f32.mrf.mxu0 }
 0x3bf   : > { %v5864_v10 = vpop.f32.mrf.mxu1  ;;  %v4654_v22 = vadd.f32 %v5820_v61, %v9027_v26 }
 0x3c0   : > { %5749 = vst [vmem:[%s9032_s19 + $0x10] sm:$0xff] %v5681_v29   ;;  %v4724_v52 = vadd.f32 %v5863_v45, %v4627_v4  ;;  %v5822_v9 = vpop.f32.mrf.mxu0 }
 0x3c1   : > { %v5865_v0 = vpop.f32.mrf.mxu1  ;;  %v5823_v20 = vadd.f32 %v5822_v9, %v5821_v44 }
 0x3c2   : > { %v5866_v53 = vadd.f32 %v5865_v0, %v5864_v10  ;;  %v5824_v27 = vpop.f32.mrf.mxu0 }
 0x3c3   : > { %v5867_v14 = vpop.f32.mrf.mxu1  ;;  %v4659_v17 = vadd.f32 %v5823_v20, %v9027_v26 }
 0x3c4   : > { %v4727_v41 = vadd.f32 %v5866_v53, %v4630_v36  ;;  %v5825_v7 = vpop.f32.mrf.mxu0 }
 0x3c5   : > { %v5868_v3 = vpop.f32.mrf.mxu1  ;;  %v5826_v21 = vadd.f32 %v5825_v7, %v5824_v27 }
 0x3c6   : > { %v5686_v31 = vpack.c.bf16 %v4727_v41, %v4724_v52  ;;  %v5869_v47 = vadd.f32 %v5868_v3, %v5867_v14 }
 0x3c7   : > { %v5870_v2 = vpop.f32.mrf.mxu1  ;;  %v4662_v10 = vadd.f32 %v5826_v21, %v9027_v26 }
 0x3c8   : > { %5750 = vst [vmem:[%s9032_s19 + $0x18] sm:$0xff] %v5686_v31   ;;  %v4732_v25 = vadd.f32 %v5869_v47, %v4635_v46 }
 0x3c9   : > { %v5871_v6 = vpop.f32.mrf.mxu1 }
 0x3ca   : > { %v5872_v48 = vadd.f32 %v5871_v6, %v5870_v2 }
 0x3cb   : > { %v5873_v49 = vpop.f32.mrf.mxu1 }
 0x3cc   : > { %v4735_v62 = vadd.f32 %v5872_v48, %v4638_v39 }
 0x3cd   : > { %v5874_v54 = vpop.f32.mrf.mxu1 }
 0x3ce   : > { %v5691_v42 = vpack.c.bf16 %v4735_v62, %v4732_v25  ;;  %v5875_v63 = vadd.f32 %v5874_v54, %v5873_v49 }
 0x3cf   : > { %v5876_v19 = vpop.f32.mrf.mxu1 }
 0x3d0   : > { %5751 = vst [vmem:[%s9032_s19 + $0x20] sm:$0xff] %v5691_v42   ;;  %v4740_v18 = vadd.f32 %v5875_v63, %v4643_v35 }
 0x3d1   : > { %v5877_v1 = vpop.f32.mrf.mxu1 }
 0x3d2   : > { %v5878_v12 = vadd.f32 %v5877_v1, %v5876_v19 }
 0x3d3   : > { %v5879_v57 = vpop.f32.mrf.mxu1 }
 0x3d4   : > { %v4743_v13 = vadd.f32 %v5878_v12, %v4646_v28 }
 0x3d5   : > { %v5880_v23 = vpop.f32.mrf.mxu1 }
 0x3d6   : > { %v5696_v8 = vpack.c.bf16 %v4743_v13, %v4740_v18  ;;  %v5881_v5 = vadd.f32 %v5880_v23, %v5879_v57 }
 0x3d7   : > { %v5882_v15 = vpop.f32.mrf.mxu1 }
 0x3d8   : > { %5752 = vst [vmem:[%s9032_s19 + $0x28] sm:$0xff] %v5696_v8   ;;  %v4748_v56 = vadd.f32 %v5881_v5, %v4651_v16 }
 0x3d9   : > { %v5883_v37 = vpop.f32.mrf.mxu1 }
 0x3da   : > { %v5884_v59 = vadd.f32 %v5883_v37, %v5882_v15 }
 0x3db   : > { %v5885_v34 = vpop.f32.mrf.mxu1 }
 0x3dc   : > { %v4751_v50 = vadd.f32 %v5884_v59, %v4654_v22 }
 0x3dd   : > { %v5886_v30 = vpop.f32.mrf.mxu1 }
 0x3de   : > { %v5701_v38 = vpack.c.bf16 %v4751_v50, %v4748_v56  ;;  %v5887_v32 = vadd.f32 %v5886_v30, %v5885_v34 }
 0x3df   : > { %v5888_v58 = vpop.f32.mrf.mxu1 }
 0x3e0   : > { %5753 = vst [vmem:[%s9032_s19 + $0x30] sm:$0xff] %v5701_v38   ;;  %v4756_v0 = vadd.f32 %v5887_v32, %v4659_v17 }
 0x3e1   : > { %v5889_v29 = vpop.f32.mrf.mxu1 }
 0x3e2   : > { %v5890_v45 = vadd.f32 %v5889_v29, %v5888_v58 }
 0x3e4   : > { %v4759_v4 = vadd.f32 %v5890_v45, %v4662_v10  ;;  %v5907_v36 = vpop.f32.mrf.mxu0 }
 0x3e6   : > { %v5706_v53 = vpack.c.bf16 %v4759_v4, %v4756_v0  ;;  %v5908_v40 = vpop.f32.mrf.mxu0 }
 0x3e7   : > { %v5909_v54 = vadd.f32 %v5908_v40, %v5907_v36 }
 0x3e8   : > { %5754 = vst [vmem:[%s9032_s19 + $0x38] sm:$0xff] %v5706_v53   ;;  %v5910_v14 = vpop.f32.mrf.mxu0 }
 0x3e9   : > { %v4909_v63 = vadd.f32 %v5909_v54, %v9027_v26 }
 0x3ea   : > { %v5911_v52 = vpop.f32.mrf.mxu0 }
 0x3eb   : > { %v5912_v33 = vadd.f32 %v5911_v52, %v5910_v14 }
 0x3ec   : > { %v5913_v41 = vpop.f32.mrf.mxu0 }
 0x3ed   : > { %v4912_v1 = vadd.f32 %v5912_v33, %v9027_v26 }
 0x3ee   : > { %v5914_v3 = vpop.f32.mrf.mxu0 }
 0x3ef   : > { %v5915_v13 = vadd.f32 %v5914_v3, %v5913_v41 }
 0x3f0   : > { %v5916_v51 = vpop.f32.mrf.mxu0 }
 0x3f1   : > { %v4917_v5 = vadd.f32 %v5915_v13, %v9027_v26 }
 0x3f2   : > { %v5917_v60 = vpop.f32.mrf.mxu0 }
 0x3f3   : > { %v5918_v23 = vadd.f32 %v5917_v60, %v5916_v51 }
 0x3f4   : > { %v5919_v31 = vpop.f32.mrf.mxu0 }
 0x3f5   : > { %v4920_v37 = vadd.f32 %v5918_v23, %v9027_v26 }
 0x3f6   : > { %v5920_v11 = vpop.f32.mrf.mxu0 }
 0x3f7   : > { %v5921_v50 = vadd.f32 %v5920_v11, %v5919_v31 }
 0x3f8   : > { %v5922_v2 = vpop.f32.mrf.mxu0 }
 0x3f9   : > { %v4925_v29 = vadd.f32 %v5921_v50, %v9027_v26 }
 0x3fa   : > { %v5923_v47 = vpop.f32.mrf.mxu0 }
 0x3fb   : > { %v5924_v30 = vadd.f32 %v5923_v47, %v5922_v2 }
 0x3fc   : > { %v5925_v6 = vpop.f32.mrf.mxu0 }
 0x3fd   : > { %v4928_v17 = vadd.f32 %v5924_v30, %v9027_v26 }
 0x3fe   : > { %v5926_v46 = vpop.f32.mrf.mxu0 }
 0x3ff   : > { %v5927_v40 = vadd.f32 %v5926_v46, %v5925_v6 }
 0x400   : > { %v5928_v39 = vpop.f32.mrf.mxu0 }
 0x401   : > { %v4933_v31 = vadd.f32 %v5927_v40, %v9027_v26 }
 0x402   : > { %v5929_v48 = vpop.f32.mrf.mxu0 }
 0x403   : > { %v5930_v14 = vadd.f32 %v5929_v48, %v5928_v39 }
 0x404   : > { %v9057_v55 = vpop.f32.mrf.mxu0 }
 0x405   : > { %v4936_v11 = vadd.f32 %v5930_v14, %v9027_v26 }
 0x406   : > { %v9059_v49 = vpop.f32.mrf.mxu0 }
 0x407   : > { %v5933_v6 = vadd.f32 %v9059_v49, %v9057_v55 }
 0x408   : > { %v5934_v24 = vpop.f32.mrf.mxu0 }
 0x40a   : > { %v5935_v28 = vpop.f32.mrf.mxu0 }
 0x40b   : > { %v5936_v46 = vadd.f32 %v5935_v28, %v5934_v24 }
 0x40c   : > { %v5937_v61 = vpop.f32.mrf.mxu0 }
 0x40e   : > { %v5938_v22 = vpop.f32.mrf.mxu0 }
 0x40f   : > { %v5939_v23 = vadd.f32 %v5938_v22, %v5937_v61 }
 0x410   : > { %v5940_v21 = vpop.f32.mrf.mxu0 }
 0x412   : > { %v5941_v45 = vpop.f32.mrf.mxu0 }
 0x413   : > { %v5942_v55 = vadd.f32 %v5941_v45, %v5940_v21 }
 0x414   : > { %v5943_v41 = vpop.f32.mrf.mxu0 }
 0x416   : > { %v5944_v47 = vpop.f32.mrf.mxu0 }
 0x418   : > { %v5946_v48 = vpop.f32.mrf.mxu0 }
 0x424   : > { %v5971_v25 = vpop.f32.mrf.mxu1 }
 0x426   : > { %v5972_v62 = vpop.f32.mrf.mxu1 }
 0x427   : > { %v5973_v44 = vadd.f32 %v5972_v62, %v5971_v25 }
 0x428   : > { %v5974_v42 = vpop.f32.mrf.mxu1 }
 0x429   : > { %v5006_v9 = vadd.f32 %v5973_v44, %v4909_v63  ;;  %v4941_v63 = vadd.f32 %v5933_v6, %v9027_v26 }
 0x42a   : > { %v5975_v19 = vpop.f32.mrf.mxu1 }
 0x42b   : > { %v5976_v35 = vadd.f32 %v5975_v19, %v5974_v42 }
 0x42c   : > { %v5977_v12 = vpop.f32.mrf.mxu1 }
 0x42d   : > { %v5009_v57 = vadd.f32 %v5976_v35, %v4912_v1  ;;  %v4944_v1 = vadd.f32 %v5936_v46, %v9027_v26 }
 0x42e   : > { %v5978_v18 = vpop.f32.mrf.mxu1 }
 0x42f   : > { %v5711_v43 = vpack.c.bf16 %v5009_v57, %v5006_v9  ;;  %v5979_v27 = vadd.f32 %v5978_v18, %v5977_v12  ;;  %v5947_v12 = vpop.f32.mrf.mxu0 }
 0x430   : > { %v5980_v8 = vpop.f32.mrf.mxu1  ;;  %v5948_v61 = vadd.f32 %v5947_v12, %v5946_v48 }
 0x431   : > { %5755 = vst [vmem:[%s9032_s19 + $0x40] sm:$0xff] %v5711_v43   ;;  %v5014_v7 = vadd.f32 %v5979_v27, %v4917_v5  ;;  %v5949_v24 = vpop.f32.mrf.mxu0  ;;  %v4949_v27 = vadd.f32 %v5939_v23, %v9027_v26 }
 0x432   : > { %v5981_v15 = vpop.f32.mrf.mxu1 }
 0x433   : > { %v5982_v16 = vadd.f32 %v5981_v15, %v5980_v8  ;;  %v4952_v15 = vadd.f32 %v5942_v55, %v9027_v26 }
 0x434   : > { %v5983_v59 = vpop.f32.mrf.mxu1 }
 0x435   : > { %v5017_v34 = vadd.f32 %v5982_v16, %v4920_v37  ;;  %v5950_v37 = vpop.f32.mrf.mxu0 }
 0x436   : > { %v5984_v56 = vpop.f32.mrf.mxu1 }
 0x437   : > { %v5716_v20 = vpack.c.bf16 %v5017_v34, %v5014_v7  ;;  %v5985_v58 = vadd.f32 %v5984_v56, %v5983_v59  ;;  %v5945_v56 = vadd.f32 %v5944_v47, %v5943_v41  ;;  %v5952_v50 = vpop.f32.mrf.mxu0 }
 0x438   : > { %v5986_v38 = vpop.f32.mrf.mxu1 }
 0x439   : > { %5756 = vst [vmem:[%s9032_s19 + $0x48] sm:$0xff] %v5716_v20   ;;  %v5022_v4 = vadd.f32 %v5985_v58, %v4925_v29  ;;  %v4960_v58 = vadd.f32 %v5948_v61, %v9027_v26  ;;  %v5953_v29 = vpop.f32.mrf.mxu0 }
 0x43a   : > { %v5987_v32 = vpop.f32.mrf.mxu1 }
 0x43b   : > { %v5988_v10 = vadd.f32 %v5987_v32, %v5986_v38  ;;  %v4957_v38 = vadd.f32 %v5945_v56, %v9027_v26 }
 0x43c   : > { %v5989_v0 = vpop.f32.mrf.mxu1 }
 0x43d   : > { %v5025_v36 = vadd.f32 %v5988_v10, %v4928_v17 }
 0x43e   : > { %v5990_v53 = vpop.f32.mrf.mxu1 }
 0x43f   : > { %v5721_v52 = vpack.c.bf16 %v5025_v36, %v5022_v4  ;;  %v5991_v51 = vadd.f32 %v5990_v53, %v5989_v0  ;;  %v5951_v4 = vadd.f32 %v5950_v37, %v5949_v24  ;;  %v5954_v36 = vadd.f32 %v5953_v29, %v5952_v50 }
 0x440   : > { %v5992_v3 = vpop.f32.mrf.mxu1 }
 0x441   : > { %5757 = vst [vmem:[%s9032_s19 + $0x50] sm:$0xff] %v5721_v52   ;;  %v5030_v62 = vadd.f32 %v5991_v51, %v4933_v31  ;;  %v4965_v41 = vadd.f32 %v5951_v4, %v9027_v26 }
 0x442   : > { %v5993_v60 = vpop.f32.mrf.mxu1 }
 0x443   : > { %v5994_v2 = vadd.f32 %v5993_v60, %v5992_v3  ;;  %v4968_v3 = vadd.f32 %v5954_v36, %v9027_v26 }
 0x444   : > { %v5995_v25 = vpop.f32.mrf.mxu1 }
 0x445   : > { %v5033_v54 = vadd.f32 %v5994_v2, %v4936_v11 }
 0x446   : > { %v5996_v33 = vpop.f32.mrf.mxu1 }
 0x447   : > { %v5726_v39 = vpack.c.bf16 %v5033_v54, %v5030_v62  ;;  %v5997_v44 = vadd.f32 %v5996_v33, %v5995_v25 }
 0x448   : > { %v5998_v42 = vpop.f32.mrf.mxu1 }
 0x449   : > { %5758 = vst [vmem:[%s9032_s19 + $0x58] sm:$0xff] %v5726_v39   ;;  %v5038_v57 = vadd.f32 %v5997_v44, %v4941_v63 }
 0x44a   : > { %v5999_v19 = vpop.f32.mrf.mxu1 }
 0x44b   : > { %v6000_v35 = vadd.f32 %v5999_v19, %v5998_v42 }
 0x44c   : > { %v6001_v9 = vpop.f32.mrf.mxu1 }
 0x44d   : > { %v5041_v18 = vadd.f32 %v6000_v35, %v4944_v1 }
 0x44e   : > { %v6002_v13 = vpop.f32.mrf.mxu1 }
 0x44f   : > { %v5731_v49 = vpack.c.bf16 %v5041_v18, %v5038_v57  ;;  %v6003_v43 = vadd.f32 %v6002_v13, %v6001_v9 }
 0x450   : > { %v6004_v28 = vpop.f32.mrf.mxu1 }
 0x451   : > { %5759 = vst [vmem:[%s9032_s19 + $0x60] sm:$0xff] %v5731_v49   ;;  %v5046_v59 = vadd.f32 %v6003_v43, %v4949_v27 }
 0x452   : > { %v6005_v8 = vpop.f32.mrf.mxu1 }
 0x453   : > { %v6006_v5 = vadd.f32 %v6005_v8, %v6004_v28 }
 0x454   : > { %v6007_v16 = vpop.f32.mrf.mxu1 }
 0x455   : > { %v5049_v7 = vadd.f32 %v6006_v5, %v4952_v15 }
 0x456   : > { %v6008_v34 = vpop.f32.mrf.mxu1 }
 0x457   : > { %v5736_v22 = vpack.c.bf16 %v5049_v7, %v5046_v59  ;;  %v6009_v20 = vadd.f32 %v6008_v34, %v6007_v16 }
 0x458   : > { %v6010_v30 = vpop.f32.mrf.mxu1 }
 0x459   : > { %5760 = vst [vmem:[%s9032_s19 + $0x68] sm:$0xff] %v5736_v22   ;;  %v5054_v10 = vadd.f32 %v6009_v20, %v4957_v38 }
 0x45a   : > { %v6011_v21 = vpop.f32.mrf.mxu1 }
 0x45b   : > { %v6012_v32 = vadd.f32 %v6011_v21, %v6010_v30 }
 0x45c   : > { %v6013_v17 = vpop.f32.mrf.mxu1 }
 0x45d   : > { %v5057_v45 = vadd.f32 %v6012_v32, %v4960_v58 }
 0x45e   : > { %v6014_v0 = vpop.f32.mrf.mxu1 }
 0x45f   : > { %v5741_v53 = vpack.c.bf16 %v5057_v45, %v5054_v10  ;;  %v6015_v14 = vadd.f32 %v6014_v0, %v6013_v17 }
 0x460   : > { %v6016_v40 = vpop.f32.mrf.mxu1 }
 0x461   : > { %5761 = vst [vmem:[%s9032_s19 + $0x70] sm:$0xff] %v5741_v53   ;;  %v5062_v60 = vadd.f32 %v6015_v14, %v4965_v41 }
 0x462   : > { %v6017_v52 = vpop.f32.mrf.mxu1 }
 0x463   : > { %v6018_v51 = vadd.f32 %v6017_v52, %v6016_v40 }
 0x465   : > { %v5065_v31 = vadd.f32 %v6018_v51, %v4968_v3  ;;  %5155 = sbr.rel (!%p9322_p12) target bundleno = 1157 (0x485), region = 72 }
 0x467   : > { %v5746_v11 = vpack.c.bf16 %v5065_v31, %v5062_v60 }
 0x469   : > { %5762 = vst [vmem:[%s9032_s19 + $0x78] sm:$0xff] %v5746_v11  }
 0x46a   : > { %s9331_s1 = smov (!%p5158_p4, %s5157_s1), 32 }
 0x46b   : > { %s9091_s23 = sshll.u32 %s9331_s1, 6 }
 0x46c   : > { %s5162_s2 = ssub.s32 2048, %s9091_s23 }
 0x46d   : > { %5163 = vsyncadd %s5149_s22, %s5162_s2  ;;  %p5626_p8 = scmp.ne.s32.totalorder %s9091_s23, 0  ;;  %s5667_s13 = sshll.u32 %s7042_s28, 11 }
 0x46e   : > { %s9101_s9 = scalar_lea.hbm %s9156_s7, %s5667_s13  ;;  %s5168_s8 = sshll.u32 %s9032_s19, 4  ;;  %s9104_s8 = int_to_ptr.vmem [resolvable:$true] %s5168_s8 }
 0x46f   : > { %s6893_s12 = scalar_lea.vmem %s9104_s8, %s9091_s23  ;;  %s6978_s15 = smov [#allocation11]  }
 0x470   : > { %p6894_p11 = scmp.ne.s32.totalorder %s9104_s8, %s6893_s12  ;;  %s6897_s18 = sshll.u32 %s6978_s15, 4  ;;  %s6898_s18 = int_to_ptr.vmem [resolvable:$false] %s6897_s18 }
 0x471   : > { %s6899_s28 = scalar_lea.vmem %s6898_s18, 4096  ;;  %p6900_p0 = scmp.lt.s32.totalorder %s9104_s8, %s6898_s18 }
 0x472   : > { %p6895_p13 = pnand %p6894_p11, %p5626_p8  ;;  %p6901_p10 = scmp.lt.s32.totalorder %s6899_s28, %s6893_s12 }
 0x474   : > { %p6896_p2 = pneg %p6895_p13  ;;  %p6902_p1 = por %p6901_p10, %p6900_p0 }
 0x476   : > { %p6903_p5 = pnand %p6902_p1, %p6896_p2 }
 0x478   : > { %6906 = shalt.err (!%p6903_p5)
}
 0x479   : > { %s6907_s20 = scalar_lea.hbm %s9101_s9, %s9091_s23  ;;  %s6911_s11 = scalar_lea.hbm %s9156_s7, 2432 }
 0x47a   : > { %p6908_p3 = scmp.ne.s32.totalorder %s9101_s9, %s6907_s20  ;;  %p6912_p12 = scmp.lt.s32.totalorder %s9101_s9, %s9156_s7 }
 0x47b   : > { %p6913_p4 = scmp.lt.s32.totalorder %s6911_s11, %s6907_s20 }
 0x47c   : > { %p6909_p7 = pnand %p6908_p3, %p5626_p8 }
 0x47d   : > { %p6914_p11 = por %p6913_p4, %p6912_p12 }
 0x47e   : > { %p6910_p9 = pneg %p6909_p7 }
 0x480   : > { %p6915_p13 = pnand %p6914_p11, %p6910_p9 }
 0x482   : > { %6918 = shalt.err (!%p6915_p13)
}
 0x483   : > { %s6979_s13 = smov 64   ;;  %s6980_s21 = smov 4  }
 0x484   : > { %5174 = dma.vmem_to_hbm [thread:$0]  (%p5626_p8), %s9104_s8, %s9091_s23, %s9101_s9, %s5149_s22, %s6979_s13, %s6979_s13, %s6980_s21  }
 0x485 PF: > { %s5183_s29 = sand.u32 1, %s6953_s24   ;;  %p9323_p2 = scmp.ne.s32.totalorder %s9194_s14, 0 }
 0x486   : > { %s5184_s12 = scalar_lea.sflag [#allocation4], %s5183_s29 }
 0x487   : > { %p6051_p0 = pnand %p5285_p6, %p9323_p2 }
 0x489   : > { %p6052_p10 = pneg %p6051_p0 }
 0x48b   : > { %6948 = dma.done.wait (%p6052_p10), %s5184_s12, 2048  }
 0x48c   : > { %6950 = vsyncadd (%p6052_p10), %s5184_s12, 4294965248  ;;  %p22_p1 = scmp.ge.s32.totalorder %s7046_s30, 4   ;;  %s9324_s24 = smov %s6957_s25 }
 0x48d   : > { %s9325_s25 = smov %s6961_s26  ;;  %s9326_s26 = smov %s7058_s10 }
 0x48e   : > { %s9327_s27 = smov %s7046_s30  ;;  %24 = sbr.rel (!%p22_p1) target bundleno = 10 (0xa), region = 109 }
 0x493   :  { %5189 = vsyncpa [#allocation3], 1 }
 0x494   :  { %5191 = vsyncpa [#allocation3 + $0x1], 1 }
 0x495   :  { %5192 = vsyncpa [#allocation6], 1 }
 0x496   :  { %5193 = vsyncpa [#allocation9], 1 }
 0x497   :  { %5194 = vsyncpa [#allocation4], 1 }
 0x498   :  { %5196 = vsyncpa [#allocation4 + $0x1], 1 }

</bundles_post_ra>
